<compile_context>
chip_gen: v5e
topology: v5e:2x2
jax: 0.10.0
libtpu: 0.0.40
codegen_flags: <defaults>
</compile_context>

<pallas_src>
import functools

import jax
import jax.numpy as jnp
import jax.random as jr
import numpy as np
from jax.experimental import pallas as pl
from jax.experimental.pallas import tpu as pltpu


# -----------------------------------------------------------------------------
# Pallas kernel
# -----------------------------------------------------------------------------
def _make_kernel(batch_block, tokens_per_batch, exact_gelu):
  n_rows = batch_block * tokens_per_batch

  def kernel(x_ref, we_ref, w1a_ref, w2a_ref, w1b_ref, w2b_ref,
             vecs_ref, clsb_ref, out_ref):
    cdt = x_ref.dtype  # compute dtype of matmul operands (bf16 or f32)

    # One (8, D) f32 slab of all small row vectors (single DMA).
    vecs = vecs_ref[...]
    be, b1a, b2a = vecs[0:1], vecs[1:2], vecs[2:3]
    b1b, b2b = vecs[3:4], vecs[4:5]
    ln_g, ln_b, wd = vecs[5:6], vecs[6:7], vecs[7:8]

    # Patch embed: all tokens of this batch block as one MXU slab.
    rows = jnp.dot(x_ref[...], we_ref[...],
                   preferred_element_type=jnp.float32) + be

    def mlp(h, w1, b1, w2, b2):
      h1 = jnp.dot(h.astype(cdt), w1, preferred_element_type=jnp.float32) + b1
      h1 = jax.nn.gelu(h1, approximate=not exact_gelu)
      return jnp.dot(h1.astype(cdt), w2, preferred_element_type=jnp.float32) + b2

    rows = mlp(rows, w1a_ref[...], b1a, w2a_ref[...], b2a)
    rows = mlp(rows, w1b_ref[...], b1b, w2b_ref[...], b2b)

    # LayerNorm(embed_dim, eps=1e-6) in f32.
    mu = jnp.mean(rows, axis=-1, keepdims=True)
    var = jnp.mean(jnp.square(rows - mu), axis=-1, keepdims=True)
    rows = (rows - mu) * jax.lax.rsqrt(var + 1e-6) * ln_g + ln_b

    # Per-batch pooling: 0/1 selector generated in-kernel (iota + compare),
    # applied as a (batch_block, n_rows) @ (n_rows, D) MXU matmul.
    row_id = jax.lax.broadcasted_iota(jnp.int32, (batch_block, n_rows), 0)
    col_id = jax.lax.broadcasted_iota(jnp.int32, (batch_block, n_rows), 1)
    sel = jnp.logical_and(col_id >= row_id * tokens_per_batch,
                          col_id < (row_id + 1) * tokens_per_batch)
    pooled = jnp.dot(sel.astype(jnp.float32), rows,
                     preferred_element_type=jnp.float32)

    # decoder_pred Linear(D, 1): VPU multiply + lane reduce.  The batch-
    # invariant cls-token contribution (cls_row @ wd + bd) is a scalar in SMEM.
    out_ref[...] = (jnp.sum(pooled * wd, axis=-1, keepdims=True)
                    + clsb_ref[0, 0])

  return kernel


# -----------------------------------------------------------------------------
# Block-size heuristic
# -----------------------------------------------------------------------------
def _pick_batch_block(B, N, x_bytes_per_batch_elem, *, target_block_bytes=2 << 20):
  """Largest batch block that (a) divides B, (b) keeps (8,128)/(16,128) tiling
  legal with >1 grid step, and (c) gives >=4 (preferred, else >=2) grid steps
  so the x DMA pipelines and the parallel axis shards across TensorCores."""
  def legal(d):
    return B % d == 0 and d % 8 == 0 and (d * N) % 16 == 0
  cands = sorted((d for d in range(8, B, 8) if legal(d)), reverse=True)
  for min_steps in (4, 2):
    for d in cands:                       # biggest block under the VMEM budget
      if B // d >= min_steps and d * x_bytes_per_batch_elem <= target_block_bytes:
        return d
    for d in reversed(cands):             # else smallest block, still pipelined
      if B // d >= min_steps:
        return d
  return B                                # tiny batch: single grid step


# -----------------------------------------------------------------------------
# Wrapper
# -----------------------------------------------------------------------------
def critic_ppo_forward(x, params, *, exact_gelu=True, use_bf16=True,
                       batch_block=None):
  """x: (B, N, days, feats) float32  ->  value: (B,) float32."""
  B, N, days, feats = x.shape
  P = days * feats
  D = params["we"].shape[1]
  cdt = jnp.bfloat16 if use_bf16 else jnp.float32
  f32 = jnp.float32

  # Token slab (B*N, P).  No pad copy: the block's last dim == full array dim.
  xf = x.reshape(B * N, P).astype(cdt)

  if batch_block is None:
    batch_block = _pick_batch_block(B, N, N * P * xf.dtype.itemsize)
  if B % batch_block:
    raise ValueError("batch_block must divide B")
  nblk = B // batch_block
  if nblk > 1 and (batch_block % 8 or (batch_block * N) % 16):
    raise ValueError("with >1 grid step, batch_block must be a multiple of 8 "
                     "and batch_block*N a multiple of 16")
  rows_per_blk = batch_block * N

  # Matmul operands in bf16; everything else stays f32.
  we = params["we"].astype(cdt)
  w1a, w2a = params["w1a"].astype(cdt), params["w2a"].astype(cdt)
  w1b, w2b = params["w1b"].astype(cdt), params["w2b"].astype(cdt)

  # Batch-invariant cls-token path, computed once here in f32.  Its only
  # effect on the output is a scalar bias (cls_row @ wd + bd).
  def _mlp(h, w1, b1, w2, b2):
    h1 = jax.nn.gelu(h @ w1 + b1, approximate=not exact_gelu)
    return h1 @ w2 + b2
  cls = params["cls"].astype(f32)
  cls = _mlp(cls, params["w1a"].astype(f32), params["b1a"],
             params["w2a"].astype(f32), params["b2a"])
  cls = _mlp(cls, params["w1b"].astype(f32), params["b1b"],
             params["w2b"].astype(f32), params["b2b"])
  cmu = jnp.mean(cls, axis=-1, keepdims=True)
  cvar = jnp.mean(jnp.square(cls - cmu), axis=-1, keepdims=True)
  cls_row = ((cls - cmu) * jax.lax.rsqrt(cvar + 1e-6)
             * params["ln_g"] + params["ln_b"])                       # (1, D)
  cls_bias = (cls_row @ params["wd"] + params["bd"]).astype(f32)      # (1, 1)

  # All small (1, D) row vectors collapsed into one (8, D) f32 slab.
  wd_row = params["wd"].astype(f32).T                                 # (1, D)
  vecs = jnp.concatenate(
      [params["be"], params["b1a"], params["b2a"], params["b1b"],
       params["b2b"], params["ln_g"], params["ln_b"], wd_row], axis=0)

  kernel = _make_kernel(batch_block, N, exact_gelu)

  in_specs = [
      pl.BlockSpec((rows_per_blk, P), lambda i: (i, 0)),              # x tokens
      pl.BlockSpec((P, D), lambda i: (0, 0)),                         # patch embed
      pl.BlockSpec((D, D), lambda i: (0, 0)),                         # MLP0 fc1
      pl.BlockSpec((D, D), lambda i: (0, 0)),                         # MLP0 fc2
      pl.BlockSpec((D, D), lambda i: (0, 0)),                         # MLP1 fc1
      pl.BlockSpec((D, D), lambda i: (0, 0)),                         # MLP1 fc2
      pl.BlockSpec((8, D), lambda i: (0, 0)),                         # row-vector slab
      pl.BlockSpec(memory_space=pltpu.MemorySpace.SMEM),              # cls scalar
  ]
  out_spec = pl.BlockSpec((batch_block, 1), lambda i: (i, 0))

  operands = (xf, we, w1a, w2a, w1b, w2b, vecs, cls_bias)
  bytes_accessed = sum(int(a.size) * a.dtype.itemsize for a in operands) + B * 4
  flops = 2 * B * N * (P * D + 4 * D * D) + 2 * B * rows_per_blk * D + 2 * B * D
  cost = pl.CostEstimate(flops=int(flops),
                         transcendentals=int(2 * B * N * D),
                         bytes_accessed=int(bytes_accessed))

  out = pl.pallas_call(
      kernel,
      out_shape=jax.ShapeDtypeStruct((B, 1), jnp.float32),
      grid=(nblk,),
      in_specs=in_specs,
      out_specs=out_spec,
      compiler_params=pltpu.CompilerParams(
          dimension_semantics=("parallel",),
          vmem_limit_bytes=48 * 1024 * 1024),
      cost_estimate=cost,
  )(*operands)
  return out[:, 0]   # squeeze(-1)


# -----------------------------------------------------------------------------
# Pure-JAX reference (module-faithful structure, same dtype policy as kernel)
# -----------------------------------------------------------------------------
def critic_ppo_reference(x, p, *, exact_gelu=True, use_bf16=True):
  B, N, days, feats = x.shape
  D = p["we"].shape[1]
  cd = jnp.bfloat16 if use_bf16 else jnp.float32

  def mlp(h, w1, b1, w2, b2):
    h1 = jnp.dot(h.astype(cd), w1.astype(cd),
                 preferred_element_type=jnp.float32) + b1
    h1 = jax.nn.gelu(h1, approximate=not exact_gelu)
    return jnp.dot(h1.astype(cd), w2.astype(cd),
                   preferred_element_type=jnp.float32) + b2

  xf = x.reshape(B, N, days * feats).astype(jnp.float32)
  h = jnp.dot(xf.astype(cd), p["we"].astype(cd),
              preferred_element_type=jnp.float32) + p["be"]           # (B,N,D)
  cls = jnp.broadcast_to(p["cls"][None], (B, 1, D)).astype(jnp.float32)
  h = jnp.concatenate([cls, h], axis=1)                               # (B,N+1,D)
  h = mlp(h, p["w1a"], p["b1a"], p["w2a"], p["b2a"])
  h = mlp(h, p["w1b"], p["b1b"], p["w2b"], p["b2b"])
  mu = jnp.mean(h, axis=-1, keepdims=True)
  var = jnp.mean(jnp.square(h - mu), axis=-1, keepdims=True)
  h = (h - mu) * jax.lax.rsqrt(var + 1e-6) * p["ln_g"] + p["ln_b"]
  pooled = jnp.sum(h, axis=1)                                         # (B, D)
  return (pooled @ p["wd"] + p["bd"])[:, 0]


# -----------------------------------------------------------------------------
# Deterministic parameter init (matches __init__ shapes / _init_weights intent)
# -----------------------------------------------------------------------------
def init_params(key, *, patch_dim, embed_dim):
  ortho = jax.nn.initializers.orthogonal(scale=1.0)
  ks = jr.split(key, 8)
  bias = lambda n: jnp.full((1, n), 1e-6, jnp.float32)   # nn.init.constant_(bias, 1e-6)
  return {
      "we":  ortho(ks[0], (patch_dim, embed_dim), jnp.float32),
      "be":  bias(embed_dim),
      "cls": (0.02 * jr.truncated_normal(ks[1], -2.0, 2.0, (1, embed_dim))).astype(jnp.float32),
      "w1a": ortho(ks[2], (embed_dim, embed_dim), jnp.float32), "b1a": bias(embed_dim),
      "w2a": ortho(ks[3], (embed_dim, embed_dim), jnp.float32), "b2a": bias(embed_dim),
      "w1b": ortho(ks[4], (embed_dim, embed_dim), jnp.float32), "b1b": bias(embed_dim),
      "w2b": ortho(ks[5], (embed_dim, embed_dim), jnp.float32), "b2b": bias(embed_dim),
      "ln_g": jnp.ones((1, embed_dim), jnp.float32),
      "ln_b": jnp.zeros((1, embed_dim), jnp.float32),
      "wd":  ortho(ks[6], (embed_dim, 1), jnp.float32),
      "bd":  jnp.full((1, 1), 1e-6, jnp.float32),
  }


if __name__ == "__main__":
  # Small shapes consistent with the module's (batch, num_stocks, days, feats)
  # input; embed_dim matches the module default (128) so the MXU lane dim is
  # full, and B/N give a 4-step parallel grid (pipelined x DMA, megacore-able).
  B, N, DAYS, FEATS, EMBED = 32, 32, 10, 12, 128
  key = jr.PRNGKey(0)
  kx, kp = jr.split(key)
  x = jr.normal(kx, (B, N, DAYS, FEATS), dtype=jnp.float32)
  params = init_params(kp, patch_dim=DAYS * FEATS, embed_dim=EMBED)

  fwd = jax.jit(critic_ppo_forward,
                static_argnames=("exact_gelu", "use_bf16", "batch_block"))

  # PyTorch nn.GELU default is the exact (erf) form.  If exact erf is not
  # lowerable on this Mosaic build, fall back to the tanh approximation and
  # use the SAME mode for the reference so the check stays apples-to-apples.
  # TODO(synk): surface this fallback to callers (it changes numerics vs torch).
  try:
    value = jax.block_until_ready(fwd(x, params, exact_gelu=True))
    used_exact = True
  except Exception:
    value = jax.block_until_ready(fwd(x, params, exact_gelu=False))
    used_exact = False

  ref = jax.block_until_ready(
      critic_ppo_reference(x, params, exact_gelu=used_exact, use_bf16=True))
  np.testing.assert_allclose(np.asarray(value), np.asarray(ref),
                             rtol=1e-2, atol=1e-2)
  assert value.shape == (B,)
  print("KERNEL_OK")
</pallas_src>

<mosaic_0001>
module attributes {stable_mosaic.version = 11 : i64} {
  func.func @kernel(%arg0: i32, %arg1: memref<256x120xbf16, #tpu.memory_space<vmem>>, %arg2: memref<120x128xbf16, #tpu.memory_space<vmem>>, %arg3: memref<128x128xbf16, #tpu.memory_space<vmem>>, %arg4: memref<128x128xbf16, #tpu.memory_space<vmem>>, %arg5: memref<128x128xbf16, #tpu.memory_space<vmem>>, %arg6: memref<128x128xbf16, #tpu.memory_space<vmem>>, %arg7: memref<8x128xf32, #tpu.memory_space<vmem>>, %arg8: memref<1x1xf32, #tpu.memory_space<smem>>, %arg9: memref<8x1xf32, #tpu.memory_space<vmem>>) attributes {dimension_semantics = [#tpu.dimension_semantics<parallel>], iteration_bounds = array<i64: 4>, scalar_prefetch = 0 : i64, scratch_operands = 0 : i64, tpu.core_type = #tpu.core_type<tc>, window_params = [{transform_indices = @transform_0, window_bounds = array<i64: 256, 120>}, {pipeline_mode = #tpu.pipeline_mode<synchronous>, transform_indices = @transform_1, window_bounds = array<i64: 120, 128>}, {pipeline_mode = #tpu.pipeline_mode<synchronous>, transform_indices = @transform_2, window_bounds = array<i64: 128, 128>}, {pipeline_mode = #tpu.pipeline_mode<synchronous>, transform_indices = @transform_3, window_bounds = array<i64: 128, 128>}, {pipeline_mode = #tpu.pipeline_mode<synchronous>, transform_indices = @transform_4, window_bounds = array<i64: 128, 128>}, {pipeline_mode = #tpu.pipeline_mode<synchronous>, transform_indices = @transform_5, window_bounds = array<i64: 128, 128>}, {pipeline_mode = #tpu.pipeline_mode<synchronous>, transform_indices = @transform_6, window_bounds = array<i64: 8, 128>}, {transform_indices = @transform_7, window_bounds = array<i64: 1, 1>}, {transform_indices = @transform_8, window_bounds = array<i64: 8, 1>}]} {
    %c0 = arith.constant 0 : index
    %c0_0 = arith.constant 0 : index
    %0 = vector.load %arg7[%c0, %c0_0] : memref<8x128xf32, #tpu.memory_space<vmem>>, vector<8x128xf32>
    %1 = vector.extract_strided_slice %0 {offsets = [0, 0], sizes = [1, 128], strides = [1, 1]} : vector<8x128xf32> to vector<1x128xf32>
    %2 = vector.extract_strided_slice %0 {offsets = [1, 0], sizes = [1, 128], strides = [1, 1]} : vector<8x128xf32> to vector<1x128xf32>
    %3 = vector.extract_strided_slice %0 {offsets = [2, 0], sizes = [1, 128], strides = [1, 1]} : vector<8x128xf32> to vector<1x128xf32>
    %4 = vector.extract_strided_slice %0 {offsets = [3, 0], sizes = [1, 128], strides = [1, 1]} : vector<8x128xf32> to vector<1x128xf32>
    %5 = vector.extract_strided_slice %0 {offsets = [4, 0], sizes = [1, 128], strides = [1, 1]} : vector<8x128xf32> to vector<1x128xf32>
    %6 = vector.extract_strided_slice %0 {offsets = [5, 0], sizes = [1, 128], strides = [1, 1]} : vector<8x128xf32> to vector<1x128xf32>
    %7 = vector.extract_strided_slice %0 {offsets = [6, 0], sizes = [1, 128], strides = [1, 1]} : vector<8x128xf32> to vector<1x128xf32>
    %8 = vector.extract_strided_slice %0 {offsets = [7, 0], sizes = [1, 128], strides = [1, 1]} : vector<8x128xf32> to vector<1x128xf32>
    %c0_1 = arith.constant 0 : index
    %c0_2 = arith.constant 0 : index
    %9 = vector.load %arg1[%c0_1, %c0_2] : memref<256x120xbf16, #tpu.memory_space<vmem>>, vector<256x120xbf16>
    %c0_3 = arith.constant 0 : index
    %c0_4 = arith.constant 0 : index
    %10 = vector.load %arg2[%c0_3, %c0_4] : memref<120x128xbf16, #tpu.memory_space<vmem>>, vector<120x128xbf16>
    %cst = arith.constant dense<0.000000e+00> : vector<256x128xf32>
    %11 = tpu.matmul %9, %10, %cst {dimension_numbers = #tpu.dot_dimension_numbers<[1], [0], [0], [1], [0, 0, 1, 1], [], []>} : vector<256x120xbf16>, vector<120x128xbf16>, vector<256x128xf32> -> vector<256x128xf32>
    %12 = vector.broadcast %1 : vector<1x128xf32> to vector<256x128xf32>
    %13 = arith.addf %11, %12 : vector<256x128xf32>
    %c0_5 = arith.constant 0 : index
    %c0_6 = arith.constant 0 : index
    %14 = vector.load %arg3[%c0_5, %c0_6] : memref<128x128xbf16, #tpu.memory_space<vmem>>, vector<128x128xbf16>
    %c0_7 = arith.constant 0 : index
    %c0_8 = arith.constant 0 : index
    %15 = vector.load %arg4[%c0_7, %c0_8] : memref<128x128xbf16, #tpu.memory_space<vmem>>, vector<128x128xbf16>
    %16 = arith.truncf %13 : vector<256x128xf32> to vector<256x128xbf16>
    %cst_9 = arith.constant dense<0.000000e+00> : vector<256x128xf32>
    %17 = tpu.matmul %16, %14, %cst_9 {dimension_numbers = #tpu.dot_dimension_numbers<[1], [0], [0], [1], [0, 0, 1, 1], [], []>} : vector<256x128xbf16>, vector<128x128xbf16>, vector<256x128xf32> -> vector<256x128xf32>
    %18 = vector.broadcast %2 : vector<1x128xf32> to vector<256x128xf32>
    %19 = arith.addf %17, %18 : vector<256x128xf32>
    %20 = arith.mulf %19, %19 : vector<256x128xf32>
    %21 = arith.mulf %19, %20 : vector<256x128xf32>
    %cst_10 = arith.constant 4.471500e-02 : f32
    %22 = vector.broadcast %cst_10 : f32 to vector<256x128xf32>
    %23 = arith.mulf %22, %21 : vector<256x128xf32>
    %24 = arith.addf %19, %23 : vector<256x128xf32>
    %cst_11 = arith.constant 0.797884583 : f32
    %25 = vector.broadcast %cst_11 : f32 to vector<256x128xf32>
    %26 = arith.mulf %25, %24 : vector<256x128xf32>
    %27 = math.tanh %26 : vector<256x128xf32>
    %cst_12 = arith.constant 1.000000e+00 : f32
    %28 = vector.broadcast %cst_12 : f32 to vector<256x128xf32>
    %29 = arith.addf %28, %27 : vector<256x128xf32>
    %cst_13 = arith.constant 5.000000e-01 : f32
    %30 = vector.broadcast %cst_13 : f32 to vector<256x128xf32>
    %31 = arith.mulf %30, %29 : vector<256x128xf32>
    %32 = arith.mulf %19, %31 : vector<256x128xf32>
    %33 = arith.truncf %32 : vector<256x128xf32> to vector<256x128xbf16>
    %cst_14 = arith.constant dense<0.000000e+00> : vector<256x128xf32>
    %34 = tpu.matmul %33, %15, %cst_14 {dimension_numbers = #tpu.dot_dimension_numbers<[1], [0], [0], [1], [0, 0, 1, 1], [], []>} : vector<256x128xbf16>, vector<128x128xbf16>, vector<256x128xf32> -> vector<256x128xf32>
    %35 = vector.broadcast %3 : vector<1x128xf32> to vector<256x128xf32>
    %36 = arith.addf %34, %35 : vector<256x128xf32>
    %c0_15 = arith.constant 0 : index
    %c0_16 = arith.constant 0 : index
    %37 = vector.load %arg5[%c0_15, %c0_16] : memref<128x128xbf16, #tpu.memory_space<vmem>>, vector<128x128xbf16>
    %c0_17 = arith.constant 0 : index
    %c0_18 = arith.constant 0 : index
    %38 = vector.load %arg6[%c0_17, %c0_18] : memref<128x128xbf16, #tpu.memory_space<vmem>>, vector<128x128xbf16>
    %39 = arith.truncf %36 : vector<256x128xf32> to vector<256x128xbf16>
    %cst_19 = arith.constant dense<0.000000e+00> : vector<256x128xf32>
    %40 = tpu.matmul %39, %37, %cst_19 {dimension_numbers = #tpu.dot_dimension_numbers<[1], [0], [0], [1], [0, 0, 1, 1], [], []>} : vector<256x128xbf16>, vector<128x128xbf16>, vector<256x128xf32> -> vector<256x128xf32>
    %41 = vector.broadcast %4 : vector<1x128xf32> to vector<256x128xf32>
    %42 = arith.addf %40, %41 : vector<256x128xf32>
    %43 = arith.mulf %42, %42 : vector<256x128xf32>
    %44 = arith.mulf %42, %43 : vector<256x128xf32>
    %cst_20 = arith.constant 4.471500e-02 : f32
    %45 = vector.broadcast %cst_20 : f32 to vector<256x128xf32>
    %46 = arith.mulf %45, %44 : vector<256x128xf32>
    %47 = arith.addf %42, %46 : vector<256x128xf32>
    %cst_21 = arith.constant 0.797884583 : f32
    %48 = vector.broadcast %cst_21 : f32 to vector<256x128xf32>
    %49 = arith.mulf %48, %47 : vector<256x128xf32>
    %50 = math.tanh %49 : vector<256x128xf32>
    %cst_22 = arith.constant 1.000000e+00 : f32
    %51 = vector.broadcast %cst_22 : f32 to vector<256x128xf32>
    %52 = arith.addf %51, %50 : vector<256x128xf32>
    %cst_23 = arith.constant 5.000000e-01 : f32
    %53 = vector.broadcast %cst_23 : f32 to vector<256x128xf32>
    %54 = arith.mulf %53, %52 : vector<256x128xf32>
    %55 = arith.mulf %42, %54 : vector<256x128xf32>
    %56 = arith.truncf %55 : vector<256x128xf32> to vector<256x128xbf16>
    %cst_24 = arith.constant dense<0.000000e+00> : vector<256x128xf32>
    %57 = tpu.matmul %56, %38, %cst_24 {dimension_numbers = #tpu.dot_dimension_numbers<[1], [0], [0], [1], [0, 0, 1, 1], [], []>} : vector<256x128xbf16>, vector<128x128xbf16>, vector<256x128xf32> -> vector<256x128xf32>
    %58 = vector.broadcast %5 : vector<1x128xf32> to vector<256x128xf32>
    %59 = arith.addf %57, %58 : vector<256x128xf32>
    %cst_25 = arith.constant dense<0.000000e+00> : vector<256xf32>
    %60 = vector.multi_reduction <add>, %59, %cst_25 [1] : vector<256x128xf32> to vector<256xf32>
    %61 = vector.shape_cast %60 : vector<256xf32> to vector<256x1xf32>
    %cst_26 = arith.constant 1.280000e+02 : f32
    %62 = vector.broadcast %cst_26 : f32 to vector<256x1xf32>
    %63 = arith.divf %61, %62 : vector<256x1xf32>
    %64 = vector.broadcast %63 : vector<256x1xf32> to vector<256x128xf32>
    %65 = arith.subf %59, %64 : vector<256x128xf32>
    %66 = arith.mulf %65, %65 : vector<256x128xf32>
    %cst_27 = arith.constant dense<0.000000e+00> : vector<256xf32>
    %67 = vector.multi_reduction <add>, %66, %cst_27 [1] : vector<256x128xf32> to vector<256xf32>
    %68 = vector.shape_cast %67 : vector<256xf32> to vector<256x1xf32>
    %cst_28 = arith.constant 1.280000e+02 : f32
    %69 = vector.broadcast %cst_28 : f32 to vector<256x1xf32>
    %70 = arith.divf %68, %69 : vector<256x1xf32>
    %71 = vector.broadcast %63 : vector<256x1xf32> to vector<256x128xf32>
    %72 = arith.subf %59, %71 : vector<256x128xf32>
    %cst_29 = arith.constant 9.99999997E-7 : f32
    %73 = vector.broadcast %cst_29 : f32 to vector<256x1xf32>
    %74 = arith.addf %70, %73 : vector<256x1xf32>
    %75 = math.rsqrt %74 : vector<256x1xf32>
    %76 = vector.broadcast %75 : vector<256x1xf32> to vector<256x128xf32>
    %77 = arith.mulf %72, %76 : vector<256x128xf32>
    %78 = vector.broadcast %6 : vector<1x128xf32> to vector<256x128xf32>
    %79 = arith.mulf %77, %78 : vector<256x128xf32>
    %80 = vector.broadcast %7 : vector<1x128xf32> to vector<256x128xf32>
    %81 = arith.addf %79, %80 : vector<256x128xf32>
    %82 = tpu.iota {dimensions = array<i32: 0>} : vector<8x256xi32>
    %83 = tpu.iota {dimensions = array<i32: 1>} : vector<8x256xi32>
    %c32_i32 = arith.constant 32 : i32
    %84 = vector.broadcast %c32_i32 : i32 to vector<8x256xi32>
    %85 = arith.muli %82, %84 : vector<8x256xi32>
    %86 = arith.cmpi sge, %83, %85 : vector<8x256xi32>
    %c1_i32 = arith.constant 1 : i32
    %87 = vector.broadcast %c1_i32 : i32 to vector<8x256xi32>
    %88 = arith.addi %82, %87 : vector<8x256xi32>
    %c32_i32_30 = arith.constant 32 : i32
    %89 = vector.broadcast %c32_i32_30 : i32 to vector<8x256xi32>
    %90 = arith.muli %88, %89 : vector<8x256xi32>
    %91 = arith.cmpi slt, %83, %90 : vector<8x256xi32>
    %92 = arith.andi %86, %91 : vector<8x256xi1>
    %93 = arith.extui %92 : vector<8x256xi1> to vector<8x256xi32>
    %94 = arith.sitofp %93 : vector<8x256xi32> to vector<8x256xf32>
    %cst_31 = arith.constant dense<0.000000e+00> : vector<8x128xf32>
    %95 = tpu.matmul %94, %81, %cst_31 {dimension_numbers = #tpu.dot_dimension_numbers<[1], [0], [0], [1], [0, 0, 1, 1], [], []>} : vector<8x256xf32>, vector<256x128xf32>, vector<8x128xf32> -> vector<8x128xf32>
    %96 = vector.broadcast %8 : vector<1x128xf32> to vector<8x128xf32>
    %97 = arith.mulf %95, %96 : vector<8x128xf32>
    %cst_32 = arith.constant dense<0.000000e+00> : vector<8xf32>
    %98 = vector.multi_reduction <add>, %97, %cst_32 [1] : vector<8x128xf32> to vector<8xf32>
    %99 = vector.shape_cast %98 : vector<8xf32> to vector<8x1xf32>
    %c0_33 = arith.constant 0 : index
    %c0_34 = arith.constant 0 : index
    %100 = memref.load %arg8[%c0_33, %c0_34] : memref<1x1xf32, #tpu.memory_space<smem>>
    %101 = vector.broadcast %100 : f32 to vector<8x1xf32>
    %102 = arith.addf %99, %101 : vector<8x1xf32>
    %c0_35 = arith.constant 0 : index
    %c0_36 = arith.constant 0 : index
    %103 = vector.load %arg9[%c0_35, %c0_36] : memref<8x1xf32, #tpu.memory_space<vmem>>, vector<8x1xf32>
    tpu.vector_store %arg9[%c0_35, %c0_36], %102 {strides = array<i32>} : memref<8x1xf32, #tpu.memory_space<vmem>>, vector<8x1xf32>,
    return
  }
  func.func @transform_0(%arg0: i32) -> (i32, i32) {
    %c0_i32 = arith.constant 0 : i32
    %c0_i32_0 = arith.constant 0 : i32
    return %arg0, %c0_i32 : i32, i32
  }
  func.func @transform_1(%arg0: i32) -> (i32, i32) {
    %c0_i32 = arith.constant 0 : i32
    %c0_i32_0 = arith.constant 0 : i32
    %c0_i32_1 = arith.constant 0 : i32
    return %c0_i32, %c0_i32_0 : i32, i32
  }
  func.func @transform_2(%arg0: i32) -> (i32, i32) {
    %c0_i32 = arith.constant 0 : i32
    %c0_i32_0 = arith.constant 0 : i32
    %c0_i32_1 = arith.constant 0 : i32
    return %c0_i32, %c0_i32_0 : i32, i32
  }
  func.func @transform_3(%arg0: i32) -> (i32, i32) {
    %c0_i32 = arith.constant 0 : i32
    %c0_i32_0 = arith.constant 0 : i32
    %c0_i32_1 = arith.constant 0 : i32
    return %c0_i32, %c0_i32_0 : i32, i32
  }
  func.func @transform_4(%arg0: i32) -> (i32, i32) {
    %c0_i32 = arith.constant 0 : i32
    %c0_i32_0 = arith.constant 0 : i32
    %c0_i32_1 = arith.constant 0 : i32
    return %c0_i32, %c0_i32_0 : i32, i32
  }
  func.func @transform_5(%arg0: i32) -> (i32, i32) {
    %c0_i32 = arith.constant 0 : i32
    %c0_i32_0 = arith.constant 0 : i32
    %c0_i32_1 = arith.constant 0 : i32
    return %c0_i32, %c0_i32_0 : i32, i32
  }
  func.func @transform_6(%arg0: i32) -> (i32, i32) {
    %c0_i32 = arith.constant 0 : i32
    %c0_i32_0 = arith.constant 0 : i32
    %c0_i32_1 = arith.constant 0 : i32
    return %c0_i32, %c0_i32_0 : i32, i32
  }
  func.func @transform_7(%arg0: i32) -> (i32, i32) {
    %c0_i32 = arith.constant 0 : i32
    %c0_i32_0 = arith.constant 0 : i32
    %c0_i32_1 = arith.constant 0 : i32
    return %c0_i32, %c0_i32_0 : i32, i32
  }
  func.func @transform_8(%arg0: i32) -> (i32, i32) {
    %c0_i32 = arith.constant 0 : i32
    %c0_i32_0 = arith.constant 0 : i32
    return %arg0, %c0_i32 : i32, i32
  }
}

</mosaic_0001>

<bundles_post_ra>
// kernel: critic_ppo_forward.1
= control target key start
LH: loop header
LB: loop body
LE: loop exit
PB: predicated region body
PF: predicated region fallthrough
CT: control target
= control target key end

     0   :  { %s3306_s29 = smov 0   ;;  %s4764_s0 = inlined_call_operand.vmem [shape: bf16[1024,120], index: 0, kind: input, shape index: {}]   ;;  %s4765_s1 = inlined_call_operand.vmem [shape: bf16[120,128], index: 1, kind: input, shape index: {}]   ;;  %s4766_s2 = inlined_call_operand.vmem [shape: bf16[128,128], index: 2, kind: input, shape index: {}]   ;;  %s4767_s3 = inlined_call_operand.vmem [shape: bf16[128,128], index: 3, kind: input, shape index: {}]   ;;  %s4768_s4 = inlined_call_operand.vmem [shape: bf16[128,128], index: 4, kind: input, shape index: {}]   ;;  %s4769_s5 = inlined_call_operand.vmem [shape: bf16[128,128], index: 5, kind: input, shape index: {}]   ;;  %s4770_s6 = inlined_call_operand.vmem [shape: f32[8,128], index: 6, kind: input, shape index: {}]   ;;  %s4771_s7 = inlined_call_operand.<no memory space> [shape: f32[1,1], index: 7, kind: input, shape index: {}]   ;;  %s4772_s8 = inlined_call_operand.vmem [shape: f32[32,1], index: 8, kind: output, shape index: {}]  }
   0x1   :  { %13 = sst [smem:[#allocation2]] %s4771_s7 }
   0x2 LB: > { %s3312_s30 = sadd.s32 4294967295, %s3254_s29   ;;  %p2716_p0 = scmp.ge.s32.totalorder %s3254_s29, 1  ;;  %s3254_s29 = sphi %s3306_s29, %s19_s29  }
   0x3   : > { %p264_p1 = scmp.lt.s32.totalorder %s3254_s29, 5 }
   0x5   : > { %p265_p2 = pnand %p2716_p0, %p264_p1 }
   0x6   : > { %s2717_s16 = sshll.u32 (!%p265_p2), %s3312_s30, 5  ;;  %p303_p4 = scmp.lt.s32.totalorder (!%p265_p2), %s3312_s30, 3 }
   0x7   : > { %268 = sbr.rel (%p265_p2) target bundleno = 1593 (0x639), region = 52  ;;  %p298_p3 = scmp.lt.s32.totalorder (!%p265_p2), %s2717_s16, 127 }
   0x8   : > { %s2654_s17 = sld [smem:[#allocation2]] (!%p265_p2) }
   0xc   : > { %v354_v0 = vld [vmem:[%s4765_s1 + $0x38] sm:$0xf]  ;;  %vm530_vm0 = vcmask 1043456   ;;  %v2984_v4 = vld [vmem:[%s4765_s1 + $0x30] sm:$0xff]  ;;  %v2983_v5 = vld [vmem:[%s4765_s1 + $0x28] sm:$0xff]  ;;  %s4830_s16 = smov (!%p298_p3, %s2717_s16), 127 }
   0xd   : > { %v465_v1 = vunpack.c.l.b16 %v354_v0  ;;  %v2982_v6 = vld [vmem:[%s4765_s1 + $0x20] sm:$0xff]  ;;  %v2981_v7 = vld [vmem:[%s4765_s1 + $0x18] sm:$0xff]  ;;  %v2980_v8 = vld [vmem:[%s4765_s1 + $0x10] sm:$0xff]  ;;  %s2718_s23 = sshll.u32 %s4830_s16, 2  ;;  %vm481_vm1 = vcmask 982016   ;;  %s4832_s30 = smov (!%p303_p4, %s3312_s30), 3 }
   0xe   : > { %v2979_v9 = vld [vmem:[%s4765_s1 + $0x8] sm:$0xff]  ;;  %v2978_v10 = vld [vmem:[%s4765_s1] sm:$0xff]  ;;  %s3344_s28 = scalar_lea.vmem %s4764_s0, %s2718_s23  ;;  %v2992_v16 = vld [vmem:[%s4766_s2 + $0x38] sm:$0xff]  ;;  %s2719_s18 = sshll.u32 %s4832_s30, 3 }
   0xf   : > { %v473_v2 = vpack.c.b16 %v465_v1, %v465_v1  ;;  %v2962_v11 = vld [vmem:[%s3344_s28] sm:$0xff]  ;;  %v2963_v12 = vld [vmem:[%s3344_s28 + $0x8] sm:$0xff]  ;;  %v2964_v13 = vld [vmem:[%s3344_s28 + $0x10] sm:$0xff]  ;;  %s306_s21 = scalar_lea.vmem %s4772_s8, %s2719_s18 }
  0x10   : > { %v2967_v14 = vld [vmem:[%s3344_s28 + $0x28] sm:$0xff]  ;;  %v2969_v15 = vld [vmem:[%s3344_s28 + $0x38] sm:$0xff]  ;;  %v2991_v17 = vld [vmem:[%s4766_s2 + $0x30] sm:$0xff] }
  0x11   : > { %v532_v3 = vsel %vm530_vm0, %v473_v2, 0  ;;  %v2990_v18 = vld [vmem:[%s4766_s2 + $0x28] sm:$0xff]  ;;  %v2989_v19 = vld [vmem:[%s4766_s2 + $0x20] sm:$0xff]  ;;  %v2965_v20 = vld [vmem:[%s3344_s28 + $0x18] sm:$0xff] }
  0x12   : > { %534 = vmatpush.bf16.msra.mxu0 %v532_v3  ;;  %3017 = vmatpush.bf16.msra.mxu1 %v532_v3  ;;  %v2968_v21 = vld [vmem:[%s3344_s28 + $0x30] sm:$0xff]  ;;  %v2970_v22 = vld [vmem:[%s3344_s28 + $0x40] sm:$0xff]  ;;  %v2988_v23 = vld [vmem:[%s4766_s2 + $0x18] sm:$0xff] }
  0x13   : > { %3018 = vmatpush.bf16.msra.mxu2 %v532_v3  ;;  %3019 = vmatpush.bf16.msra.mxu3 %v532_v3  ;;  %v2966_v24 = vld [vmem:[%s3344_s28 + $0x20] sm:$0xff]  ;;  %v2987_v25 = vld [vmem:[%s4766_s2 + $0x10] sm:$0xff]  ;;  %v2971_v26 = vld [vmem:[%s3344_s28 + $0x48] sm:$0xff] }
  0x14   : > { %v2986_v27 = vld [vmem:[%s4766_s2 + $0x8] sm:$0xff]  ;;  %v2985_v28 = vld [vmem:[%s4766_s2] sm:$0xff]  ;;  %v2972_v29 = vld [vmem:[%s3344_s28 + $0x50] sm:$0xff] }
  0x15   : > { %v2973_v31 = vld [vmem:[%s3344_s28 + $0x58] sm:$0xff]  ;;  %v3396_v32 = vld [vmem:[%s4770_s6] sm:$0xff]  ;;  %v2975_v45 = vld [vmem:[%s3344_s28 + $0x68] sm:$0xff] }
  0x16   : > { %535 = vmatpush.bf16.msra.mxu0 %v2984_v4  ;;  %3020 = vmatpush.bf16.msra.mxu1 %v2984_v4  ;;  %v3400_v33 = vperm.slane %v3396_v32, 0  ;;  %v2974_v39 = vld [vmem:[%s3344_s28 + $0x60] sm:$0xff]  ;;  %v2976_v50 = vld [vmem:[%s3344_s28 + $0x70] sm:$0xff]  ;;  %v2977_v56 = vld [vmem:[%s3344_s28 + $0x78] sm:$0xff] }
  0x17   : > { %3021 = vmatpush.bf16.msra.mxu2 %v2984_v4  ;;  %3022 = vmatpush.bf16.msra.mxu3 %v2984_v4 }
  0x1a   : > { %536 = vmatpush.bf16.msra.mxu0 %v2983_v5  ;;  %3023 = vmatpush.bf16.msra.mxu1 %v2983_v5 }
  0x1b   : > { %3024 = vmatpush.bf16.msra.mxu2 %v2983_v5  ;;  %3025 = vmatpush.bf16.msra.mxu3 %v2983_v5 }
  0x1e   : > { %537 = vmatpush.bf16.msra.mxu0 %v2982_v6  ;;  %3026 = vmatpush.bf16.msra.mxu1 %v2982_v6 }
  0x1f   : > { %3027 = vmatpush.bf16.msra.mxu2 %v2982_v6  ;;  %3028 = vmatpush.bf16.msra.mxu3 %v2982_v6 }
  0x22   : > { %538 = vmatpush.bf16.msra.mxu0 %v2981_v7  ;;  %3029 = vmatpush.bf16.msra.mxu1 %v2981_v7 }
  0x23   : > { %3030 = vmatpush.bf16.msra.mxu2 %v2981_v7  ;;  %3031 = vmatpush.bf16.msra.mxu3 %v2981_v7 }
  0x26   : > { %539 = vmatpush.bf16.msra.mxu0 %v2980_v8  ;;  %3032 = vmatpush.bf16.msra.mxu1 %v2980_v8 }
  0x27   : > { %3033 = vmatpush.bf16.msra.mxu2 %v2980_v8  ;;  %3034 = vmatpush.bf16.msra.mxu3 %v2980_v8 }
  0x2a   : > { %540 = vmatpush.bf16.msra.mxu0 %v2979_v9  ;;  %3035 = vmatpush.bf16.msra.mxu1 %v2979_v9 }
  0x2b   : > { %3036 = vmatpush.bf16.msra.mxu2 %v2979_v9  ;;  %3037 = vmatpush.bf16.msra.mxu3 %v2979_v9 }
  0x2e   : > { %541 = vmatpush.bf16.msra.mxu0 %v2978_v10  ;;  %3038 = vmatpush.bf16.msra.mxu1 %v2978_v10 }
  0x2f   : > { %3039 = vmatpush.bf16.msra.mxu2 %v2978_v10  ;;  %3040 = vmatpush.bf16.msra.mxu3 %v2978_v10  ;;  %v3000_v10 = vld [vmem:[%s4767_s3 + $0x38] sm:$0xff] }
  0x31   : > { %2812 = vmatmul.msk.bf16.vlgmr.msra.gmra.mxu0 %vm481_vm1, %v2962_v11  ;;  %2817 = vmatmul.msk.bf16.vlgmr.msra.gmra.mxu1 %vm481_vm1, %v2967_v14 }
  0x32   : > { %2819 = vmatmul.msk.bf16.vlgmr.msra.gmra.mxu2 %vm481_vm1, %v2969_v15  ;;  %720 = vmatpush.bf16.msrb.mxu1 %v2992_v16  ;;  %v2997_v16 = vld [vmem:[%s4767_s3 + $0x20] sm:$0xff] }
  0x33   : > { %2823 = vmatmul.msk.bf16.vlgmr.msra.gmra.mxu3 %vm481_vm1, %v2973_v31  ;;  %1162 = vmatpush.bf16.msrb.mxu2 %v3000_v10 }
  0x36   : > { %721 = vmatpush.bf16.msrb.mxu1 %v2991_v17 }
  0x3a   : > { %722 = vmatpush.bf16.msrb.mxu1 %v2990_v18 }
  0x3e   : > { %723 = vmatpush.bf16.msrb.mxu1 %v2989_v19  ;;  %v2996_v19 = vld [vmem:[%s4767_s3 + $0x18] sm:$0xff] }
  0x41   : > { %2813 = vmatmul.msk.bf16.gmra.mxu0 %vm481_vm1, %v2963_v12  ;;  %2818 = vmatmul.msk.bf16.gmra.mxu1 %vm481_vm1, %v2968_v21  ;;  %v2999_v12 = vld [vmem:[%s4767_s3 + $0x30] sm:$0xff] }
  0x42   : > { %2820 = vmatmul.msk.bf16.gmra.mxu2 %vm481_vm1, %v2970_v22  ;;  %724 = vmatpush.bf16.msrb.mxu1 %v2988_v23  ;;  %v2994_v22 = vld [vmem:[%s4767_s3 + $0x8] sm:$0xff] }
  0x43   : > { %2824 = vmatmul.msk.bf16.gmra.mxu3 %vm481_vm1, %v2974_v39  ;;  %1163 = vmatpush.bf16.msrb.mxu2 %v2999_v12 }
  0x46   : > { %725 = vmatpush.bf16.msrb.mxu1 %v2987_v25  ;;  %v3450_v25 = vperm.slane %v3396_v32, 1 }
  0x4a   : > { %726 = vmatpush.bf16.msrb.mxu1 %v2986_v27 }
  0x4e   : > { %727 = vmatpush.bf16.msrb.mxu1 %v2985_v28 }
  0x51   : > { %2814 = vmatmul.msk.bf16.gmra.mxu0 %vm481_vm1, %v2964_v13  ;;  %v2998_v13 = vld [vmem:[%s4767_s3 + $0x28] sm:$0xff] }
  0x52   : > { %2821 = vmatmul.msk.bf16.gmra.mxu2 %vm481_vm1, %v2971_v26  ;;  %v2993_v26 = vld [vmem:[%s4767_s3] sm:$0xff] }
  0x53   : > { %2825 = vmatmul.msk.bf16.gmra.mxu3 %vm481_vm1, %v2975_v45  ;;  %1164 = vmatpush.bf16.msrb.mxu2 %v2998_v13 }
  0x57   : > { %1165 = vmatpush.bf16.msrb.mxu2 %v2997_v16 }
  0x5b   : > { %1166 = vmatpush.bf16.msrb.mxu2 %v2996_v19 }
  0x61   : > { %2815 = vmatmul.msk.bf16.gmra.mxu0 %vm481_vm1, %v2965_v20  ;;  %v2995_v20 = vld [vmem:[%s4767_s3 + $0x10] sm:$0xff] }
  0x62   : > { %2822 = vmatmul.msk.bf16.gmra.mxu2 %vm481_vm1, %v2972_v29 }
  0x63   : > { %2826 = vmatmul.msk.bf16.gmra.mxu3 %vm481_vm1, %v2976_v50  ;;  %1167 = vmatpush.bf16.msrb.mxu2 %v2995_v20 }
  0x67   : > { %1168 = vmatpush.bf16.msrb.mxu2 %v2994_v22 }
  0x6b   : > { %1169 = vmatpush.bf16.msrb.mxu2 %v2993_v26 }
  0x71   : > { %2816 = vmatmul.msk.bf16.gmra.mxu0 %vm481_vm1, %v2966_v24 }
  0x73   : > { %2827 = vmatmul.msk.bf16.gmra.mxu3 %vm481_vm1, %v2977_v56 }
  0xae   : > { %v543_v30 = vpop.f32.mrf.mxu0  ;;  %v568_v58 = vpop.f32.mrf.mxu1 }
  0xaf   : > { %v544_v35 = vadd.f32 %v543_v30, %v3400_v33  ;;  %v569_v0 = vadd.f32 %v568_v58, %v3400_v33 }
  0xb5   : > { %v578_v4 = vpop.f32.mrf.mxu2 }
  0xb6   : > { %v545_v34 = vpop.f32.mrf.mxu0  ;;  %v570_v63 = vpop.f32.mrf.mxu1  ;;  %v579_v14 = vadd.f32 %v578_v4, %v3400_v33 }
  0xb7   : > { %v546_v36 = vadd.f32 %v545_v34, %v3400_v33  ;;  %v571_v1 = vadd.f32 %v570_v63, %v3400_v33 }
  0xb9   : > { %v655_v37 = vpack.c.bf16 %v546_v36, %v544_v35  ;;  %v660_v3 = vpack.c.bf16 %v571_v1, %v569_v0 }
  0xbb   : > { %728 = vmatmul.bf16.vlgmr.msrb.gmra.mxu1 %v655_v37 }
  0xbd   : > { %v580_v8 = vpop.f32.mrf.mxu2 }
  0xbe   : > { %v548_v38 = vpop.f32.mrf.mxu0  ;;  %v573_v2 = vpop.f32.mrf.mxu1  ;;  %v581_v15 = vadd.f32 %v580_v8, %v3400_v33 }
  0xbf   : > { %v549_v41 = vadd.f32 %v548_v38, %v3400_v33  ;;  %v574_v6 = vadd.f32 %v573_v2, %v3400_v33 }
  0xc0   : > { %v662_v17 = vpack.c.bf16 %v581_v15, %v579_v14 }
  0xc5   : > { %v583_v11 = vpop.f32.mrf.mxu2 }
  0xc6   : > { %v550_v40 = vpop.f32.mrf.mxu0  ;;  %v575_v5 = vpop.f32.mrf.mxu1  ;;  %v584_v23 = vadd.f32 %v583_v11, %v3400_v33 }
  0xc7   : > { %v551_v42 = vadd.f32 %v550_v40, %v3400_v33  ;;  %v576_v7 = vadd.f32 %v575_v5, %v3400_v33 }
  0xc9   : > { %v656_v43 = vpack.c.bf16 %v551_v42, %v549_v41  ;;  %v661_v9 = vpack.c.bf16 %v576_v7, %v574_v6 }
  0xcb   : > { %733 = vmatmul.bf16.gmra.mxu1 %v656_v43 }
  0xcd   : > { %v585_v18 = vpop.f32.mrf.mxu2 }
  0xce   : > { %v553_v44 = vpop.f32.mrf.mxu0  ;;  %v586_v24 = vadd.f32 %v585_v18, %v3400_v33 }
  0xcf   : > { %v554_v47 = vadd.f32 %v553_v44, %v3400_v33 }
  0xd0   : > { %v663_v29 = vpack.c.bf16 %v586_v24, %v584_v23 }
  0xd5   : > { %v588_v21 = vpop.f32.mrf.mxu2 }
  0xd6   : > { %v555_v46 = vpop.f32.mrf.mxu0  ;;  %v589_v41 = vadd.f32 %v588_v21, %v3400_v33 }
  0xd7   : > { %v556_v48 = vadd.f32 %v555_v46, %v3400_v33 }
  0xd9   : > { %v657_v49 = vpack.c.bf16 %v556_v48, %v554_v47  ;;  %v598_v47 = vpop.f32.mrf.mxu3 }
  0xdb   : > { %738 = vmatmul.bf16.gmra.mxu1 %v657_v49 }
  0xdd   : > { %v590_v34 = vpop.f32.mrf.mxu2 }
  0xde   : > { %v558_v51 = vpop.f32.mrf.mxu0  ;;  %v591_v42 = vadd.f32 %v590_v34, %v3400_v33 }
  0xdf   : > { %v559_v53 = vadd.f32 %v558_v51, %v3400_v33 }
  0xe0   : > { %v664_v50 = vpack.c.bf16 %v591_v42, %v589_v41 }
  0xe5   : > { %v593_v45 = vpop.f32.mrf.mxu2 }
  0xe6   : > { %v560_v52 = vpop.f32.mrf.mxu0 }
  0xe7   : > { %v561_v54 = vadd.f32 %v560_v52, %v3400_v33 }
  0xe9   : > { %v658_v55 = vpack.c.bf16 %v561_v54, %v559_v53 }
  0xeb   : > { %743 = vmatmul.bf16.gmra.mxu1 %v658_v55 }
  0xee   : > { %v563_v57 = vpop.f32.mrf.mxu0 }
  0xef   : > { %v564_v60 = vadd.f32 %v563_v57, %v3400_v33 }
  0xf6   : > { %v565_v59 = vpop.f32.mrf.mxu0 }
  0xf7   : > { %v566_v61 = vadd.f32 %v565_v59, %v3400_v33 }
  0xf9   : > { %v659_v62 = vpack.c.bf16 %v566_v61, %v564_v60  ;;  %v595_v60 = vpop.f32.mrf.mxu2  ;;  %v600_v61 = vpop.f32.mrf.mxu3 }
  0xfa   : > { %v596_v4 = vadd.f32 %v595_v60, %v3400_v33  ;;  %v601_v34 = vadd.f32 %v600_v61, %v3400_v33 }
  0xfb   : > { %748 = vmatmul.bf16.gmra.mxu1 %v659_v62 }
 0x10b   : > { %753 = vmatmul.bf16.gmra.mxu1 %v660_v3  ;;  %v594_v3 = vadd.f32 %v593_v45, %v3400_v33 }
 0x10d   : > { %v665_v11 = vpack.c.bf16 %v596_v4, %v594_v3 }
 0x11b   : > { %758 = vmatmul.bf16.gmra.mxu1 %v661_v9 }
 0x12b   : > { %763 = vmatmul.bf16.gmra.mxu1 %v662_v17  ;;  %v603_v17 = vpop.f32.mrf.mxu3 }
 0x12c   : > { %v604_v61 = vadd.f32 %v603_v17, %v3400_v33 }
 0x138   : > { %v729_v27 = vpop.f32.mrf.mxu1 }
 0x139   : > { %v730_v28 = vadd.f32 %v729_v27, %v3450_v25 }
 0x13b   : > { %v809_v30 = vmul.f32 %v730_v28, %v730_v28  ;;  %768 = vmatmul.bf16.gmra.mxu1 %v663_v29 }
 0x13d   : > { %v841_v31 = vmul.f32 %v809_v30, %v730_v28 }
 0x13f   : > { %v873_v35 = vmul.f32 0.044715, %v841_v31  ;;  %v599_v31 = vadd.f32 %v598_v47, %v3400_v33 }
 0x140   : > { %v731_v36 = vpop.f32.mrf.mxu1 }
 0x141   : > { %v905_v37 = vadd.f32 %v873_v35, %v730_v28  ;;  %v732_v38 = vadd.f32 %v731_v36, %v3450_v25  ;;  %v666_v42 = vpack.c.bf16 %v601_v34, %v599_v31 }
 0x143   : > { %v937_v39 = vmul.f32 0.7978846, %v905_v37  ;;  %v810_v40 = vmul.f32 %v732_v38, %v732_v38  ;;  %v605_v37 = vpop.f32.mrf.mxu3 }
 0x145   : > { %v842_v43 = vmul.f32 %v810_v40, %v732_v38  ;;  %3051 = vtanh.f32 %v937_v39 }
 0x147   : > { %v874_v44 = vmul.f32 0.044715, %v842_v43 }
 0x148   : > { %v734_v46 = vpop.f32.mrf.mxu1 }
 0x149   : > { %v906_v48 = vadd.f32 %v874_v44, %v732_v38  ;;  %v735_v49 = vadd.f32 %v734_v46, %v3450_v25 }
 0x14b   : > { %v938_v51 = vmul.f32 0.7978846, %v906_v48  ;;  %v811_v52 = vmul.f32 %v735_v49, %v735_v49  ;;  %773 = vmatmul.bf16.gmra.mxu1 %v664_v50  ;;  %v3052_v53 = vpop.eup %3051 }
 0x14c   : > { %v1001_v57 = vadd.f32 1.0, %v3052_v53  ;;  %v608_v53 = vpop.f32.mrf.mxu3 }
 0x14d   : > { %v843_v54 = vmul.f32 %v811_v52, %v735_v49  ;;  %3053 = vtanh.f32 %v938_v51 }
 0x14e   : > { %v1033_v2 = vmul.f32 0.5, %v1001_v57 }
 0x14f   : > { %v875_v55 = vmul.f32 0.044715, %v843_v54 }
 0x150   : > { %v736_v56 = vpop.f32.mrf.mxu1  ;;  %v1065_v9 = vmul.f32 %v1033_v2, %v730_v28 }
 0x151   : > { %v907_v58 = vadd.f32 %v875_v55, %v735_v49  ;;  %v737_v59 = vadd.f32 %v736_v56, %v3450_v25 }
 0x153   : > { %v3054_v62 = vpop.eup %3053  ;;  %v812_v63 = vmul.f32 %v737_v59, %v737_v59  ;;  %v939_v0 = vmul.f32 0.7978846, %v907_v58 }
 0x154   : > { %v1002_v1 = vadd.f32 1.0, %v3054_v62  ;;  %v606_v62 = vadd.f32 %v605_v37, %v3400_v33 }
 0x155   : > { %v844_v5 = vmul.f32 %v812_v63, %v737_v59  ;;  %3055 = vtanh.f32 %v939_v0 }
 0x156   : > { %v1034_v6 = vmul.f32 0.5, %v1002_v1 }
 0x157   : > { %v876_v7 = vmul.f32 0.044715, %v844_v5  ;;  %v667_v5 = vpack.c.bf16 %v606_v62, %v604_v61 }
 0x158   : > { %v739_v8 = vpop.f32.mrf.mxu1  ;;  %v1066_v10 = vmul.f32 %v1034_v6, %v732_v38 }
 0x159   : > { %v740_v12 = vadd.f32 %v739_v8, %v3450_v25  ;;  %v908_v13 = vadd.f32 %v876_v7, %v737_v59 }
 0x15a   : > { %v1097_v14 = vpack.c.bf16 %v1066_v10, %v1065_v9  ;;  %v610_v9 = vpop.f32.mrf.mxu3 }
 0x15b   : > { %v813_v15 = vmul.f32 %v740_v12, %v740_v12  ;;  %778 = vmatmul.bf16.gmra.mxu1 %v665_v11  ;;  %v940_v16 = vmul.f32 0.7978846, %v908_v13  ;;  %v3056_v18 = vpop.eup %3055 }
 0x15c   : > { %1170 = vmatmul.bf16.vlgmr.msrb.gmra.mxu2 %v1097_v14  ;;  %v1003_v22 = vadd.f32 1.0, %v3056_v18 }
 0x15d   : > { %v845_v19 = vmul.f32 %v813_v15, %v740_v12  ;;  %3057 = vtanh.f32 %v940_v16 }
 0x15e   : > { %v1035_v30 = vmul.f32 0.5, %v1003_v22 }
 0x15f   : > { %v877_v20 = vmul.f32 0.044715, %v845_v19 }
 0x160   : > { %v741_v21 = vpop.f32.mrf.mxu1  ;;  %v1067_v40 = vmul.f32 %v1035_v30, %v735_v49 }
 0x161   : > { %v909_v23 = vadd.f32 %v877_v20, %v740_v12  ;;  %v742_v24 = vadd.f32 %v741_v21, %v3450_v25 }
 0x162   : > { %v613_v22 = vpop.f32.mrf.mxu3 }
 0x163   : > { %v3058_v26 = vpop.eup %3057  ;;  %v814_v27 = vmul.f32 %v742_v24, %v742_v24  ;;  %v941_v28 = vmul.f32 0.7978846, %v909_v23 }
 0x164   : > { %v1004_v29 = vadd.f32 1.0, %v3058_v26  ;;  %v609_v26 = vadd.f32 %v608_v53, %v3400_v33 }
 0x165   : > { %v846_v35 = vmul.f32 %v814_v27, %v742_v24  ;;  %3059 = vtanh.f32 %v941_v28  ;;  %v611_v27 = vadd.f32 %v610_v9, %v3400_v33 }
 0x166   : > { %v1036_v36 = vmul.f32 0.5, %v1004_v29 }
 0x167   : > { %v878_v38 = vmul.f32 0.044715, %v846_v35 }
 0x168   : > { %v744_v39 = vpop.f32.mrf.mxu1  ;;  %v1068_v41 = vmul.f32 %v1036_v36, %v737_v59  ;;  %v668_v36 = vpack.c.bf16 %v611_v27, %v609_v26 }
 0x169   : > { %v745_v43 = vadd.f32 %v744_v39, %v3450_v25  ;;  %v910_v44 = vadd.f32 %v878_v38, %v742_v24 }
 0x16a   : > { %v1098_v45 = vpack.c.bf16 %v1068_v41, %v1067_v40 }
 0x16b   : > { %v815_v46 = vmul.f32 %v745_v43, %v745_v43  ;;  %783 = vmatmul.bf16.gmra.mxu1 %v666_v42  ;;  %v942_v48 = vmul.f32 0.7978846, %v910_v44  ;;  %v3060_v47 = vpop.eup %3059 }
 0x16c   : > { %1175 = vmatmul.bf16.gmra.mxu2 %v1098_v45  ;;  %v1005_v54 = vadd.f32 1.0, %v3060_v47  ;;  %v615_v45 = vpop.f32.mrf.mxu3 }
 0x16d   : > { %v847_v50 = vmul.f32 %v815_v46, %v745_v43  ;;  %3061 = vtanh.f32 %v942_v48 }
 0x16e   : > { %v1037_v60 = vmul.f32 0.5, %v1005_v54 }
 0x16f   : > { %v879_v51 = vmul.f32 0.044715, %v847_v50 }
 0x170   : > { %v746_v52 = vpop.f32.mrf.mxu1  ;;  %v1069_v3 = vmul.f32 %v1037_v60, %v740_v12 }
 0x171   : > { %v911_v55 = vadd.f32 %v879_v51, %v745_v43  ;;  %v747_v49 = vadd.f32 %v746_v52, %v3450_v25 }
 0x173   : > { %v3062_v56 = vpop.eup %3061  ;;  %v816_v57 = vmul.f32 %v747_v49, %v747_v49  ;;  %v943_v58 = vmul.f32 0.7978846, %v911_v55 }
 0x174   : > { %v1006_v59 = vadd.f32 1.0, %v3062_v56  ;;  %v616_v56 = vadd.f32 %v615_v45, %v3400_v33  ;;  %v618_v60 = vpop.f32.mrf.mxu3 }
 0x175   : > { %v848_v63 = vmul.f32 %v816_v57, %v747_v49  ;;  %3063 = vtanh.f32 %v943_v58 }
 0x176   : > { %v1038_v0 = vmul.f32 0.5, %v1006_v59 }
 0x177   : > { %v880_v1 = vmul.f32 0.044715, %v848_v63 }
 0x178   : > { %v749_v2 = vpop.f32.mrf.mxu1  ;;  %v1070_v4 = vmul.f32 %v1038_v0, %v742_v24 }
 0x179   : > { %v750_v6 = vadd.f32 %v749_v2, %v3450_v25  ;;  %v912_v7 = vadd.f32 %v880_v1, %v747_v49 }
 0x17a   : > { %v1099_v8 = vpack.c.bf16 %v1070_v4, %v1069_v3 }
 0x17b   : > { %v817_v10 = vmul.f32 %v750_v6, %v750_v6  ;;  %788 = vmatmul.bf16.gmra.mxu1 %v667_v5  ;;  %v944_v11 = vmul.f32 0.7978846, %v912_v7  ;;  %v3064_v13 = vpop.eup %3063 }
 0x17c   : > { %1180 = vmatmul.bf16.gmra.mxu2 %v1099_v8  ;;  %v1007_v17 = vadd.f32 1.0, %v3064_v13 }
 0x17d   : > { %v849_v14 = vmul.f32 %v817_v10, %v750_v6  ;;  %3065 = vtanh.f32 %v944_v11 }
 0x17e   : > { %v1039_v24 = vmul.f32 0.5, %v1007_v17 }
 0x17f   : > { %v881_v15 = vmul.f32 0.044715, %v849_v14 }
 0x180   : > { %v751_v16 = vpop.f32.mrf.mxu1  ;;  %v1071_v34 = vmul.f32 %v1039_v24, %v745_v43 }
 0x181   : > { %v752_v18 = vadd.f32 %v751_v16, %v3450_v25  ;;  %v913_v12 = vadd.f32 %v881_v15, %v750_v6 }
 0x183   : > { %v3066_v19 = vpop.eup %3065  ;;  %v818_v20 = vmul.f32 %v752_v18, %v752_v18  ;;  %v945_v21 = vmul.f32 0.7978846, %v913_v12 }
 0x184   : > { %v1008_v23 = vadd.f32 1.0, %v3066_v19  ;;  %v619_v19 = vadd.f32 %v618_v60, %v3400_v33 }
 0x185   : > { %v850_v28 = vmul.f32 %v818_v20, %v752_v18  ;;  %3067 = vtanh.f32 %v945_v21 }
 0x186   : > { %v1040_v29 = vmul.f32 0.5, %v1008_v23 }
 0x187   : > { %v882_v30 = vmul.f32 0.044715, %v850_v28 }
 0x188   : > { %v754_v31 = vpop.f32.mrf.mxu1  ;;  %v1072_v35 = vmul.f32 %v1040_v29, %v747_v49  ;;  %v614_v49 = vadd.f32 %v613_v22, %v3400_v33 }
 0x189   : > { %v914_v37 = vadd.f32 %v882_v30, %v752_v18  ;;  %v755_v38 = vadd.f32 %v754_v31, %v3450_v25 }
 0x18a   : > { %v1100_v39 = vpack.c.bf16 %v1072_v35, %v1071_v34  ;;  %v669_v0 = vpack.c.bf16 %v616_v56, %v614_v49 }
 0x18b   : > { %v819_v40 = vmul.f32 %v755_v38, %v755_v38  ;;  %793 = vmatmul.bf16.gmra.mxu1 %v668_v36  ;;  %v946_v41 = vmul.f32 0.7978846, %v914_v37  ;;  %v3068_v42 = vpop.eup %3067 }
 0x18c   : > { %1185 = vmatmul.bf16.gmra.mxu2 %v1100_v39  ;;  %v1009_v47 = vadd.f32 1.0, %v3068_v42  ;;  %v3007_v39 = vld [vmem:[%s4768_s4 + $0x30] sm:$0xff] }
 0x18d   : > { %v851_v44 = vmul.f32 %v819_v40, %v755_v38  ;;  %3069 = vtanh.f32 %v946_v41 }
 0x18e   : > { %v1041_v55 = vmul.f32 0.5, %v1009_v47  ;;  %v3006_v47 = vld [vmem:[%s4768_s4 + $0x28] sm:$0xff] }
 0x18f   : > { %v883_v46 = vmul.f32 0.044715, %v851_v44 }
 0x190   : > { %v756_v48 = vpop.f32.mrf.mxu1  ;;  %v1073_v62 = vmul.f32 %v1041_v55, %v750_v6  ;;  %v620_v6 = vpop.f32.mrf.mxu3 }
 0x191   : > { %v915_v50 = vadd.f32 %v883_v46, %v755_v38  ;;  %v757_v43 = vadd.f32 %v756_v48, %v3450_v25  ;;  %v621_v20 = vadd.f32 %v620_v6, %v3400_v33  ;;  %v3008_v33 = vld [vmem:[%s4768_s4 + $0x38] sm:$0xff] }
 0x192   : > { %1348 = vmatpush.bf16.msrb.mxu3 %v3008_v33 }
 0x193   : > { %v3070_v51 = vpop.eup %3069  ;;  %v820_v52 = vmul.f32 %v757_v43, %v757_v43  ;;  %v947_v53 = vmul.f32 0.7978846, %v915_v50  ;;  %v670_v28 = vpack.c.bf16 %v621_v20, %v619_v19 }
 0x194   : > { %v1010_v54 = vadd.f32 1.0, %v3070_v51 }
 0x195   : > { %v852_v57 = vmul.f32 %v820_v52, %v757_v43  ;;  %3071 = vtanh.f32 %v947_v53 }
 0x196   : > { %v1042_v58 = vmul.f32 0.5, %v1010_v54  ;;  %1349 = vmatpush.bf16.msrb.mxu3 %v3007_v39  ;;  %v3005_v54 = vld [vmem:[%s4768_s4 + $0x20] sm:$0xff] }
 0x197   : > { %v884_v59 = vmul.f32 0.044715, %v852_v57 }
 0x198   : > { %v759_v61 = vpop.f32.mrf.mxu1  ;;  %v1074_v63 = vmul.f32 %v1042_v58, %v752_v18 }
 0x199   : > { %v916_v1 = vadd.f32 %v884_v59, %v757_v43  ;;  %v760_v2 = vadd.f32 %v759_v61, %v3450_v25 }
 0x19a   : > { %v1101_v3 = vpack.c.bf16 %v1074_v63, %v1073_v62  ;;  %1350 = vmatpush.bf16.msrb.mxu3 %v3006_v47  ;;  %v3004_v62 = vld [vmem:[%s4768_s4 + $0x18] sm:$0xff] }
 0x19b   : > { %v821_v4 = vmul.f32 %v760_v2, %v760_v2  ;;  %798 = vmatmul.bf16.gmra.mxu1 %v669_v0  ;;  %v948_v5 = vmul.f32 0.7978846, %v916_v1  ;;  %v3072_v7 = vpop.eup %3071 }
 0x19c   : > { %1190 = vmatmul.bf16.gmra.mxu2 %v1101_v3  ;;  %v1011_v11 = vadd.f32 1.0, %v3072_v7 }
 0x19d   : > { %v853_v8 = vmul.f32 %v821_v4, %v760_v2  ;;  %3073 = vtanh.f32 %v948_v5 }
 0x19e   : > { %v1043_v12 = vmul.f32 0.5, %v1011_v11  ;;  %1351 = vmatpush.bf16.msrb.mxu3 %v3005_v54  ;;  %v3002_v11 = vld [vmem:[%s4768_s4 + $0x8] sm:$0xff] }
 0x19f   : > { %v885_v9 = vmul.f32 0.044715, %v853_v8 }
 0x1a0   : > { %v761_v10 = vpop.f32.mrf.mxu1  ;;  %v1075_v26 = vmul.f32 %v1043_v12, %v755_v38 }
 0x1a1   : > { %v917_v13 = vadd.f32 %v885_v9, %v760_v2  ;;  %v762_v14 = vadd.f32 %v761_v10, %v3450_v25 }
 0x1a2   : > { %1352 = vmatpush.bf16.msrb.mxu3 %v3004_v62 }
 0x1a3   : > { %v3074_v15 = vpop.eup %3073  ;;  %v822_v16 = vmul.f32 %v762_v14, %v762_v14  ;;  %v949_v17 = vmul.f32 0.7978846, %v917_v13 }
 0x1a4   : > { %v1012_v18 = vadd.f32 1.0, %v3074_v15 }
 0x1a5   : > { %v854_v21 = vmul.f32 %v822_v16, %v762_v14  ;;  %3075 = vtanh.f32 %v949_v17  ;;  %v3001_v17 = vld [vmem:[%s4768_s4] sm:$0xff] }
 0x1a6   : > { %v1044_v22 = vmul.f32 0.5, %v1012_v18 }
 0x1a7   : > { %v886_v23 = vmul.f32 0.044715, %v854_v21 }
 0x1a8   : > { %v764_v24 = vpop.f32.mrf.mxu1  ;;  %v1076_v27 = vmul.f32 %v1044_v22, %v757_v43 }
 0x1a9   : > { %v918_v29 = vadd.f32 %v886_v23, %v762_v14  ;;  %v3484_v30 = vadd.f32 %v764_v24, %v3450_v25 }
 0x1aa   : > { %v1102_v31 = vpack.c.bf16 %v1076_v27, %v1075_v26 }
 0x1ab   : > { %v823_v34 = vmul.f32 %v3484_v30, %v3484_v30  ;;  %803 = vmatmul.bf16.gmra.mxu1 %v670_v28  ;;  %v950_v35 = vmul.f32 0.7978846, %v918_v29  ;;  %v3076_v36 = vpop.eup %3075 }
 0x1ac   : > { %1195 = vmatmul.bf16.gmra.mxu2 %v1102_v31  ;;  %v1013_v41 = vadd.f32 1.0, %v3076_v36 }
 0x1ad   : > { %v855_v37 = vmul.f32 %v823_v34, %v3484_v30  ;;  %3077 = vtanh.f32 %v950_v35 }
 0x1ae   : > { %v1045_v43 = vmul.f32 0.5, %v1013_v41 }
 0x1af   : > { %v887_v38 = vmul.f32 0.044715, %v855_v37 }
 0x1b0   : > { %v766_v40 = vpop.f32.mrf.mxu1  ;;  %v1077_v49 = vmul.f32 %v1045_v43, %v760_v2  ;;  %v3003_v2 = vld [vmem:[%s4768_s4 + $0x10] sm:$0xff] }
 0x1b1   : > { %v919_v42 = vadd.f32 %v887_v38, %v3484_v30  ;;  %v767_v44 = vadd.f32 %v766_v40, %v3450_v25  ;;  %1353 = vmatpush.bf16.msrb.mxu3 %v3003_v2 }
 0x1b3   : > { %v3078_v45 = vpop.eup %3077  ;;  %v824_v46 = vmul.f32 %v767_v44, %v767_v44  ;;  %v951_v48 = vmul.f32 0.7978846, %v919_v42 }
 0x1b4   : > { %v1014_v50 = vadd.f32 1.0, %v3078_v45 }
 0x1b5   : > { %v856_v51 = vmul.f32 %v824_v46, %v767_v44  ;;  %3079 = vtanh.f32 %v951_v48  ;;  %1354 = vmatpush.bf16.msrb.mxu3 %v3002_v11 }
 0x1b6   : > { %v1046_v52 = vmul.f32 0.5, %v1014_v50 }
 0x1b7   : > { %v888_v53 = vmul.f32 0.044715, %v856_v51 }
 0x1b8   : > { %v769_v55 = vpop.f32.mrf.mxu1  ;;  %v1078_v56 = vmul.f32 %v1046_v52, %v762_v14 }
 0x1b9   : > { %v920_v57 = vadd.f32 %v888_v53, %v767_v44  ;;  %v770_v58 = vadd.f32 %v769_v55, %v3450_v25  ;;  %1355 = vmatpush.bf16.msrb.mxu3 %v3001_v17 }
 0x1ba   : > { %v1103_v59 = vpack.c.bf16 %v1078_v56, %v1077_v49 }
 0x1bb   : > { %v825_v60 = vmul.f32 %v770_v58, %v770_v58  ;;  %v952_v61 = vmul.f32 0.7978846, %v920_v57  ;;  %v3080_v63 = vpop.eup %3079 }
 0x1bc   : > { %1200 = vmatmul.bf16.gmra.mxu2 %v1103_v59  ;;  %v1015_v4 = vadd.f32 1.0, %v3080_v63 }
 0x1bd   : > { %v857_v0 = vmul.f32 %v825_v60, %v770_v58  ;;  %3081 = vtanh.f32 %v952_v61  ;;  %v3523_v61 = vperm.slane %v3396_v32, 2 }
 0x1be   : > { %v1047_v14 = vmul.f32 0.5, %v1015_v4 }
 0x1bf   : > { %v889_v1 = vmul.f32 0.044715, %v857_v0 }
 0x1c0   : > { %v771_v3 = vpop.f32.mrf.mxu1  ;;  %v1079_v12 = vmul.f32 %v1047_v14, %v3484_v30 }
 0x1c1   : > { %v921_v5 = vadd.f32 %v889_v1, %v770_v58  ;;  %v772_v7 = vadd.f32 %v771_v3, %v3450_v25 }
 0x1c3   : > { %v3082_v8 = vpop.eup %3081  ;;  %v953_v9 = vmul.f32 0.7978846, %v921_v5  ;;  %v826_v10 = vmul.f32 %v772_v7, %v772_v7 }
 0x1c4   : > { %v1016_v13 = vadd.f32 1.0, %v3082_v8 }
 0x1c5   : > { %v858_v6 = vmul.f32 %v826_v10, %v772_v7  ;;  %3083 = vtanh.f32 %v953_v9 }
 0x1c6   : > { %v1048_v15 = vmul.f32 0.5, %v1016_v13 }
 0x1c7   : > { %v890_v16 = vmul.f32 0.044715, %v858_v6 }
 0x1c8   : > { %v774_v18 = vpop.f32.mrf.mxu1  ;;  %v1080_v19 = vmul.f32 %v1048_v15, %v767_v44 }
 0x1c9   : > { %v922_v20 = vadd.f32 %v890_v16, %v772_v7  ;;  %v775_v21 = vadd.f32 %v774_v18, %v3450_v25 }
 0x1ca   : > { %v1104_v22 = vpack.c.bf16 %v1080_v19, %v1079_v12 }
 0x1cb   : > { %v954_v23 = vmul.f32 0.7978846, %v922_v20  ;;  %v827_v24 = vmul.f32 %v775_v21, %v775_v21  ;;  %v3084_v26 = vpop.eup %3083 }
 0x1cc   : > { %1205 = vmatmul.bf16.gmra.mxu2 %v1104_v22  ;;  %v1017_v31 = vadd.f32 1.0, %v3084_v26 }
 0x1cd   : > { %3085 = vtanh.f32 %v954_v23  ;;  %v859_v27 = vmul.f32 %v827_v24, %v775_v21 }
 0x1ce   : > { %v1049_v38 = vmul.f32 0.5, %v1017_v31 }
 0x1cf   : > { %v891_v28 = vmul.f32 0.044715, %v859_v27 }
 0x1d0   : > { %v776_v29 = vpop.f32.mrf.mxu1  ;;  %v1081_v44 = vmul.f32 %v1049_v38, %v770_v58 }
 0x1d1   : > { %v923_v34 = vadd.f32 %v891_v28, %v775_v21  ;;  %v777_v35 = vadd.f32 %v776_v29, %v3450_v25 }
 0x1d3   : > { %v3086_v33 = vpop.eup %3085  ;;  %v955_v30 = vmul.f32 0.7978846, %v923_v34  ;;  %v828_v36 = vmul.f32 %v777_v35, %v777_v35 }
 0x1d4   : > { %v1018_v37 = vadd.f32 1.0, %v3086_v33 }
 0x1d5   : > { %v860_v39 = vmul.f32 %v828_v36, %v777_v35  ;;  %3087 = vtanh.f32 %v955_v30 }
 0x1d6   : > { %v1050_v40 = vmul.f32 0.5, %v1018_v37 }
 0x1d7   : > { %v892_v41 = vmul.f32 0.044715, %v860_v39 }
 0x1d8   : > { %v779_v42 = vpop.f32.mrf.mxu1  ;;  %v1082_v45 = vmul.f32 %v1050_v40, %v772_v7 }
 0x1d9   : > { %v924_v46 = vadd.f32 %v892_v41, %v777_v35  ;;  %v780_v48 = vadd.f32 %v779_v42, %v3450_v25 }
 0x1da   : > { %v1105_v47 = vpack.c.bf16 %v1082_v45, %v1081_v44 }
 0x1db   : > { %v956_v50 = vmul.f32 0.7978846, %v924_v46  ;;  %v829_v43 = vmul.f32 %v780_v48, %v780_v48  ;;  %v3088_v51 = vpop.eup %3087 }
 0x1dc   : > { %1210 = vmatmul.bf16.gmra.mxu2 %v1105_v47  ;;  %v1019_v49 = vadd.f32 1.0, %v3088_v51 }
 0x1dd   : > { %3089 = vtanh.f32 %v956_v50  ;;  %v861_v52 = vmul.f32 %v829_v43, %v780_v48 }
 0x1de   : > { %v1051_v63 = vmul.f32 0.5, %v1019_v49 }
 0x1df   : > { %v893_v53 = vmul.f32 0.044715, %v861_v52  ;;  %v1171_v54 = vpop.f32.mrf.mxu2 }
 0x1e0   : > { %v781_v55 = vpop.f32.mrf.mxu1  ;;  %v1172_v4 = vadd.f32 %v1171_v54, %v3523_v61  ;;  %v1083_v8 = vmul.f32 %v1051_v63, %v775_v21 }
 0x1e1   : > { %v925_v56 = vadd.f32 %v893_v53, %v780_v48  ;;  %v782_v57 = vadd.f32 %v781_v55, %v3450_v25 }
 0x1e3   : > { %v3090_v59 = vpop.eup %3089  ;;  %v957_v58 = vmul.f32 0.7978846, %v925_v56  ;;  %v830_v60 = vmul.f32 %v782_v57, %v782_v57 }
 0x1e4   : > { %v1020_v62 = vadd.f32 1.0, %v3090_v59 }
 0x1e5   : > { %v862_v0 = vmul.f32 %v830_v60, %v782_v57  ;;  %3091 = vtanh.f32 %v957_v58 }
 0x1e6   : > { %v1052_v1 = vmul.f32 0.5, %v1020_v62 }
 0x1e7   : > { %v894_v2 = vmul.f32 0.044715, %v862_v0  ;;  %v1173_v3 = vpop.f32.mrf.mxu2 }
 0x1e8   : > { %v1174_v5 = vadd.f32 %v1173_v3, %v3523_v61  ;;  %v784_v7 = vpop.f32.mrf.mxu1  ;;  %v1084_v9 = vmul.f32 %v1052_v1, %v777_v35 }
 0x1e9   : > { %v926_v10 = vadd.f32 %v894_v2, %v782_v57  ;;  %v785_v11 = vadd.f32 %v784_v7, %v3450_v25 }
 0x1ea   : > { %v1283_v13 = vpack.c.bf16 %v1174_v5, %v1172_v4  ;;  %v1106_v32 = vpack.c.bf16 %v1084_v9, %v1083_v8 }
 0x1eb   : > { %v958_v14 = vmul.f32 0.7978846, %v926_v10  ;;  %v831_v6 = vmul.f32 %v785_v11, %v785_v11  ;;  %v3092_v15 = vpop.eup %3091 }
 0x1ec   : > { %1215 = vmatmul.bf16.gmra.mxu2 %v1106_v32  ;;  %1356 = vmatmul.bf16.vlgmr.msrb.gmra.mxu3 %v1283_v13  ;;  %v1021_v19 = vadd.f32 1.0, %v3092_v15 }
 0x1ed   : > { %3093 = vtanh.f32 %v958_v14  ;;  %v863_v16 = vmul.f32 %v831_v6, %v785_v11 }
 0x1ee   : > { %v1053_v27 = vmul.f32 0.5, %v1021_v19 }
 0x1ef   : > { %v895_v17 = vmul.f32 0.044715, %v863_v16  ;;  %v1176_v18 = vpop.f32.mrf.mxu2 }
 0x1f0   : > { %v786_v12 = vpop.f32.mrf.mxu1  ;;  %v1177_v35 = vadd.f32 %v1176_v18, %v3523_v61  ;;  %v1085_v36 = vmul.f32 %v1053_v27, %v780_v48 }
 0x1f1   : > { %v927_v20 = vadd.f32 %v895_v17, %v785_v11  ;;  %v787_v21 = vadd.f32 %v786_v12, %v3450_v25 }
 0x1f3   : > { %v3094_v22 = vpop.eup %3093  ;;  %v959_v23 = vmul.f32 0.7978846, %v927_v20  ;;  %v832_v24 = vmul.f32 %v787_v21, %v787_v21 }
 0x1f4   : > { %v1022_v26 = vadd.f32 1.0, %v3094_v22 }
 0x1f5   : > { %v864_v28 = vmul.f32 %v832_v24, %v787_v21  ;;  %3095 = vtanh.f32 %v959_v23 }
 0x1f6   : > { %v1054_v29 = vmul.f32 0.5, %v1022_v26 }
 0x1f7   : > { %v896_v31 = vmul.f32 0.044715, %v864_v28  ;;  %v1178_v34 = vpop.f32.mrf.mxu2 }
 0x1f8   : > { %v1179_v33 = vadd.f32 %v1178_v34, %v3523_v61  ;;  %v789_v30 = vpop.f32.mrf.mxu1  ;;  %v1086_v37 = vmul.f32 %v1054_v29, %v782_v57 }
 0x1f9   : > { %v928_v38 = vadd.f32 %v896_v31, %v787_v21  ;;  %v790_v39 = vadd.f32 %v789_v30, %v3450_v25 }
 0x1fa   : > { %v1107_v40 = vpack.c.bf16 %v1086_v37, %v1085_v36  ;;  %v1284_v41 = vpack.c.bf16 %v1179_v33, %v1177_v35 }
 0x1fb   : > { %v960_v42 = vmul.f32 0.7978846, %v928_v38  ;;  %v833_v44 = vmul.f32 %v790_v39, %v790_v39  ;;  %v3096_v45 = vpop.eup %3095 }
 0x1fc   : > { %1220 = vmatmul.bf16.gmra.mxu2 %v1107_v40  ;;  %1361 = vmatmul.bf16.gmra.mxu3 %v1284_v41  ;;  %v1023_v51 = vadd.f32 1.0, %v3096_v45 }
 0x1fd   : > { %3097 = vtanh.f32 %v960_v42  ;;  %v865_v46 = vmul.f32 %v833_v44, %v790_v39 }
 0x1fe   : > { %v1055_v56 = vmul.f32 0.5, %v1023_v51 }
 0x1ff   : > { %v897_v47 = vmul.f32 0.044715, %v865_v46  ;;  %v1181_v50 = vpop.f32.mrf.mxu2 }
 0x200   : > { %v791_v43 = vpop.f32.mrf.mxu1  ;;  %v1182_v62 = vadd.f32 %v1181_v50, %v3523_v61  ;;  %v1087_v1 = vmul.f32 %v1055_v56, %v785_v11 }
 0x201   : > { %v929_v52 = vadd.f32 %v897_v47, %v790_v39  ;;  %v792_v48 = vadd.f32 %v791_v43, %v3450_v25 }
 0x203   : > { %v3098_v53 = vpop.eup %3097  ;;  %v961_v54 = vmul.f32 0.7978846, %v929_v52  ;;  %v834_v55 = vmul.f32 %v792_v48, %v792_v48 }
 0x204   : > { %v1024_v49 = vadd.f32 1.0, %v3098_v53 }
 0x205   : > { %v866_v57 = vmul.f32 %v834_v55, %v792_v48  ;;  %3099 = vtanh.f32 %v961_v54 }
 0x206   : > { %v1056_v59 = vmul.f32 0.5, %v1024_v49 }
 0x207   : > { %v898_v58 = vmul.f32 0.044715, %v866_v57  ;;  %v1183_v60 = vpop.f32.mrf.mxu2 }
 0x208   : > { %v1184_v63 = vadd.f32 %v1183_v60, %v3523_v61  ;;  %v794_v0 = vpop.f32.mrf.mxu1  ;;  %v1088_v2 = vmul.f32 %v1056_v59, %v787_v21 }
 0x209   : > { %v930_v3 = vadd.f32 %v898_v58, %v792_v48  ;;  %v795_v4 = vadd.f32 %v794_v0, %v3450_v25 }
 0x20a   : > { %v1108_v5 = vpack.c.bf16 %v1088_v2, %v1087_v1  ;;  %v1285_v7 = vpack.c.bf16 %v1184_v63, %v1182_v62 }
 0x20b   : > { %v962_v8 = vmul.f32 0.7978846, %v930_v3  ;;  %v835_v9 = vmul.f32 %v795_v4, %v795_v4  ;;  %v3100_v10 = vpop.eup %3099 }
 0x20c   : > { %1225 = vmatmul.bf16.gmra.mxu2 %v1108_v5  ;;  %1366 = vmatmul.bf16.gmra.mxu3 %v1285_v7  ;;  %v1025_v15 = vadd.f32 1.0, %v3100_v10 }
 0x20d   : > { %3101 = vtanh.f32 %v962_v8  ;;  %v867_v13 = vmul.f32 %v835_v9, %v795_v4 }
 0x20e   : > { %v1057_v20 = vmul.f32 0.5, %v1025_v15 }
 0x20f   : > { %v899_v32 = vmul.f32 0.044715, %v867_v13  ;;  %v1186_v14 = vpop.f32.mrf.mxu2 }
 0x210   : > { %v796_v6 = vpop.f32.mrf.mxu1  ;;  %v1187_v26 = vadd.f32 %v1186_v14, %v3523_v61  ;;  %v1089_v29 = vmul.f32 %v1057_v20, %v790_v39 }
 0x211   : > { %v931_v16 = vadd.f32 %v899_v32, %v795_v4  ;;  %v797_v11 = vadd.f32 %v796_v6, %v3450_v25 }
 0x213   : > { %v3102_v17 = vpop.eup %3101  ;;  %v963_v18 = vmul.f32 0.7978846, %v931_v16  ;;  %v836_v12 = vmul.f32 %v797_v11, %v797_v11 }
 0x214   : > { %v1026_v19 = vadd.f32 1.0, %v3102_v17 }
 0x215   : > { %v868_v21 = vmul.f32 %v836_v12, %v797_v11  ;;  %3103 = vtanh.f32 %v963_v18 }
 0x216   : > { %v1058_v22 = vmul.f32 0.5, %v1026_v19 }
 0x217   : > { %v900_v23 = vmul.f32 0.044715, %v868_v21  ;;  %v1188_v24 = vpop.f32.mrf.mxu2 }
 0x218   : > { %v1189_v27 = vadd.f32 %v1188_v24, %v3523_v61  ;;  %v799_v28 = vpop.f32.mrf.mxu1  ;;  %v1090_v31 = vmul.f32 %v1058_v22, %v792_v48 }
 0x219   : > { %v932_v34 = vadd.f32 %v900_v23, %v797_v11  ;;  %v800_v35 = vadd.f32 %v799_v28, %v3450_v25 }
 0x21a   : > { %v1109_v33 = vpack.c.bf16 %v1090_v31, %v1089_v29  ;;  %v1286_v30 = vpack.c.bf16 %v1189_v27, %v1187_v26 }
 0x21b   : > { %v964_v36 = vmul.f32 0.7978846, %v932_v34  ;;  %v837_v37 = vmul.f32 %v800_v35, %v800_v35  ;;  %v3104_v38 = vpop.eup %3103 }
 0x21c   : > { %1230 = vmatmul.bf16.gmra.mxu2 %v1109_v33  ;;  %1371 = vmatmul.bf16.gmra.mxu3 %v1286_v30  ;;  %v1027_v45 = vadd.f32 1.0, %v3104_v38 }
 0x21d   : > { %3105 = vtanh.f32 %v964_v36  ;;  %v869_v40 = vmul.f32 %v837_v37, %v800_v35 }
 0x21e   : > { %v1059_v52 = vmul.f32 0.5, %v1027_v45  ;;  %v3016_v45 = vld [vmem:[%s4769_s5 + $0x38] sm:$0xff] }
 0x21f   : > { %v901_v41 = vmul.f32 0.044715, %v869_v40  ;;  %v1191_v42 = vpop.f32.mrf.mxu2  ;;  %1790 = vmatpush.bf16.msrb.mxu0 %v3016_v45 }
 0x220   : > { %v801_v44 = vpop.f32.mrf.mxu1  ;;  %v1192_v49 = vadd.f32 %v1191_v42, %v3523_v61  ;;  %v1091_v59 = vmul.f32 %v1059_v52, %v795_v4  ;;  %v3013_v52 = vld [vmem:[%s4769_s5 + $0x20] sm:$0xff] }
 0x221   : > { %v933_v46 = vadd.f32 %v901_v41, %v800_v35  ;;  %v802_v39 = vadd.f32 %v801_v44, %v3450_v25 }
 0x223   : > { %v3106_v47 = vpop.eup %3105  ;;  %v965_v50 = vmul.f32 0.7978846, %v933_v46  ;;  %v838_v43 = vmul.f32 %v802_v39, %v802_v39  ;;  %v3015_v46 = vld [vmem:[%s4769_s5 + $0x30] sm:$0xff] }
 0x224   : > { %v1028_v51 = vadd.f32 1.0, %v3106_v47  ;;  %1791 = vmatpush.bf16.msrb.mxu0 %v3015_v46 }
 0x225   : > { %v870_v48 = vmul.f32 %v838_v43, %v802_v39  ;;  %3107 = vtanh.f32 %v965_v50 }
 0x226   : > { %v1060_v53 = vmul.f32 0.5, %v1028_v51  ;;  %v3014_v51 = vld [vmem:[%s4769_s5 + $0x28] sm:$0xff] }
 0x227   : > { %v902_v54 = vmul.f32 0.044715, %v870_v48  ;;  %v1193_v55 = vpop.f32.mrf.mxu2 }
 0x228   : > { %v1194_v56 = vadd.f32 %v1193_v55, %v3523_v61  ;;  %v804_v57 = vpop.f32.mrf.mxu1  ;;  %v1092_v58 = vmul.f32 %v1060_v53, %v797_v11  ;;  %1792 = vmatpush.bf16.msrb.mxu0 %v3014_v51  ;;  %v3012_v53 = vld [vmem:[%s4769_s5 + $0x18] sm:$0xff] }
 0x229   : > { %v934_v60 = vadd.f32 %v902_v54, %v802_v39  ;;  %v805_v62 = vadd.f32 %v804_v57, %v3450_v25  ;;  %v3011_v54 = vld [vmem:[%s4769_s5 + $0x10] sm:$0xff] }
 0x22a   : > { %v1110_v63 = vpack.c.bf16 %v1092_v58, %v1091_v59  ;;  %v1287_v0 = vpack.c.bf16 %v1194_v56, %v1192_v49  ;;  %v3010_v59 = vld [vmem:[%s4769_s5 + $0x8] sm:$0xff]  ;;  %v3577_v58 = vld [vmem:[%s4770_s6] sm:$0xff] }
 0x22b   : > { %v966_v1 = vmul.f32 0.7978846, %v934_v60  ;;  %v839_v2 = vmul.f32 %v805_v62, %v805_v62  ;;  %v3108_v3 = vpop.eup %3107  ;;  %v3580_v60 = vperm.slane %v3577_v58, 3 }
 0x22c   : > { %1235 = vmatmul.bf16.gmra.mxu2 %v1110_v63  ;;  %1376 = vmatmul.bf16.gmra.mxu3 %v1287_v0  ;;  %v1029_v10 = vadd.f32 1.0, %v3108_v3 }
 0x22d   : > { %3109 = vtanh.f32 %v966_v1  ;;  %v871_v5 = vmul.f32 %v839_v2, %v805_v62  ;;  %1793 = vmatpush.bf16.msrb.mxu0 %v3013_v52 }
 0x22e   : > { %v1061_v16 = vmul.f32 0.5, %v1029_v10 }
 0x22f   : > { %v903_v7 = vmul.f32 0.044715, %v871_v5  ;;  %v1196_v8 = vpop.f32.mrf.mxu2 }
 0x230   : > { %v806_v9 = vpop.f32.mrf.mxu1  ;;  %v1197_v19 = vadd.f32 %v1196_v8, %v3523_v61  ;;  %v1093_v21 = vmul.f32 %v1061_v16, %v800_v35 }
 0x231   : > { %v935_v13 = vadd.f32 %v903_v7, %v805_v62  ;;  %v807_v4 = vadd.f32 %v806_v9, %v3450_v25  ;;  %1794 = vmatpush.bf16.msrb.mxu0 %v3012_v53 }
 0x233   : > { %v3110_v32 = vpop.eup %3109  ;;  %v967_v14 = vmul.f32 0.7978846, %v935_v13  ;;  %v840_v6 = vmul.f32 %v807_v4, %v807_v4 }
 0x234   : > { %v1030_v15 = vadd.f32 1.0, %v3110_v32 }
 0x235   : > { %v872_v11 = vmul.f32 %v840_v6, %v807_v4  ;;  %3111 = vtanh.f32 %v967_v14  ;;  %1795 = vmatpush.bf16.msrb.mxu0 %v3011_v54 }
 0x236   : > { %v1062_v17 = vmul.f32 0.5, %v1030_v15 }
 0x237   : > { %v904_v18 = vmul.f32 0.044715, %v872_v11  ;;  %v1198_v12 = vpop.f32.mrf.mxu2 }
 0x238   : > { %v1199_v20 = vadd.f32 %v1198_v12, %v3523_v61  ;;  %v1094_v22 = vmul.f32 %v1062_v17, %v802_v39 }
 0x239   : > { %v936_v23 = vadd.f32 %v904_v18, %v807_v4  ;;  %1796 = vmatpush.bf16.msrb.mxu0 %v3010_v59 }
 0x23a   : > { %v1111_v24 = vpack.c.bf16 %v1094_v22, %v1093_v21  ;;  %v1288_v26 = vpack.c.bf16 %v1199_v20, %v1197_v19 }
 0x23b   : > { %v968_v25 = vmul.f32 0.7978846, %v936_v23  ;;  %v3112_v27 = vpop.eup %3111 }
 0x23c   : > { %1240 = vmatmul.bf16.gmra.mxu2 %v1111_v24  ;;  %1381 = vmatmul.bf16.gmra.mxu3 %v1288_v26  ;;  %v1031_v29 = vadd.f32 1.0, %v3112_v27 }
 0x23d   : > { %3113 = vtanh.f32 %v968_v25 }
 0x23e   : > { %v1063_v33 = vmul.f32 0.5, %v1031_v29 }
 0x23f   : > { %v1201_v28 = vpop.f32.mrf.mxu2 }
 0x240   : > { %v1202_v37 = vadd.f32 %v1201_v28, %v3523_v61  ;;  %v1095_v38 = vmul.f32 %v1063_v33, %v805_v62  ;;  %v3009_v62 = vld [vmem:[%s4769_s5] sm:$0xff] }
 0x241   : > { %1797 = vmatpush.bf16.msrb.mxu0 %v3009_v62 }
 0x243   : > { %v3114_v31 = vpop.eup %3113 }
 0x244   : > { %v1032_v34 = vadd.f32 1.0, %v3114_v31 }
 0x246   : > { %v1064_v30 = vmul.f32 0.5, %v1032_v34 }
 0x247   : > { %v1203_v36 = vpop.f32.mrf.mxu2 }
 0x248   : > { %v1204_v35 = vadd.f32 %v1203_v36, %v3523_v61  ;;  %v1096_v40 = vmul.f32 %v1064_v30, %v807_v4 }
 0x24a   : > { %v1112_v41 = vpack.c.bf16 %v1096_v40, %v1095_v38  ;;  %v1289_v42 = vpack.c.bf16 %v1204_v35, %v1202_v37 }
 0x24c   : > { %1245 = vmatmul.bf16.gmra.mxu2 %v1112_v41  ;;  %1386 = vmatmul.bf16.gmra.mxu3 %v1289_v42 }
 0x24f   : > { %v1206_v44 = vpop.f32.mrf.mxu2 }
 0x250   : > { %v1207_v47 = vadd.f32 %v1206_v44, %v3523_v61 }
 0x257   : > { %v1208_v39 = vpop.f32.mrf.mxu2 }
 0x258   : > { %v1209_v50 = vadd.f32 %v1208_v39, %v3523_v61 }
 0x25a   : > { %v1290_v43 = vpack.c.bf16 %v1209_v50, %v1207_v47 }
 0x25c   : > { %1391 = vmatmul.bf16.gmra.mxu3 %v1290_v43 }
 0x25f   : > { %v1211_v48 = vpop.f32.mrf.mxu2 }
 0x260   : > { %v1212_v49 = vadd.f32 %v1211_v48, %v3523_v61 }
 0x267   : > { %v1213_v55 = vpop.f32.mrf.mxu2 }
 0x268   : > { %v1214_v56 = vadd.f32 %v1213_v55, %v3523_v61 }
 0x26a   : > { %v1291_v57 = vpack.c.bf16 %v1214_v56, %v1212_v49 }
 0x26c   : > { %1396 = vmatmul.bf16.gmra.mxu3 %v1291_v57 }
 0x26f   : > { %v1216_v63 = vpop.f32.mrf.mxu2  ;;  %v1357_v0 = vpop.f32.mrf.mxu3 }
 0x270   : > { %v1358_v1 = vadd.f32 %v1357_v0, %v3580_v60  ;;  %v1217_v9 = vadd.f32 %v1216_v63, %v3523_v61 }
 0x272   : > { %v1437_v2 = vmul.f32 %v1358_v1, %v1358_v1 }
 0x274   : > { %v1469_v3 = vmul.f32 %v1437_v2, %v1358_v1 }
 0x276   : > { %v1501_v5 = vmul.f32 0.044715, %v1469_v3 }
 0x277   : > { %v1218_v7 = vpop.f32.mrf.mxu2  ;;  %v1359_v8 = vpop.f32.mrf.mxu3 }
 0x278   : > { %v1533_v10 = vadd.f32 %v1501_v5, %v1358_v1  ;;  %v1219_v13 = vadd.f32 %v1218_v7, %v3523_v61  ;;  %v1360_v4 = vadd.f32 %v1359_v8, %v3580_v60 }
 0x27a   : > { %v1565_v32 = vmul.f32 0.7978846, %v1533_v10  ;;  %v1292_v14 = vpack.c.bf16 %v1219_v13, %v1217_v9  ;;  %v1438_v6 = vmul.f32 %v1360_v4, %v1360_v4 }
 0x27c   : > { %v1470_v15 = vmul.f32 %v1438_v6, %v1360_v4  ;;  %1401 = vmatmul.bf16.gmra.mxu3 %v1292_v14  ;;  %3115 = vtanh.f32 %v1565_v32 }
 0x27e   : > { %v1502_v16 = vmul.f32 0.044715, %v1470_v15 }
 0x27f   : > { %v1221_v11 = vpop.f32.mrf.mxu2  ;;  %v1362_v17 = vpop.f32.mrf.mxu3 }
 0x280   : > { %v1534_v18 = vadd.f32 %v1502_v16, %v1360_v4  ;;  %v1363_v12 = vadd.f32 %v1362_v17, %v3580_v60  ;;  %v1222_v27 = vadd.f32 %v1221_v11, %v3523_v61 }
 0x282   : > { %v1566_v19 = vmul.f32 0.7978846, %v1534_v18  ;;  %v1439_v20 = vmul.f32 %v1363_v12, %v1363_v12  ;;  %v3116_v21 = vpop.eup %3115 }
 0x283   : > { %v1629_v25 = vadd.f32 1.0, %v3116_v21 }
 0x284   : > { %v1471_v22 = vmul.f32 %v1439_v20, %v1363_v12  ;;  %3117 = vtanh.f32 %v1566_v19 }
 0x285   : > { %v1661_v35 = vmul.f32 0.5, %v1629_v25 }
 0x286   : > { %v1503_v23 = vmul.f32 0.044715, %v1471_v22 }
 0x287   : > { %v1223_v24 = vpop.f32.mrf.mxu2  ;;  %v1364_v26 = vpop.f32.mrf.mxu3  ;;  %v1693_v45 = vmul.f32 %v1661_v35, %v1358_v1 }
 0x288   : > { %v1535_v28 = vadd.f32 %v1503_v23, %v1363_v12  ;;  %v1224_v29 = vadd.f32 %v1223_v24, %v3523_v61  ;;  %v1365_v31 = vadd.f32 %v1364_v26, %v3580_v60 }
 0x28a   : > { %v3118_v34 = vpop.eup %3117  ;;  %v1293_v33 = vpack.c.bf16 %v1224_v29, %v1222_v27  ;;  %v1440_v30 = vmul.f32 %v1365_v31, %v1365_v31  ;;  %v1567_v36 = vmul.f32 0.7978846, %v1535_v28 }
 0x28b   : > { %v1630_v37 = vadd.f32 1.0, %v3118_v34 }
 0x28c   : > { %v1472_v38 = vmul.f32 %v1440_v30, %v1365_v31  ;;  %1406 = vmatmul.bf16.gmra.mxu3 %v1293_v33  ;;  %3119 = vtanh.f32 %v1567_v36 }
 0x28d   : > { %v1662_v40 = vmul.f32 0.5, %v1630_v37 }
 0x28e   : > { %v1504_v41 = vmul.f32 0.044715, %v1472_v38 }
 0x28f   : > { %v1226_v42 = vpop.f32.mrf.mxu2  ;;  %v1367_v44 = vpop.f32.mrf.mxu3  ;;  %v1694_v46 = vmul.f32 %v1662_v40, %v1360_v4 }
 0x290   : > { %v1368_v39 = vadd.f32 %v1367_v44, %v3580_v60  ;;  %v1536_v47 = vadd.f32 %v1504_v41, %v1365_v31  ;;  %v1227_v56 = vadd.f32 %v1226_v42, %v3523_v61 }
 0x291   : > { %v1725_v50 = vpack.c.bf16 %v1694_v46, %v1693_v45 }
 0x292   : > { %v1441_v43 = vmul.f32 %v1368_v39, %v1368_v39  ;;  %v1568_v51 = vmul.f32 0.7978846, %v1536_v47  ;;  %v3120_v52 = vpop.eup %3119 }
 0x293   : > { %1798 = vmatmul.bf16.vlgmr.msrb.gmra.mxu0 %v1725_v50  ;;  %v1631_v49 = vadd.f32 1.0, %v3120_v52 }
 0x294   : > { %v1473_v48 = vmul.f32 %v1441_v43, %v1368_v39  ;;  %3121 = vtanh.f32 %v1568_v51 }
 0x295   : > { %v1663_v5 = vmul.f32 0.5, %v1631_v49 }
 0x296   : > { %v1505_v53 = vmul.f32 0.044715, %v1473_v48 }
 0x297   : > { %v1228_v54 = vpop.f32.mrf.mxu2  ;;  %v1369_v55 = vpop.f32.mrf.mxu3  ;;  %v1695_v4 = vmul.f32 %v1663_v5, %v1363_v12 }
 0x298   : > { %v1537_v57 = vadd.f32 %v1505_v53, %v1368_v39  ;;  %v1229_v59 = vadd.f32 %v1228_v54, %v3523_v61  ;;  %v1370_v62 = vadd.f32 %v1369_v55, %v3580_v60 }
 0x29a   : > { %v3122_v63 = vpop.eup %3121  ;;  %v1294_v0 = vpack.c.bf16 %v1229_v59, %v1227_v56  ;;  %v1442_v1 = vmul.f32 %v1370_v62, %v1370_v62  ;;  %v1569_v2 = vmul.f32 0.7978846, %v1537_v57 }
 0x29b   : > { %v1632_v3 = vadd.f32 1.0, %v3122_v63 }
 0x29c   : > { %v1474_v7 = vmul.f32 %v1442_v1, %v1370_v62  ;;  %1411 = vmatmul.bf16.gmra.mxu3 %v1294_v0  ;;  %3123 = vtanh.f32 %v1569_v2 }
 0x29d   : > { %v1664_v8 = vmul.f32 0.5, %v1632_v3 }
 0x29e   : > { %v1506_v9 = vmul.f32 0.044715, %v1474_v7 }
 0x29f   : > { %v1231_v10 = vpop.f32.mrf.mxu2  ;;  %v1372_v13 = vpop.f32.mrf.mxu3  ;;  %v1696_v32 = vmul.f32 %v1664_v8, %v1365_v31 }
 0x2a0   : > { %v1373_v14 = vadd.f32 %v1372_v13, %v3580_v60  ;;  %v1538_v6 = vadd.f32 %v1506_v9, %v1370_v62  ;;  %v1232_v23 = vadd.f32 %v1231_v10, %v3523_v61 }
 0x2a1   : > { %v1726_v15 = vpack.c.bf16 %v1696_v32, %v1695_v4 }
 0x2a2   : > { %v1443_v16 = vmul.f32 %v1373_v14, %v1373_v14  ;;  %v1570_v11 = vmul.f32 0.7978846, %v1538_v6  ;;  %v3124_v17 = vpop.eup %3123 }
 0x2a3   : > { %1803 = vmatmul.bf16.gmra.mxu0 %v1726_v15  ;;  %v1633_v22 = vadd.f32 1.0, %v3124_v17 }
 0x2a4   : > { %v1475_v18 = vmul.f32 %v1443_v16, %v1373_v14  ;;  %3125 = vtanh.f32 %v1570_v11 }
 0x2a5   : > { %v1665_v34 = vmul.f32 0.5, %v1633_v22 }
 0x2a6   : > { %v1507_v19 = vmul.f32 0.044715, %v1475_v18 }
 0x2a7   : > { %v1233_v20 = vpop.f32.mrf.mxu2  ;;  %v1374_v21 = vpop.f32.mrf.mxu3  ;;  %v1697_v38 = vmul.f32 %v1665_v34, %v1368_v39 }
 0x2a8   : > { %v1539_v24 = vadd.f32 %v1507_v19, %v1373_v14  ;;  %v1234_v12 = vadd.f32 %v1233_v20, %v3523_v61  ;;  %v1375_v26 = vadd.f32 %v1374_v21, %v3580_v60 }
 0x2aa   : > { %v3126_v25 = vpop.eup %3125  ;;  %v1295_v27 = vpack.c.bf16 %v1234_v12, %v1232_v23  ;;  %v1444_v28 = vmul.f32 %v1375_v26, %v1375_v26  ;;  %v1571_v29 = vmul.f32 0.7978846, %v1539_v24 }
 0x2ab   : > { %v1634_v31 = vadd.f32 1.0, %v3126_v25 }
 0x2ac   : > { %v1476_v33 = vmul.f32 %v1444_v28, %v1375_v26  ;;  %1416 = vmatmul.bf16.gmra.mxu3 %v1295_v27  ;;  %3127 = vtanh.f32 %v1571_v29 }
 0x2ad   : > { %v1666_v30 = vmul.f32 0.5, %v1634_v31 }
 0x2ae   : > { %v1508_v36 = vmul.f32 0.044715, %v1476_v33 }
 0x2af   : > { %v1236_v37 = vpop.f32.mrf.mxu2  ;;  %v1377_v35 = vpop.f32.mrf.mxu3  ;;  %v1698_v40 = vmul.f32 %v1666_v30, %v1370_v62 }
 0x2b0   : > { %v1378_v41 = vadd.f32 %v1377_v35, %v3580_v60  ;;  %v1540_v42 = vadd.f32 %v1508_v36, %v1375_v26  ;;  %v1237_v53 = vadd.f32 %v1236_v37, %v3523_v61 }
 0x2b1   : > { %v1727_v44 = vpack.c.bf16 %v1698_v40, %v1697_v38 }
 0x2b2   : > { %v1445_v45 = vmul.f32 %v1378_v41, %v1378_v41  ;;  %v1572_v46 = vmul.f32 0.7978846, %v1540_v42  ;;  %v3128_v47 = vpop.eup %3127 }
 0x2b3   : > { %1808 = vmatmul.bf16.gmra.mxu0 %v1727_v44  ;;  %v1635_v48 = vadd.f32 1.0, %v3128_v47 }
 0x2b4   : > { %v1477_v50 = vmul.f32 %v1445_v45, %v1378_v41  ;;  %3129 = vtanh.f32 %v1572_v46 }
 0x2b5   : > { %v1667_v63 = vmul.f32 0.5, %v1635_v48 }
 0x2b6   : > { %v1509_v43 = vmul.f32 0.044715, %v1477_v50 }
 0x2b7   : > { %v1238_v51 = vpop.f32.mrf.mxu2  ;;  %v1379_v52 = vpop.f32.mrf.mxu3  ;;  %v1699_v7 = vmul.f32 %v1667_v63, %v1373_v14 }
 0x2b8   : > { %v1541_v54 = vadd.f32 %v1509_v43, %v1378_v41  ;;  %v1239_v39 = vadd.f32 %v1238_v51, %v3523_v61  ;;  %v1380_v55 = vadd.f32 %v1379_v52, %v3580_v60 }
 0x2ba   : > { %v3130_v49 = vpop.eup %3129  ;;  %v1296_v56 = vpack.c.bf16 %v1239_v39, %v1237_v53  ;;  %v1446_v57 = vmul.f32 %v1380_v55, %v1380_v55  ;;  %v1573_v59 = vmul.f32 0.7978846, %v1541_v54 }
 0x2bb   : > { %v1636_v62 = vadd.f32 1.0, %v3130_v49 }
 0x2bc   : > { %v1478_v0 = vmul.f32 %v1446_v57, %v1380_v55  ;;  %1421 = vmatmul.bf16.gmra.mxu3 %v1296_v56  ;;  %3131 = vtanh.f32 %v1573_v59 }
 0x2bd   : > { %v1668_v1 = vmul.f32 0.5, %v1636_v62 }
 0x2be   : > { %v1510_v2 = vmul.f32 0.044715, %v1478_v0 }
 0x2bf   : > { %v1241_v3 = vpop.f32.mrf.mxu2  ;;  %v1382_v5 = vpop.f32.mrf.mxu3  ;;  %v1700_v8 = vmul.f32 %v1668_v1, %v1375_v26 }
 0x2c0   : > { %v1542_v9 = vadd.f32 %v1510_v2, %v1380_v55  ;;  %v1383_v10 = vadd.f32 %v1382_v5, %v3580_v60  ;;  %v1242_v19 = vadd.f32 %v1241_v3, %v3523_v61 }
 0x2c1   : > { %v1728_v13 = vpack.c.bf16 %v1700_v8, %v1699_v7 }
 0x2c2   : > { %v1447_v4 = vmul.f32 %v1383_v10, %v1383_v10  ;;  %v1574_v32 = vmul.f32 0.7978846, %v1542_v9  ;;  %v3132_v6 = vpop.eup %3131 }
 0x2c3   : > { %1813 = vmatmul.bf16.gmra.mxu0 %v1728_v13  ;;  %v1637_v18 = vadd.f32 1.0, %v3132_v6 }
 0x2c4   : > { %v1479_v15 = vmul.f32 %v1447_v4, %v1383_v10  ;;  %3133 = vtanh.f32 %v1574_v32 }
 0x2c5   : > { %v1669_v25 = vmul.f32 0.5, %v1637_v18 }
 0x2c6   : > { %v1511_v16 = vmul.f32 0.044715, %v1479_v15 }
 0x2c7   : > { %v1243_v11 = vpop.f32.mrf.mxu2  ;;  %v1384_v17 = vpop.f32.mrf.mxu3  ;;  %v1701_v33 = vmul.f32 %v1669_v25, %v1378_v41 }
 0x2c8   : > { %v1543_v20 = vadd.f32 %v1511_v16, %v1383_v10  ;;  %v1244_v14 = vadd.f32 %v1243_v11, %v3523_v61  ;;  %v1385_v21 = vadd.f32 %v1384_v17, %v3580_v60 }
 0x2ca   : > { %v3134_v22 = vpop.eup %3133  ;;  %v1297_v23 = vpack.c.bf16 %v1244_v14, %v1242_v19  ;;  %v1448_v24 = vmul.f32 %v1385_v21, %v1385_v21  ;;  %v1575_v12 = vmul.f32 0.7978846, %v1543_v20 }
 0x2cb   : > { %v1638_v26 = vadd.f32 1.0, %v3134_v22 }
 0x2cc   : > { %v1480_v27 = vmul.f32 %v1448_v24, %v1385_v21  ;;  %1426 = vmatmul.bf16.gmra.mxu3 %v1297_v23  ;;  %3135 = vtanh.f32 %v1575_v12 }
 0x2cd   : > { %v1670_v28 = vmul.f32 0.5, %v1638_v26 }
 0x2ce   : > { %v1512_v29 = vmul.f32 0.044715, %v1480_v27 }
 0x2cf   : > { %v1246_v31 = vpop.f32.mrf.mxu2  ;;  %v1387_v34 = vpop.f32.mrf.mxu3  ;;  %v1702_v30 = vmul.f32 %v1670_v28, %v1380_v55 }
 0x2d0   : > { %v1544_v36 = vadd.f32 %v1512_v29, %v1385_v21  ;;  %v1388_v37 = vadd.f32 %v1387_v34, %v3580_v60  ;;  %v1247_v43 = vadd.f32 %v1246_v31, %v3523_v61 }
 0x2d1   : > { %v1729_v35 = vpack.c.bf16 %v1702_v30, %v1701_v33 }
 0x2d2   : > { %v1449_v38 = vmul.f32 %v1388_v37, %v1388_v37  ;;  %v1576_v40 = vmul.f32 0.7978846, %v1544_v36  ;;  %v3136_v42 = vpop.eup %3135 }
 0x2d3   : > { %1818 = vmatmul.bf16.gmra.mxu0 %v1729_v35  ;;  %v1639_v50 = vadd.f32 1.0, %v3136_v42 }
 0x2d4   : > { %v1481_v44 = vmul.f32 %v1449_v38, %v1388_v37  ;;  %3137 = vtanh.f32 %v1576_v40 }
 0x2d5   : > { %v1671_v49 = vmul.f32 0.5, %v1639_v50 }
 0x2d6   : > { %v1513_v45 = vmul.f32 0.044715, %v1481_v44 }
 0x2d7   : > { %v1248_v46 = vpop.f32.mrf.mxu2  ;;  %v1389_v47 = vpop.f32.mrf.mxu3  ;;  %v1703_v63 = vmul.f32 %v1671_v49, %v1383_v10 }
 0x2d8   : > { %v1545_v51 = vadd.f32 %v1513_v45, %v1388_v37  ;;  %v1249_v41 = vadd.f32 %v1248_v46, %v3523_v61  ;;  %v1390_v52 = vadd.f32 %v1389_v47, %v3580_v60 }
 0x2da   : > { %v3138_v48 = vpop.eup %3137  ;;  %v1298_v53 = vpack.c.bf16 %v1249_v41, %v1247_v43  ;;  %v1450_v54 = vmul.f32 %v1390_v52, %v1390_v52  ;;  %v1577_v39 = vmul.f32 0.7978846, %v1545_v51 }
 0x2db   : > { %v1640_v55 = vadd.f32 1.0, %v3138_v48 }
 0x2dc   : > { %v1482_v56 = vmul.f32 %v1450_v54, %v1390_v52  ;;  %1431 = vmatmul.bf16.gmra.mxu3 %v1298_v53  ;;  %3139 = vtanh.f32 %v1577_v39 }
 0x2dd   : > { %v1672_v57 = vmul.f32 0.5, %v1640_v55 }
 0x2de   : > { %v1514_v59 = vmul.f32 0.044715, %v1482_v56 }
 0x2df   : > { %v1392_v62 = vpop.f32.mrf.mxu3  ;;  %v1704_v0 = vmul.f32 %v1672_v57, %v1385_v21 }
 0x2e0   : > { %v1546_v1 = vadd.f32 %v1514_v59, %v1390_v52  ;;  %v1393_v2 = vadd.f32 %v1392_v62, %v3580_v60 }
 0x2e1   : > { %v1730_v61 = vpack.c.bf16 %v1704_v0, %v1703_v63 }
 0x2e2   : > { %v1451_v3 = vmul.f32 %v1393_v2, %v1393_v2  ;;  %v1578_v5 = vmul.f32 0.7978846, %v1546_v1  ;;  %v3140_v7 = vpop.eup %3139 }
 0x2e3   : > { %1823 = vmatmul.bf16.gmra.mxu0 %v1730_v61  ;;  %v1641_v4 = vadd.f32 1.0, %v3140_v7  ;;  %v3620_v61 = vperm.slane %v3577_v58, 4 }
 0x2e4   : > { %v1483_v8 = vmul.f32 %v1451_v3, %v1393_v2  ;;  %3141 = vtanh.f32 %v1578_v5 }
 0x2e5   : > { %v1673_v17 = vmul.f32 0.5, %v1641_v4 }
 0x2e6   : > { %v1515_v9 = vmul.f32 0.044715, %v1483_v8 }
 0x2e7   : > { %v1394_v13 = vpop.f32.mrf.mxu3  ;;  %v1705_v21 = vmul.f32 %v1673_v17, %v1388_v37 }
 0x2e8   : > { %v1547_v32 = vadd.f32 %v1515_v9, %v1393_v2  ;;  %v1395_v6 = vadd.f32 %v1394_v13, %v3580_v60 }
 0x2ea   : > { %v3142_v15 = vpop.eup %3141  ;;  %v1579_v16 = vmul.f32 0.7978846, %v1547_v32  ;;  %v1452_v10 = vmul.f32 %v1395_v6, %v1395_v6 }
 0x2eb   : > { %v1642_v11 = vadd.f32 1.0, %v3142_v15 }
 0x2ec   : > { %v1484_v18 = vmul.f32 %v1452_v10, %v1395_v6  ;;  %3143 = vtanh.f32 %v1579_v16 }
 0x2ed   : > { %v1674_v19 = vmul.f32 0.5, %v1642_v11 }
 0x2ee   : > { %v1516_v20 = vmul.f32 0.044715, %v1484_v18 }
 0x2ef   : > { %v1397_v14 = vpop.f32.mrf.mxu3  ;;  %v1706_v22 = vmul.f32 %v1674_v19, %v1390_v52 }
 0x2f0   : > { %v1548_v23 = vadd.f32 %v1516_v20, %v1395_v6  ;;  %v1398_v24 = vadd.f32 %v1397_v14, %v3580_v60 }
 0x2f1   : > { %v1731_v12 = vpack.c.bf16 %v1706_v22, %v1705_v21 }
 0x2f2   : > { %v1580_v26 = vmul.f32 0.7978846, %v1548_v23  ;;  %v1453_v25 = vmul.f32 %v1398_v24, %v1398_v24  ;;  %v3144_v27 = vpop.eup %3143 }
 0x2f3   : > { %1828 = vmatmul.bf16.gmra.mxu0 %v1731_v12  ;;  %v1643_v34 = vadd.f32 1.0, %v3144_v27 }
 0x2f4   : > { %3145 = vtanh.f32 %v1580_v26  ;;  %v1485_v28 = vmul.f32 %v1453_v25, %v1398_v24 }
 0x2f5   : > { %v1675_v40 = vmul.f32 0.5, %v1643_v34 }
 0x2f6   : > { %v1517_v29 = vmul.f32 0.044715, %v1485_v28 }
 0x2f7   : > { %v1399_v31 = vpop.f32.mrf.mxu3  ;;  %v1707_v47 = vmul.f32 %v1675_v40, %v1393_v2 }
 0x2f8   : > { %v1549_v33 = vadd.f32 %v1517_v29, %v1398_v24  ;;  %v1400_v30 = vadd.f32 %v1399_v31, %v3580_v60 }
 0x2fa   : > { %v3146_v36 = vpop.eup %3145  ;;  %v1581_v35 = vmul.f32 0.7978846, %v1549_v33  ;;  %v1454_v37 = vmul.f32 %v1400_v30, %v1400_v30 }
 0x2fb   : > { %v1644_v38 = vadd.f32 1.0, %v3146_v36 }
 0x2fc   : > { %v1486_v42 = vmul.f32 %v1454_v37, %v1400_v30  ;;  %3147 = vtanh.f32 %v1581_v35 }
 0x2fd   : > { %v1676_v44 = vmul.f32 0.5, %v1644_v38 }
 0x2fe   : > { %v1518_v45 = vmul.f32 0.044715, %v1486_v42 }
 0x2ff   : > { %v1402_v46 = vpop.f32.mrf.mxu3  ;;  %v1708_v50 = vmul.f32 %v1676_v44, %v1395_v6 }
 0x300   : > { %v1550_v43 = vadd.f32 %v1518_v45, %v1400_v30  ;;  %v1403_v51 = vadd.f32 %v1402_v46, %v3580_v60 }
 0x301   : > { %v1732_v41 = vpack.c.bf16 %v1708_v50, %v1707_v47 }
 0x302   : > { %v1582_v52 = vmul.f32 0.7978846, %v1550_v43  ;;  %v1455_v48 = vmul.f32 %v1403_v51, %v1403_v51  ;;  %v3148_v53 = vpop.eup %3147 }
 0x303   : > { %1833 = vmatmul.bf16.gmra.mxu0 %v1732_v41  ;;  %v1645_v49 = vadd.f32 1.0, %v3148_v53 }
 0x304   : > { %3149 = vtanh.f32 %v1582_v52  ;;  %v1487_v54 = vmul.f32 %v1455_v48, %v1403_v51 }
 0x305   : > { %v1677_v1 = vmul.f32 0.5, %v1645_v49 }
 0x306   : > { %v1519_v39 = vmul.f32 0.044715, %v1487_v54 }
 0x307   : > { %v1404_v55 = vpop.f32.mrf.mxu3  ;;  %v1709_v8 = vmul.f32 %v1677_v1, %v1398_v24 }
 0x308   : > { %v1551_v56 = vadd.f32 %v1519_v39, %v1403_v51  ;;  %v1405_v57 = vadd.f32 %v1404_v55, %v3580_v60 }
 0x30a   : > { %v3150_v59 = vpop.eup %3149  ;;  %v1583_v62 = vmul.f32 0.7978846, %v1551_v56  ;;  %v1456_v63 = vmul.f32 %v1405_v57, %v1405_v57 }
 0x30b   : > { %v1646_v0 = vadd.f32 1.0, %v3150_v59 }
 0x30c   : > { %v1488_v2 = vmul.f32 %v1456_v63, %v1405_v57  ;;  %3151 = vtanh.f32 %v1583_v62 }
 0x30d   : > { %v1678_v3 = vmul.f32 0.5, %v1646_v0 }
 0x30e   : > { %v1520_v5 = vmul.f32 0.044715, %v1488_v2 }
 0x30f   : > { %v1407_v7 = vpop.f32.mrf.mxu3  ;;  %v1710_v9 = vmul.f32 %v1678_v3, %v1400_v30 }
 0x310   : > { %v1552_v13 = vadd.f32 %v1520_v5, %v1405_v57  ;;  %v1408_v4 = vadd.f32 %v1407_v7, %v3580_v60  ;;  %v1799_v32 = vpop.f32.mrf.mxu0 }
 0x311   : > { %v3624_v6 = vadd.f32 %v1799_v32, %v3620_v61  ;;  %v1733_v15 = vpack.c.bf16 %v1710_v9, %v1709_v8 }
 0x312   : > { %v1584_v16 = vmul.f32 0.7978846, %v1552_v13  ;;  %v1457_v10 = vmul.f32 %v1408_v4, %v1408_v4  ;;  %v3152_v58 = vpop.eup %3151 }
 0x313   : > { %1838 = vmatmul.bf16.gmra.mxu0 %v1733_v15  ;;  %1879 = vadd.xlane.f32.xlu1 %v3624_v6  ;;  %v1647_v19 = vadd.f32 1.0, %v3152_v58 }
 0x314   : > { %3153 = vtanh.f32 %v1584_v16  ;;  %v1489_v11 = vmul.f32 %v1457_v10, %v1408_v4 }
 0x315   : > { %v1679_v25 = vmul.f32 0.5, %v1647_v19 }
 0x316   : > { %v1521_v17 = vmul.f32 0.044715, %v1489_v11 }
 0x317   : > { %v1409_v18 = vpop.f32.mrf.mxu3  ;;  %v1711_v34 = vmul.f32 %v1679_v25, %v1403_v51 }
 0x318   : > { %v1553_v20 = vadd.f32 %v1521_v17, %v1408_v4  ;;  %v1410_v14 = vadd.f32 %v1409_v18, %v3580_v60  ;;  %v1801_v21 = vpop.f32.mrf.mxu0 }
 0x319   : > { %v3629_v22 = vadd.f32 %v1801_v21, %v3620_v61 }
 0x31a   : > { %v3154_v23 = vpop.eup %3153  ;;  %v1585_v24 = vmul.f32 0.7978846, %v1553_v20  ;;  %v1458_v12 = vmul.f32 %v1410_v14, %v1410_v14 }
 0x31b   : > { %1881 = vadd.xlane.f32.xlu0 %v3629_v22  ;;  %v1648_v26 = vadd.f32 1.0, %v3154_v23 }
 0x31c   : > { %v1490_v27 = vmul.f32 %v1458_v12, %v1410_v14  ;;  %3155 = vtanh.f32 %v1585_v24 }
 0x31d   : > { %v1680_v28 = vmul.f32 0.5, %v1648_v26 }
 0x31e   : > { %v1522_v29 = vmul.f32 0.044715, %v1490_v27 }
 0x31f   : > { %v1412_v31 = vpop.f32.mrf.mxu3  ;;  %v1712_v33 = vmul.f32 %v1680_v28, %v1405_v57 }
 0x320   : > { %v1554_v30 = vadd.f32 %v1522_v29, %v1410_v14  ;;  %v1413_v36 = vadd.f32 %v1412_v31, %v3580_v60  ;;  %v1804_v35 = vpop.f32.mrf.mxu0 }
 0x321   : > { %v3634_v37 = vadd.f32 %v1804_v35, %v3620_v61  ;;  %v1734_v38 = vpack.c.bf16 %v1712_v33, %v1711_v34 }
 0x322   : > { %v1586_v40 = vmul.f32 0.7978846, %v1554_v30  ;;  %v1459_v42 = vmul.f32 %v1413_v36, %v1413_v36  ;;  %v3156_v44 = vpop.eup %3155 }
 0x323   : > { %1843 = vmatmul.bf16.gmra.mxu0 %v1734_v38  ;;  %1883 = vadd.xlane.f32.xlu2 %v3634_v37  ;;  %v1649_v50 = vadd.f32 1.0, %v3156_v44 }
 0x324   : > { %3157 = vtanh.f32 %v1586_v40  ;;  %v1491_v45 = vmul.f32 %v1459_v42, %v1413_v36 }
 0x325   : > { %v1681_v55 = vmul.f32 0.5, %v1649_v50 }
 0x326   : > { %v1523_v46 = vmul.f32 0.044715, %v1491_v45 }
 0x327   : > { %v1414_v47 = vpop.f32.mrf.mxu3  ;;  %v1713_v62 = vmul.f32 %v1681_v55, %v1408_v4 }
 0x328   : > { %v1555_v43 = vadd.f32 %v1523_v46, %v1413_v36  ;;  %v1415_v51 = vadd.f32 %v1414_v47, %v3580_v60  ;;  %v1806_v41 = vpop.f32.mrf.mxu0 }
 0x329   : > { %v3639_v52 = vadd.f32 %v1806_v41, %v3620_v61 }
 0x32a   : > { %v3158_v48 = vpop.eup %3157  ;;  %v1587_v53 = vmul.f32 0.7978846, %v1555_v43  ;;  %v1460_v54 = vmul.f32 %v1415_v51, %v1415_v51 }
 0x32b   : > { %1885 = vadd.xlane.f32.xlu0 %v3639_v52  ;;  %v1650_v39 = vadd.f32 1.0, %v3158_v48 }
 0x32c   : > { %v1492_v49 = vmul.f32 %v1460_v54, %v1415_v51  ;;  %3159 = vtanh.f32 %v1587_v53 }
 0x32d   : > { %v1682_v56 = vmul.f32 0.5, %v1650_v39 }
 0x32e   : > { %v1524_v57 = vmul.f32 0.044715, %v1492_v49 }
 0x32f   : > { %v1417_v59 = vpop.f32.mrf.mxu3  ;;  %v1714_v63 = vmul.f32 %v1682_v56, %v1410_v14 }
 0x330   : > { %v1556_v0 = vadd.f32 %v1524_v57, %v1415_v51  ;;  %v1418_v1 = vadd.f32 %v1417_v59, %v3580_v60  ;;  %v1809_v2 = vpop.f32.mrf.mxu0 }
 0x331   : > { %v3644_v3 = vadd.f32 %v1809_v2, %v3620_v61  ;;  %v1735_v5 = vpack.c.bf16 %v1714_v63, %v1713_v62 }
 0x332   : > { %v1588_v7 = vmul.f32 0.7978846, %v1556_v0  ;;  %v1461_v8 = vmul.f32 %v1418_v1, %v1418_v1  ;;  %v3160_v9 = vpop.eup %3159 }
 0x333   : > { %1848 = vmatmul.bf16.gmra.mxu0 %v1735_v5  ;;  %1887 = vadd.xlane.f32.xlu1 %v3644_v3  ;;  %v1651_v4 = vadd.f32 1.0, %v3160_v9 }
 0x334   : > { %3161 = vtanh.f32 %v1588_v7  ;;  %v1493_v13 = vmul.f32 %v1461_v8, %v1418_v1 }
 0x335   : > { %v1683_v14 = vmul.f32 0.5, %v1651_v4 }
 0x336   : > { %v1525_v32 = vmul.f32 0.044715, %v1493_v13 }
 0x337   : > { %v1419_v15 = vpop.f32.mrf.mxu3  ;;  %v1715_v26 = vmul.f32 %v1683_v14, %v1413_v36 }
 0x338   : > { %v1557_v16 = vadd.f32 %v1525_v32, %v1418_v1  ;;  %v1420_v10 = vadd.f32 %v1419_v15, %v3580_v60  ;;  %v1811_v58 = vpop.f32.mrf.mxu0 }
 0x339   : > { %v3649_v11 = vadd.f32 %v1811_v58, %v3620_v61 }
 0x33a   : > { %v3162_v17 = vpop.eup %3161  ;;  %v1589_v18 = vmul.f32 0.7978846, %v1557_v16  ;;  %v1462_v19 = vmul.f32 %v1420_v10, %v1420_v10 }
 0x33b   : > { %1889 = vadd.xlane.f32.xlu2 %v3649_v11  ;;  %v1652_v20 = vadd.f32 1.0, %v3162_v17 }
 0x33c   : > { %v1494_v21 = vmul.f32 %v1462_v19, %v1420_v10  ;;  %3163 = vtanh.f32 %v1589_v18 }
 0x33d   : > { %v1684_v23 = vmul.f32 0.5, %v1652_v20 }
 0x33e   : > { %v1526_v24 = vmul.f32 0.044715, %v1494_v21 }
 0x33f   : > { %v1422_v12 = vpop.f32.mrf.mxu3  ;;  %v1716_v25 = vmul.f32 %v1684_v23, %v1415_v51 }
 0x340   : > { %v1558_v27 = vadd.f32 %v1526_v24, %v1420_v10  ;;  %v1423_v28 = vadd.f32 %v1422_v12, %v3580_v60  ;;  %v1814_v29 = vpop.f32.mrf.mxu0 }
 0x341   : > { %v3654_v31 = vadd.f32 %v1814_v29, %v3620_v61  ;;  %v1736_v34 = vpack.c.bf16 %v1716_v25, %v1715_v26 }
 0x342   : > { %v1590_v33 = vmul.f32 0.7978846, %v1558_v27  ;;  %v1463_v30 = vmul.f32 %v1423_v28, %v1423_v28  ;;  %v3164_v35 = vpop.eup %3163 }
 0x343   : > { %1853 = vmatmul.bf16.gmra.mxu0 %v1736_v34  ;;  %1891 = vadd.xlane.f32.xlu0 %v3654_v31  ;;  %v1653_v36 = vadd.f32 1.0, %v3164_v35 }
 0x344   : > { %3165 = vtanh.f32 %v1590_v33  ;;  %v1495_v38 = vmul.f32 %v1463_v30, %v1423_v28 }
 0x345   : > { %v1685_v48 = vmul.f32 0.5, %v1653_v36 }
 0x346   : > { %v1527_v40 = vmul.f32 0.044715, %v1495_v38 }
 0x347   : > { %v1424_v42 = vpop.f32.mrf.mxu3  ;;  %v1717_v49 = vmul.f32 %v1685_v48, %v1418_v1 }
 0x348   : > { %v1559_v44 = vadd.f32 %v1527_v40, %v1423_v28  ;;  %v1425_v45 = vadd.f32 %v1424_v42, %v3580_v60  ;;  %v1816_v46 = vpop.f32.mrf.mxu0 }
 0x349   : > { %v3659_v47 = vadd.f32 %v1816_v46, %v3620_v61 }
 0x34a   : > { %v3166_v50 = vpop.eup %3165  ;;  %v1591_v43 = vmul.f32 0.7978846, %v1559_v44  ;;  %v1464_v51 = vmul.f32 %v1425_v45, %v1425_v45 }
 0x34b   : > { %1893 = vadd.xlane.f32.xlu1 %v3659_v47  ;;  %v1654_v41 = vadd.f32 1.0, %v3166_v50 }
 0x34c   : > { %v1496_v53 = vmul.f32 %v1464_v51, %v1425_v45  ;;  %3167 = vtanh.f32 %v1591_v43 }
 0x34d   : > { %v1686_v54 = vmul.f32 0.5, %v1654_v41 }
 0x34e   : > { %v1528_v39 = vmul.f32 0.044715, %v1496_v53 }
 0x34f   : > { %v1427_v55 = vpop.f32.mrf.mxu3  ;;  %v1718_v56 = vmul.f32 %v1686_v54, %v1420_v10 }
 0x350   : > { %v1560_v57 = vadd.f32 %v1528_v39, %v1425_v45  ;;  %v1428_v59 = vadd.f32 %v1427_v55, %v3580_v60  ;;  %v1819_v62 = vpop.f32.mrf.mxu0 }
 0x351   : > { %v3664_v63 = vadd.f32 %v1819_v62, %v3620_v61  ;;  %v1737_v0 = vpack.c.bf16 %v1718_v56, %v1717_v49 }
 0x352   : > { %v1592_v2 = vmul.f32 0.7978846, %v1560_v57  ;;  %v1465_v5 = vmul.f32 %v1428_v59, %v1428_v59  ;;  %v3168_v7 = vpop.eup %3167 }
 0x353   : > { %1858 = vmatmul.bf16.gmra.mxu0 %v1737_v0  ;;  %1895 = vadd.xlane.f32.xlu2 %v3664_v63  ;;  %v1655_v1 = vadd.f32 1.0, %v3168_v7 }
 0x354   : > { %3169 = vtanh.f32 %v1592_v2  ;;  %v1497_v8 = vmul.f32 %v1465_v5, %v1428_v59 }
 0x355   : > { %v1687_v19 = vmul.f32 0.5, %v1655_v1 }
 0x356   : > { %v1529_v9 = vmul.f32 0.044715, %v1497_v8 }
 0x357   : > { %v1429_v13 = vpop.f32.mrf.mxu3  ;;  %v1719_v24 = vmul.f32 %v1687_v19, %v1423_v28 }
 0x358   : > { %v1561_v32 = vadd.f32 %v1529_v9, %v1428_v59  ;;  %v1430_v15 = vadd.f32 %v1429_v13, %v3580_v60  ;;  %v1821_v4 = vpop.f32.mrf.mxu0 }
 0x359   : > { %v3669_v16 = vadd.f32 %v1821_v4, %v3620_v61 }
 0x35a   : > { %v3170_v10 = vpop.eup %3169  ;;  %v1593_v58 = vmul.f32 0.7978846, %v1561_v32  ;;  %v1466_v17 = vmul.f32 %v1430_v15, %v1430_v15 }
 0x35b   : > { %1897 = vadd.xlane.f32.xlu0 %v3669_v16  ;;  %v1656_v18 = vadd.f32 1.0, %v3170_v10 }
 0x35c   : > { %v1498_v20 = vmul.f32 %v1466_v17, %v1430_v15  ;;  %3171 = vtanh.f32 %v1593_v58 }
 0x35d   : > { %v1688_v14 = vmul.f32 0.5, %v1656_v18 }
 0x35e   : > { %v1530_v21 = vmul.f32 0.044715, %v1498_v20 }
 0x35f   : > { %v1432_v23 = vpop.f32.mrf.mxu3  ;;  %v1720_v12 = vmul.f32 %v1688_v14, %v1425_v45 }
 0x360   : > { %v1562_v26 = vadd.f32 %v1530_v21, %v1430_v15  ;;  %v1433_v25 = vadd.f32 %v1432_v23, %v3580_v60  ;;  %v1824_v27 = vpop.f32.mrf.mxu0 }
 0x361   : > { %v3674_v29 = vadd.f32 %v1824_v27, %v3620_v61  ;;  %v1738_v34 = vpack.c.bf16 %v1720_v12, %v1719_v24 }
 0x362   : > { %v1594_v33 = vmul.f32 0.7978846, %v1562_v26  ;;  %v1467_v30 = vmul.f32 %v1433_v25, %v1433_v25  ;;  %v3172_v35 = vpop.eup %3171 }
 0x363   : > { %1863 = vmatmul.bf16.gmra.mxu0 %v1738_v34  ;;  %1899 = vadd.xlane.f32.xlu1 %v3674_v29  ;;  %v1657_v28 = vadd.f32 1.0, %v3172_v35 }
 0x364   : > { %3173 = vtanh.f32 %v1594_v33  ;;  %v1499_v38 = vmul.f32 %v1467_v30, %v1433_v25 }
 0x365   : > { %v1689_v48 = vmul.f32 0.5, %v1657_v28 }
 0x366   : > { %v1531_v40 = vmul.f32 0.044715, %v1499_v38 }
 0x367   : > { %v1434_v42 = vpop.f32.mrf.mxu3  ;;  %v1721_v55 = vmul.f32 %v1689_v48, %v1428_v59 }
 0x368   : > { %v1563_v36 = vadd.f32 %v1531_v40, %v1433_v25  ;;  %v1435_v44 = vadd.f32 %v1434_v42, %v3580_v60  ;;  %v1826_v45 = vpop.f32.mrf.mxu0 }
 0x369   : > { %v3679_v46 = vadd.f32 %v1826_v45, %v3620_v61 }
 0x36a   : > { %v3174_v50 = vpop.eup %3173  ;;  %v1595_v43 = vmul.f32 0.7978846, %v1563_v36  ;;  %v1468_v51 = vmul.f32 %v1435_v44, %v1435_v44 }
 0x36b   : > { %1901 = vadd.xlane.f32.xlu2 %v3679_v46  ;;  %v1658_v41 = vadd.f32 1.0, %v3174_v50 }
 0x36c   : > { %v1500_v53 = vmul.f32 %v1468_v51, %v1435_v44  ;;  %3175 = vtanh.f32 %v1595_v43 }
 0x36d   : > { %v1690_v54 = vmul.f32 0.5, %v1658_v41  ;;  %v3256_v41 = vmov 128.0  }
 0x36e   : > { %v1532_v39 = vmul.f32 0.044715, %v1500_v53 }
 0x36f   : > { %v1722_v49 = vmul.f32 %v1690_v54, %v1430_v15 }
 0x370   : > { %v1564_v56 = vadd.f32 %v1532_v39, %v1435_v44  ;;  %v1829_v57 = vpop.f32.mrf.mxu0 }
 0x371   : > { %v3683_v60 = vadd.f32 %v1829_v57, %v3620_v61  ;;  %v1739_v62 = vpack.c.bf16 %v1722_v49, %v1721_v55 }
 0x372   : > { %v1596_v0 = vmul.f32 0.7978846, %v1564_v56  ;;  %v3176_v2 = vpop.eup %3175 }
 0x373   : > { %1868 = vmatmul.bf16.gmra.mxu0 %v1739_v62  ;;  %1903 = vadd.xlane.f32.xlu0 %v3683_v60  ;;  %v1659_v5 = vadd.f32 1.0, %v3176_v2 }
 0x374   : > { %3177 = vtanh.f32 %v1596_v0 }
 0x375   : > { %v1691_v13 = vmul.f32 0.5, %v1659_v5  ;;  %3179 = vrcp.f32 %v3256_v41 }
 0x377   : > { %v1723_v32 = vmul.f32 %v1691_v13, %v1433_v25 }
 0x378   : > { %v1831_v7 = vpop.f32.mrf.mxu0 }
 0x379   : > { %v3687_v8 = vadd.f32 %v1831_v7, %v3620_v61 }
 0x37a   : > { %v3178_v9 = vpop.eup %3177 }
 0x37b   : > { %1905 = vadd.xlane.f32.xlu1 %v3687_v8  ;;  %v1660_v59 = vadd.f32 1.0, %v3178_v9  ;;  %v3180_v39 = vpop.eup %3179 }
 0x37c   : > { %v1944_v56 = vmul.f32 128.0, %v3180_v39  ;;  %vm1948_vm2 = vweird.f32 %v3180_v39 }
 0x37d   : > { %v1692_v1 = vmul.f32 0.5, %v1660_v59 }
 0x37e   : > { %v1945_v2 = vsub.f32 1.0, %v1944_v56 }
 0x37f   : > { %v1724_v15 = vmul.f32 %v1692_v1, %v1435_v44 }
 0x380   : > { %v1834_v4 = vpop.f32.mrf.mxu0  ;;  %v1946_v9 = vmul.f32 %v3180_v39, %v1945_v2 }
 0x381   : > { %v3691_v10 = vadd.f32 %v1834_v4, %v3620_v61  ;;  %v1740_v58 = vpack.c.bf16 %v1724_v15, %v1723_v32 }
 0x382   : > { %v1947_v32 = vadd.f32 %v3180_v39, %v1946_v9 }
 0x383   : > { %1873 = vmatmul.bf16.gmra.mxu0 %v1740_v58  ;;  %1907 = vadd.xlane.f32.xlu2 %v3691_v10 }
 0x384   : > { %v3766_v58 = vsel %vm1948_vm2, %v3180_v39, %v1947_v32 }
 0x386   : > { %v3734_v36 = vpop.xlane.xlu1 %1879 }
 0x388   : > { %v1836_v17 = vpop.f32.mrf.mxu0 }
 0x389   : > { %v3695_v18 = vadd.f32 %v1836_v17, %v3620_v61 }
 0x38b   : > { %1909 = vadd.xlane.f32.xlu1 %v3695_v18 }
 0x38e   : > { %v3746_v48 = vpop.xlane.xlu0 %1881 }
 0x390   : > { %v1839_v19 = vpop.f32.mrf.mxu0 }
 0x391   : > { %v3699_v20 = vadd.f32 %v1839_v19, %v3620_v61 }
 0x393   : > { %1911 = vadd.xlane.f32.xlu1 %v3699_v20 }
 0x396   : > { %v3736_v44 = vpop.xlane.xlu2 %1883 }
 0x398   : > { %v1841_v14 = vpop.f32.mrf.mxu0 }
 0x399   : > { %v3703_v21 = vadd.f32 %v1841_v14, %v3620_v61 }
 0x39b   : > { %1913 = vadd.xlane.f32.xlu2 %v3703_v21 }
 0x39e   : > { %v3754_v57 = vpop.xlane.xlu0 %1885 }
 0x3a0   : > { %v1844_v23 = vpop.f32.mrf.mxu0 }
 0x3a1   : > { %v3707_v24 = vadd.f32 %v1844_v23, %v3620_v61 }
 0x3a3   : > { %1915 = vadd.xlane.f32.xlu0 %v3707_v24 }
 0x3a6   : > { %v3742_v43 = vpop.xlane.xlu1 %1887 }
 0x3a8   : > { %v1846_v12 = vpop.f32.mrf.mxu0 }
 0x3a9   : > { %v3711_v26 = vadd.f32 %v1846_v12, %v3620_v61 }
 0x3ab   : > { %1917 = vadd.xlane.f32.xlu1 %v3711_v26 }
 0x3ae   : > { %v3744_v51 = vpop.xlane.xlu2 %1889 }
 0x3b0   : > { %v1849_v25 = vpop.f32.mrf.mxu0 }
 0x3b1   : > { %v3715_v27 = vadd.f32 %v1849_v25, %v3620_v61 }
 0x3b3   : > { %1919 = vadd.xlane.f32.xlu2 %v3715_v27 }
 0x3b6   : > { %v3760_v59 = vpop.xlane.xlu0 %1891 }
 0x3b8   : > { %v1851_v34 = vpop.f32.mrf.mxu0 }
 0x3b9   : > { %v3719_v33 = vadd.f32 %v1851_v34, %v3620_v61 }
 0x3bb   : > { %1921 = vadd.xlane.f32.xlu0 %v3719_v33 }
 0x3be   : > { %v3752_v55 = vpop.xlane.xlu1 %1893 }
 0x3c0   : > { %v1854_v30 = vpop.f32.mrf.mxu0 }
 0x3c1   : > { %v3723_v35 = vadd.f32 %v1854_v30, %v3620_v61 }
 0x3c3   : > { %1923 = vadd.xlane.f32.xlu1 %v3723_v35 }
 0x3c6   : > { %v1896_v49 = vpop.xlane.xlu2 %1895 }
 0x3c7   : > { %v1958_v2 = vmul.f32 %v3766_v58, %v1896_v49 }
 0x3c8   : > { %v1856_v38 = vpop.f32.mrf.mxu0 }
 0x3c9   : > { %v3727_v40 = vadd.f32 %v1856_v38, %v3620_v61 }
 0x3cb   : > { %1925 = vadd.xlane.f32.xlu2 %v3727_v40 }
 0x3ce   : > { %v1898_v17 = vpop.xlane.xlu0 %1897 }
 0x3cf   : > { %v1959_v32 = vmul.f32 %v3766_v58, %v1898_v17 }
 0x3d0   : > { %v1859_v42 = vpop.f32.mrf.mxu0 }
 0x3d1   : > { %v3731_v28 = vadd.f32 %v1859_v42, %v3620_v61 }
 0x3d3   : > { %1927 = vadd.xlane.f32.xlu0 %v3731_v28 }
 0x3d6   : > { %v1900_v5 = vpop.xlane.xlu1 %1899 }
 0x3d8   : > { %v1861_v45 = vpop.f32.mrf.mxu0 }
 0x3d9   : > { %v3739_v50 = vadd.f32 %v1861_v45, %v3620_v61 }
 0x3db   : > { %1929 = vadd.xlane.f32.xlu1 %v3739_v50 }
 0x3de   : > { %v1902_v7 = vpop.xlane.xlu2 %1901 }
 0x3df   : > { %v1961_v42 = vmul.f32 %v3766_v58, %v1902_v7 }
 0x3e0   : > { %v1864_v53 = vpop.f32.mrf.mxu0 }
 0x3e1   : > { %v3749_v54 = vadd.f32 %v1864_v53, %v3620_v61  ;;  %v3791_v56 = vsub.f32 %v3679_v46, %v1961_v42 }
 0x3e3   : > { %1931 = vadd.xlane.f32.xlu2 %v3749_v54 }
 0x3e6   : > { %v1904_v30 = vpop.xlane.xlu0 %1903 }
 0x3e7   : > { %v1962_v39 = vmul.f32 %v3766_v58, %v1904_v30 }
 0x3e8   : > { %v1866_v62 = vpop.f32.mrf.mxu0 }
 0x3e9   : > { %v3757_v0 = vadd.f32 %v1866_v62, %v3620_v61 }
 0x3eb   : > { %1933 = vadd.xlane.f32.xlu0 %v3757_v0 }
 0x3ee   : > { %v1906_v15 = vpop.xlane.xlu1 %1905 }
 0x3ef   : > { %v1963_v7 = vmul.f32 %v3766_v58, %v1906_v15  ;;  %v1960_v15 = vmul.f32 %v3766_v58, %v1900_v5 }
 0x3f0   : > { %v1869_v13 = vpop.f32.mrf.mxu0 }
 0x3f1   : > { %v3763_v1 = vadd.f32 %v1869_v13, %v3620_v61  ;;  %v2025_v13 = vmul.f32 %v3791_v56, %v3791_v56  ;;  %v3811_v49 = vsub.f32 %v3687_v8, %v1963_v7  ;;  %v3824_v8 = vsub.f32 %v3674_v29, %v1960_v15 }
 0x3f3   : > { %1935 = vadd.xlane.f32.xlu2 %v3763_v1  ;;  %v2027_v17 = vmul.f32 %v3811_v49, %v3811_v49 }
 0x3f6   : > { %v1908_v4 = vpop.xlane.xlu2 %1907 }
 0x3f7   : > { %v1964_v14 = vmul.f32 %v3766_v58, %v1908_v4 }
 0x3f8   : > { %v1871_v19 = vpop.f32.mrf.mxu0 }
 0x3f9   : > { %v3770_v23 = vadd.f32 %v1871_v19, %v3620_v61  ;;  %v3774_v12 = vsub.f32 %v3691_v10, %v1964_v14 }
 0x3fb   : > { %1937 = vadd.xlane.f32.xlu1 %v3770_v23  ;;  %v2028_v53 = vmul.f32 %v3774_v12, %v3774_v12 }
 0x3fe   : > { %v1910_v25 = vpop.xlane.xlu1 %1909 }
 0x3ff   : > { %v1965_v34 = vmul.f32 %v3766_v58, %v1910_v25 }
 0x400   : > { %v1874_v38 = vpop.f32.mrf.mxu0 }
 0x401   : > { %v3779_v45 = vsub.f32 %v3695_v18, %v1965_v34  ;;  %v3782_v41 = vadd.f32 %v1874_v38, %v3620_v61  ;;  %v3794_v18 = vsub.f32 %v3683_v60, %v1962_v39  ;;  %v3808_v60 = vsub.f32 %v3664_v63, %v1958_v2 }
 0x403   : > { %1939 = vadd.xlane.f32.xlu0 %v3782_v41  ;;  %2074 = vadd.xlane.f32.xlu1 %v2028_v53  ;;  %v2029_v10 = vmul.f32 %v3779_v45, %v3779_v45  ;;  %v2026_v46 = vmul.f32 %v3794_v18, %v3794_v18  ;;  %v2022_v4 = vmul.f32 %v3808_v60, %v3808_v60 }
 0x405   : > { %2076 = vadd.xlane.f32.xlu2 %v2029_v10 }
 0x406   : > { %v3828_v5 = vpop.xlane.xlu1 %1911 }
 0x408   : > { %v1876_v62 = vpop.f32.mrf.mxu0 }
 0x409   : > { %v3799_v9 = vadd.f32 %v1876_v62, %v3620_v61  ;;  %v3814_v61 = vsub.f32 %v3669_v16, %v1959_v32  ;;  %v2024_v16 = vmul.f32 %v3824_v8, %v3824_v8 }
 0x40b   : > { %1941 = vadd.xlane.f32.xlu0 %v3799_v9  ;;  %2068 = vadd.xlane.f32.xlu1 %v2025_v13  ;;  %v2023_v63 = vmul.f32 %v3814_v61, %v3814_v61 }
 0x40d   : > { %2070 = vadd.xlane.f32.xlu2 %v2026_v46 }
 0x40e   : > { %v3830_v19 = vpop.xlane.xlu2 %1913 }
 0x413   : > { %2062 = vadd.xlane.f32.xlu1 %v2022_v4  ;;  %2072 = vadd.xlane.f32.xlu0 %v2027_v17 }
 0x415   : > { %2064 = vadd.xlane.f32.xlu2 %v2023_v63 }
 0x416   : > { %v3834_v25 = vpop.xlane.xlu0 %1915 }
 0x41b   : > { %2066 = vadd.xlane.f32.xlu0 %v2024_v16 }
 0x41e   : > { %v3832_v14 = vpop.xlane.xlu1 %1917 }
 0x426   : > { %v1920_v34 = vpop.xlane.xlu2 %1919 }
 0x42e   : > { %v3842_v53 = vpop.xlane.xlu0 %1921 }
 0x436   : > { %v1924_v30 = vpop.xlane.xlu1 %1923 }
 0x437   : > { %v1972_v38 = vmul.f32 %v3766_v58, %v1924_v30 }
 0x439   : > { %v3838_v29 = vsub.f32 %v3723_v35, %v1972_v38 }
 0x43b   : > { %v2036_v42 = vmul.f32 %v3838_v29, %v3838_v29 }
 0x43d   : > { %2090 = vadd.xlane.f32.xlu0 %v2036_v42 }
 0x43e   : > { %v1926_v39 = vpop.xlane.xlu2 %1925 }
 0x43f   : > { %v1973_v10 = vmul.f32 %v3766_v58, %v1926_v39 }
 0x441   : > { %v3846_v62 = vsub.f32 %v3727_v40, %v1973_v10 }
 0x443   : > { %v2037_v2 = vmul.f32 %v3846_v62, %v3846_v62 }
 0x445   : > { %2092 = vadd.xlane.f32.xlu1 %v2037_v2 }
 0x446   : > { %v1928_v7 = vpop.xlane.xlu0 %1927 }
 0x447   : > { %v1974_v35 = vmul.f32 %v3766_v58, %v1928_v7 }
 0x449   : > { %v3852_v13 = vsub.f32 %v3731_v28, %v1974_v35 }
 0x44b   : > { %v2038_v32 = vmul.f32 %v3852_v13, %v3852_v13 }
 0x44d   : > { %2094 = vadd.xlane.f32.xlu2 %v2038_v32  ;;  %v1970_v32 = vmul.f32 %v3766_v58, %v1920_v34 }
 0x44e   : > { %v1930_v46 = vpop.xlane.xlu1 %1929 }
 0x44f   : > { %v1975_v15 = vmul.f32 %v3766_v58, %v1930_v46 }
 0x451   : > { %v3858_v40 = vsub.f32 %v3739_v50, %v1975_v15 }
 0x453   : > { %v2039_v4 = vmul.f32 %v3858_v40, %v3858_v40 }
 0x455   : > { %2096 = vadd.xlane.f32.xlu0 %v2039_v4 }
 0x456   : > { %v1932_v17 = vpop.xlane.xlu2 %1931 }
 0x457   : > { %v1976_v63 = vmul.f32 %v3766_v58, %v1932_v17 }
 0x459   : > { %v3864_v28 = vsub.f32 %v3749_v54, %v1976_v63 }
 0x45b   : > { %v2040_v16 = vmul.f32 %v3864_v28, %v3864_v28 }
 0x45d   : > { %2098 = vadd.xlane.f32.xlu1 %v2040_v16 }
 0x45e   : > { %v1934_v30 = vpop.xlane.xlu0 %1933 }
 0x45f   : > { %v1977_v38 = vmul.f32 %v3766_v58, %v1934_v30 }
 0x461   : > { %v3870_v50 = vsub.f32 %v3757_v0, %v1977_v38  ;;  %v1957_v38 = vmul.f32 %v3766_v58, %v3752_v55  ;;  %v1967_v55 = vmul.f32 %v3766_v58, %v3830_v19 }
 0x463   : > { %v2041_v42 = vmul.f32 %v3870_v50, %v3870_v50 }
 0x465   : > { %2100 = vadd.xlane.f32.xlu2 %v2041_v42 }
 0x466   : > { %v1936_v39 = vpop.xlane.xlu2 %1935 }
 0x467   : > { %v1978_v10 = vmul.f32 %v3766_v58, %v1936_v39 }
 0x469   : > { %v3876_v54 = vsub.f32 %v3763_v1, %v1978_v10  ;;  %v3888_v1 = vsub.f32 %v3715_v27, %v1970_v32  ;;  %v3911_v10 = vsub.f32 %v3659_v47, %v1957_v38  ;;  %v1952_v47 = vmul.f32 %v3766_v58, %v3736_v44 }
 0x46b   : > { %v2042_v2 = vmul.f32 %v3876_v54, %v3876_v54  ;;  %v2034_v39 = vmul.f32 %v3888_v1, %v3888_v1 }
 0x46d   : > { %2102 = vadd.xlane.f32.xlu0 %v2042_v2 }
 0x46e   : > { %v1938_v7 = vpop.xlane.xlu1 %1937 }
 0x46f   : > { %v1979_v35 = vmul.f32 %v3766_v58, %v1938_v7 }
 0x471   : > { %v3882_v0 = vsub.f32 %v3770_v23, %v1979_v35 }
 0x473   : > { %v2043_v46 = vmul.f32 %v3882_v0, %v3882_v0 }
 0x475   : > { %2104 = vadd.xlane.f32.xlu1 %v2043_v46 }
 0x476   : > { %v1940_v15 = vpop.xlane.xlu0 %1939  ;;  %v2075_v4 = vpop.xlane.xlu1 %2074 }
 0x477   : > { %v1980_v17 = vmul.f32 %v3766_v58, %v1940_v15  ;;  %v2124_v63 = vmul.f32 %v2075_v4, %v3766_v58 }
 0x478   : > { %v2077_v16 = vpop.xlane.xlu2 %2076 }
 0x479   : > { %v3893_v30 = vsub.f32 %v3782_v41, %v1980_v17  ;;  %v3895_v23 = vadd.f32 1e-06, %v2124_v63  ;;  %v2125_v34 = vmul.f32 %v2077_v16, %v3766_v58  ;;  %v1955_v41 = vmul.f32 %v3766_v58, %v3744_v51 }
 0x47a   : > { %v1969_v51 = vmul.f32 %v3766_v58, %v3832_v14  ;;  %v3935_v16 = vsub.f32 %v3703_v21, %v1967_v55 }
 0x47b   : > { %3181 = vrsqrt.f32 %v3895_v23  ;;  %v3901_v42 = vadd.f32 1e-06, %v2125_v34  ;;  %v2044_v27 = vmul.f32 %v3893_v30, %v3893_v30  ;;  %v3918_v46 = vsub.f32 %v3649_v11, %v1955_v41 }
 0x47c   : > { %v1954_v11 = vmul.f32 %v3766_v58, %v3742_v43  ;;  %v2021_v34 = vmul.f32 %v3911_v10, %v3911_v10  ;;  %v3951_v21 = vsub.f32 %v3711_v26, %v1969_v51  ;;  %v1956_v26 = vmul.f32 %v3766_v58, %v3760_v59 }
 0x47d   : > { %3183 = vrsqrt.f32 %v3901_v42  ;;  %2106 = vadd.xlane.f32.xlu0 %v2044_v27  ;;  %2086 = vadd.xlane.f32.xlu1 %v2034_v39  ;;  %v2019_v41 = vmul.f32 %v3918_v46, %v3918_v46  ;;  %vm2320_vm4 = vweird.f32 %v3895_v23  ;;  %vm2330_vm7 = vweird.f32 %v3901_v42 }
 0x47e   : > { %v1942_v2 = vpop.xlane.xlu0 %1941  ;;  %v2069_v7 = vpop.xlane.xlu1 %2068  ;;  %v3963_v55 = vsub.f32 %v3644_v3, %v1954_v11  ;;  %v2031_v3 = vmul.f32 %v3935_v16, %v3935_v16  ;;  %v2033_v11 = vmul.f32 %v3951_v21, %v3951_v21 }
 0x47f   : > { %v1981_v35 = vmul.f32 %v3766_v58, %v1942_v2  ;;  %v2121_v32 = vmul.f32 %v2069_v7, %v3766_v58 }
 0x480   : > { %v2071_v15 = vpop.xlane.xlu2 %2070 }
 0x481   : > { %v3922_v4 = vpop.eup %3181  ;;  %v3927_v19 = vsub.f32 %v3799_v9, %v1981_v35  ;;  %v3929_v17 = vadd.f32 1e-06, %v2121_v32  ;;  %v2122_v63 = vmul.f32 %v2071_v15, %v3766_v58  ;;  %v1971_v9 = vmul.f32 %v3766_v58, %v3842_v53 }
 0x482   : > { %v2315_v14 = vmul.f32 %v3922_v4, %v3895_v23  ;;  %v3959_v53 = vsub.f32 %v3634_v37, %v1952_v47  ;;  %vm2321_vm3 = vweird.f32 %v3922_v4 }
 0x483   : > { %v3941_v44 = vpop.eup %3183  ;;  %3185 = vrsqrt.f32 %v3929_v17  ;;  %v3946_v38 = vadd.f32 1e-06, %v2122_v63  ;;  %v2045_v43 = vmul.f32 %v3927_v19, %v3927_v19  ;;  %v3969_v51 = vsub.f32 %v3719_v33, %v1971_v9  ;;  %vm3992_vm6 = vmor %vm2320_vm4, %vm2321_vm3 }
 0x484   : > { %v2316_v27 = vmul.f32 %v3922_v4, %v2315_v14  ;;  %v2325_v39 = vmul.f32 %v3941_v44, %v3901_v42  ;;  %vm2331_vm5 = vweird.f32 %v3941_v44  ;;  %v4010_v42 = vsub.f32 %v3654_v31, %v1956_v26 }
 0x485   : > { %3187 = vrsqrt.f32 %v3946_v38  ;;  %2108 = vadd.xlane.f32.xlu2 %v2045_v43  ;;  %2060 = vadd.xlane.f32.xlu0 %v2021_v34  ;;  %vm2332_vm8 = vmor %vm2330_vm7, %vm2331_vm5  ;;  %vm2300_vm10 = vweird.f32 %v3946_v38  ;;  %vm2290_vm12 = vweird.f32 %v3929_v17 }
 0x486   : > { %v2317_v2 = vmul.f32 0.5, %v2316_v27  ;;  %v2326_v7 = vmul.f32 %v3941_v44, %v2325_v39  ;;  %2056 = vadd.xlane.f32.xlu1 %v2019_v41  ;;  %v2073_v35 = vpop.xlane.xlu0 %2072  ;;  %v2063_v32 = vpop.xlane.xlu1 %2062 }
 0x487   : > { %v2123_v37 = vmul.f32 %v2073_v35, %v3766_v58  ;;  %v2118_v15 = vmul.f32 %v2063_v32, %v3766_v58 }
 0x488   : > { %v2318_v47 = vsub.f32 1.5, %v2317_v2  ;;  %v2327_v59 = vmul.f32 0.5, %v2326_v7  ;;  %v2065_v63 = vpop.xlane.xlu2 %2064  ;;  %v2035_v7 = vmul.f32 %v3969_v51, %v3969_v51 }
 0x489   : > { %v3978_v14 = vpop.eup %3185  ;;  %v3981_v33 = vadd.f32 1e-06, %v2123_v37  ;;  %v3983_v34 = vadd.f32 1e-06, %v2118_v15  ;;  %v2119_v9 = vmul.f32 %v2065_v63, %v3766_v58 }
 0x48a   : > { %v2319_v43 = vmul.f32 %v3922_v4, %v2318_v47  ;;  %v2328_v27 = vsub.f32 1.5, %v2327_v59  ;;  %v2285_v39 = vmul.f32 %v3978_v14, %v3929_v17  ;;  %v3246_v47 = vld [vmem:[%s4770_s6] sm:$0xff]  ;;  %vm2291_vm11 = vweird.f32 %v3978_v14 }
 0x48b   : > { %v3990_v41 = vpop.eup %3187  ;;  %3189 = vrsqrt.f32 %v3981_v33  ;;  %v3998_v23 = vadd.f32 1e-06, %v2119_v9  ;;  %v1950_v17 = vmul.f32 %v3766_v58, %v3734_v36  ;;  %vm4079_vm15 = vmor %vm2290_vm12, %vm2291_vm11  ;;  %vm2310_vm0 = vweird.f32 %v3981_v33 }
 0x48c   : > { %v2323_v35 = vsel %vm3992_vm6, %v3922_v4, %v2319_v43  ;;  %v2329_v32 = vmul.f32 %v3941_v44, %v2328_v27  ;;  %v2286_v37 = vmul.f32 %v3978_v14, %v2285_v39  ;;  %v2295_v15 = vmul.f32 %v3990_v41, %v3946_v38 }
 0x48d   : > { %3191 = vrsqrt.f32 %v3983_v34  ;;  %2088 = vadd.xlane.f32.xlu2 %v2035_v7  ;;  %2084 = vadd.xlane.f32.xlu0 %v2033_v11  ;;  %v4016_v4 = vperm.slane %v3246_v47, 5  ;;  %v2508_v59 = vmul.f32 %v2323_v35, %v3774_v12  ;;  %v2018_v39 = vmul.f32 %v3963_v55, %v3963_v55 }
 0x48e   : > { %v2333_v63 = vsel %vm2332_vm8, %v3941_v44, %v2329_v32  ;;  %v2287_v9 = vmul.f32 0.5, %v2286_v37  ;;  %v2296_v43 = vmul.f32 %v3990_v41, %v2295_v15  ;;  %3193 = vrsqrt.f32 %v3998_v23  ;;  %2080 = vadd.xlane.f32.xlu1 %v2031_v3  ;;  %v2067_v31 = vpop.xlane.xlu0 %2066 }
 0x48f   : > { %v2509_v26 = vmul.f32 %v2333_v63, %v3779_v45  ;;  %v2120_v11 = vmul.f32 %v2067_v31, %v3766_v58  ;;  %v2016_v12 = vmul.f32 %v3959_v53, %v3959_v53  ;;  %v4031_v35 = vperm.slane %v3246_v47, 6 }
 0x490   : > { %v2297_v27 = vmul.f32 0.5, %v2296_v43  ;;  %v2541_v3 = vmul.f32 %v4016_v4, %v2508_v59  ;;  %v2288_v32 = vsub.f32 1.5, %v2287_v9  ;;  %v2020_v15 = vmul.f32 %v4010_v42, %v4010_v42 }
 0x491   : > { %v3190_v2 = vpop.eup %3189  ;;  %v4028_v44 = vadd.f32 1e-06, %v2120_v11  ;;  %v2542_v7 = vmul.f32 %v4016_v4, %v2509_v26  ;;  %v1966_v43 = vmul.f32 %v3766_v58, %v3828_v5  ;;  %v1968_v31 = vmul.f32 %v3766_v58, %v3834_v25 }
 0x492   : > { %v2298_v45 = vsub.f32 1.5, %v2297_v27  ;;  %v2305_v37 = vmul.f32 %v3190_v2, %v3981_v33  ;;  %vm2301_vm9 = vweird.f32 %v3990_v41  ;;  %v2574_v25 = vadd.f32 %v4031_v35, %v2541_v3 }
 0x493   : > { %v4037_v63 = vpop.eup %3191  ;;  %3195 = vrsqrt.f32 %v4028_v44  ;;  %v2575_v47 = vadd.f32 %v4031_v35, %v2542_v7  ;;  %v2289_v27 = vmul.f32 %v3978_v14, %v2288_v32  ;;  %v4062_v38 = vsub.f32 %v3707_v24, %v1968_v31  ;;  %vm4067_vm13 = vmor %vm2300_vm10, %vm2301_vm9 }
 0x494   : > { %v4045_v59 = vpop.eup %3193  ;;  %v2299_v9 = vmul.f32 %v3990_v41, %v2298_v45  ;;  %v2306_v26 = vmul.f32 %v3190_v2, %v2305_v37  ;;  %v2255_v11 = vmul.f32 %v4037_v63, %v3983_v34  ;;  %v4059_v37 = vsub.f32 %v3699_v20, %v1966_v43 }
 0x495   : > { %v2265_v5 = vmul.f32 %v4045_v59, %v3998_v23  ;;  %2058 = vadd.xlane.f32.xlu2 %v2020_v15  ;;  %2610 = vmatpush.msra.mxu1 %v2575_v47  ;;  %vm2311_vm14 = vweird.f32 %v3190_v2  ;;  %v1953_v36 = vmul.f32 %v3766_v58, %v3754_v57  ;;  %vm2271_vm2 = vweird.f32 %v4045_v59 }
 0x496   : > { %v2307_v7 = vmul.f32 0.5, %v2306_v26  ;;  %v2256_v45 = vmul.f32 %v4037_v63, %v2255_v11  ;;  %2054 = vadd.xlane.f32.xlu0 %v2018_v39  ;;  %2050 = vadd.xlane.f32.xlu1 %v2016_v12  ;;  %v2303_v39 = vsel %vm4067_vm13, %v3990_v41, %v2299_v9  ;;  %v2293_v41 = vsel %vm4079_vm15, %v3978_v14, %v2289_v27  ;;  %vm2312_vm1 = vmor %vm2310_vm0, %vm2311_vm14 }
 0x497   : > { %v2266_v32 = vmul.f32 %v4045_v59, %v2265_v5  ;;  %2611 = vmatpush.msra.mxu1 %v2574_v25  ;;  %v2032_v11 = vmul.f32 %v4062_v38, %v4062_v38  ;;  %v2506_v5 = vmul.f32 %v2303_v39, %v3794_v18  ;;  %v2030_v14 = vmul.f32 %v4059_v37, %v4059_v37 }
 0x498   : > { %v2308_v20 = vsub.f32 1.5, %v2307_v7  ;;  %v2257_v12 = vmul.f32 0.5, %v2256_v45  ;;  %v2505_v57 = vmul.f32 %v2293_v41, %v3791_v56  ;;  %vm2261_vm3 = vweird.f32 %v4037_v63 }
 0x499   : > { %v3196_v24 = vpop.eup %3195  ;;  %v2267_v43 = vmul.f32 0.5, %v2266_v32  ;;  %vm2270_vm4 = vweird.f32 %v3998_v23  ;;  %v4106_v3 = vsub.f32 %v3639_v52, %v1953_v36  ;;  %vm2260_vm6 = vweird.f32 %v3983_v34 }
 0x49a   : > { %v2309_v31 = vmul.f32 %v3190_v2, %v2308_v20  ;;  %v2258_v47 = vsub.f32 1.5, %v2257_v12  ;;  %v2275_v9 = vmul.f32 %v3196_v24, %v4028_v44  ;;  %vm4108_vm5 = vmor %vm2270_vm4, %vm2271_vm2  ;;  %vm2281_vm7 = vweird.f32 %v3196_v24 }
 0x49b   : > { %v2268_v26 = vsub.f32 1.5, %v2267_v43  ;;  %vm4118_vm8 = vmor %vm2260_vm6, %vm2261_vm3  ;;  %v2538_v20 = vmul.f32 %v4016_v4, %v2505_v57  ;;  %vm2280_vm9 = vweird.f32 %v4028_v44  ;;  %v1951_v34 = vmul.f32 %v3766_v58, %v3746_v48 }
 0x49c   : > { %v2313_v33 = vsel %vm2312_vm1, %v3190_v2, %v2309_v31  ;;  %v2276_v25 = vmul.f32 %v3196_v24, %v2275_v9  ;;  %v2259_v45 = vmul.f32 %v4037_v63, %v2258_v47  ;;  %v4103_v2 = vsub.f32 %v3624_v6, %v1950_v17  ;;  %vm2282_vm10 = vmor %vm2280_vm9, %vm2281_vm7 }
 0x49d   : > { %v2269_v27 = vmul.f32 %v4045_v59, %v2268_v26  ;;  %2082 = vadd.xlane.f32.xlu2 %v2032_v11  ;;  %v2507_v7 = vmul.f32 %v2313_v33, %v3811_v49  ;;  %v2539_v49 = vmul.f32 %v4016_v4, %v2506_v5  ;;  %v2571_v44 = vadd.f32 %v4031_v35, %v2538_v20 }
 0x49e   : > { %v2277_v18 = vmul.f32 0.5, %v2276_v25  ;;  %2078 = vadd.xlane.f32.xlu0 %v2030_v14  ;;  %v2263_v12 = vsel %vm4118_vm8, %v4037_v63, %v2259_v45  ;;  %v2014_v31 = vmul.f32 %v4103_v2, %v4103_v2  ;;  %v4140_v47 = vsub.f32 %v3629_v22, %v1951_v34 }
 0x49f   : > { %v2540_v56 = vmul.f32 %v4016_v4, %v2507_v7  ;;  %v2273_v23 = vsel %vm4108_vm5, %v4045_v59, %v2269_v27  ;;  %v2017_v59 = vmul.f32 %v4106_v3, %v4106_v3  ;;  %v2572_v15 = vadd.f32 %v4031_v35, %v2539_v49 }
 0x4a0   : > { %v2278_v39 = vsub.f32 1.5, %v2277_v18  ;;  %v2503_v43 = vmul.f32 %v2273_v23, %v3814_v61  ;;  %v2502_v48 = vmul.f32 %v2263_v12, %v3808_v60  ;;  %v2015_v26 = vmul.f32 %v4140_v47, %v4140_v47 }
 0x4a1   : > { %v2573_v52 = vadd.f32 %v4031_v35, %v2540_v56 }
 0x4a2   : > { %v2279_v17 = vmul.f32 %v3196_v24, %v2278_v39  ;;  %v2536_v61 = vmul.f32 %v4016_v4, %v2503_v43  ;;  %v2535_v36 = vmul.f32 %v4016_v4, %v2502_v48 }
 0x4a3   : > { %2612 = vmatpush.msra.mxu1 %v2573_v52 }
 0x4a4   : > { %v2283_v41 = vsel %vm2282_vm10, %v3196_v24, %v2279_v17  ;;  %v2568_v22 = vadd.f32 %v4031_v35, %v2535_v36 }
 0x4a5   : > { %2052 = vadd.xlane.f32.xlu2 %v2017_v59  ;;  %2613 = vmatpush.msra.mxu1 %v2572_v15  ;;  %v2504_v63 = vmul.f32 %v2283_v41, %v3824_v8  ;;  %v2569_v8 = vadd.f32 %v4031_v35, %v2536_v61 }
 0x4a6   : > { %2046 = vadd.xlane.f32.xlu0 %v2014_v31 }
 0x4a7   : > { %2614 = vmatpush.msra.mxu1 %v2571_v44  ;;  %v2537_v9 = vmul.f32 %v4016_v4, %v2504_v63 }
 0x4a9   : > { %v2570_v24 = vadd.f32 %v4031_v35, %v2537_v9 }
 0x4ab   : > { %2615 = vmatpush.msra.mxu1 %v2570_v24 }
 0x4ad   : > { %2048 = vadd.xlane.f32.xlu2 %v2015_v26  ;;  %2616 = vmatpush.msra.mxu1 %v2569_v8 }
 0x4af   : > { %2617 = vmatpush.msra.mxu1 %v2568_v22 }
 0x4b0   : > { %v2091_v60 = vpop.xlane.xlu0 %2090 }
 0x4b1   : > { %v2132_v5 = vmul.f32 %v2091_v60, %v3766_v58 }
 0x4b3   : > { %v2164_v14 = vadd.f32 1e-06, %v2132_v5 }
 0x4b5   : > { %3197 = vrsqrt.f32 %v2164_v14  ;;  %vm2400_vm13 = vweird.f32 %v2164_v14 }
 0x4b8   : > { %v2093_v11 = vpop.xlane.xlu1 %2092 }
 0x4b9   : > { %v2133_v33 = vmul.f32 %v2093_v11, %v3766_v58 }
 0x4bb   : > { %v2165_v27 = vadd.f32 1e-06, %v2133_v33  ;;  %v4159_v23 = vpop.eup %3197 }
 0x4bc   : > { %v2395_v17 = vmul.f32 %v4159_v23, %v2164_v14  ;;  %vm2401_vm11 = vweird.f32 %v4159_v23 }
 0x4bd   : > { %3199 = vrsqrt.f32 %v2165_v27  ;;  %vm4212_vm14 = vmor %vm2400_vm13, %vm2401_vm11  ;;  %vm2410_vm15 = vweird.f32 %v2165_v27 }
 0x4be   : > { %v2396_v43 = vmul.f32 %v4159_v23, %v2395_v17 }
 0x4c0   : > { %v2095_v25 = vpop.xlane.xlu2 %2094  ;;  %v2397_v36 = vmul.f32 0.5, %v2396_v43 }
 0x4c1   : > { %v2134_v57 = vmul.f32 %v2095_v25, %v3766_v58 }
 0x4c2   : > { %v2398_v5 = vsub.f32 1.5, %v2397_v36 }
 0x4c3   : > { %v4154_v32 = vadd.f32 1e-06, %v2134_v57  ;;  %v4164_v52 = vpop.eup %3199 }
 0x4c4   : > { %v2405_v34 = vmul.f32 %v4164_v52, %v2165_v27  ;;  %v2399_v17 = vmul.f32 %v4159_v23, %v2398_v5  ;;  %vm2411_vm12 = vweird.f32 %v4164_v52 }
 0x4c5   : > { %3201 = vrsqrt.f32 %v4154_v32  ;;  %vm4216_vm0 = vmor %vm2410_vm15, %vm2411_vm12  ;;  %vm2420_vm2 = vweird.f32 %v4154_v32 }
 0x4c6   : > { %v2406_v41 = vmul.f32 %v4164_v52, %v2405_v34  ;;  %v2403_v14 = vsel %vm4212_vm14, %v4159_v23, %v2399_v17 }
 0x4c7   : > { %v2516_v17 = vmul.f32 %v2403_v14, %v3838_v29 }
 0x4c8   : > { %v2097_v7 = vpop.xlane.xlu0 %2096  ;;  %v2407_v26 = vmul.f32 0.5, %v2406_v41 }
 0x4c9   : > { %v2135_v18 = vmul.f32 %v2097_v7, %v3766_v58 }
 0x4ca   : > { %v2408_v33 = vsub.f32 1.5, %v2407_v26 }
 0x4cb   : > { %v4157_v49 = vadd.f32 1e-06, %v2135_v18  ;;  %v4174_v59 = vpop.eup %3201 }
 0x4cc   : > { %v2415_v44 = vmul.f32 %v4174_v59, %v4154_v32  ;;  %v2409_v34 = vmul.f32 %v4164_v52, %v2408_v33  ;;  %vm2421_vm1 = vweird.f32 %v4174_v59 }
 0x4cd   : > { %3203 = vrsqrt.f32 %v4157_v49  ;;  %vm4242_vm4 = vmor %vm2420_vm2, %vm2421_vm1  ;;  %vm2430_vm5 = vweird.f32 %v4157_v49 }
 0x4ce   : > { %v2416_v8 = vmul.f32 %v4174_v59, %v2415_v44 }
 0x4d0   : > { %v2099_v45 = vpop.xlane.xlu1 %2098  ;;  %v2417_v7 = vmul.f32 0.5, %v2416_v8  ;;  %v2413_v8 = vsel %vm4216_vm0, %v4164_v52, %v2409_v34 }
 0x4d1   : > { %v2136_v56 = vmul.f32 %v2099_v45, %v3766_v58 }
 0x4d2   : > { %v2418_v41 = vsub.f32 1.5, %v2417_v7 }
 0x4d3   : > { %v4162_v39 = vadd.f32 1e-06, %v2136_v56  ;;  %v4176_v15 = vpop.eup %3203 }
 0x4d4   : > { %v2425_v61 = vmul.f32 %v4176_v15, %v4157_v49  ;;  %vm2431_vm3 = vweird.f32 %v4176_v15 }
 0x4d5   : > { %3205 = vrsqrt.f32 %v4162_v39  ;;  %vm4259_vm7 = vmor %vm2430_vm5, %vm2431_vm3  ;;  %vm2440_vm9 = vweird.f32 %v4162_v39 }
 0x4d6   : > { %v2426_v11 = vmul.f32 %v4176_v15, %v2425_v61 }
 0x4d8   : > { %v2101_v6 = vpop.xlane.xlu2 %2100 }
 0x4d9   : > { %v2137_v20 = vmul.f32 %v2101_v6, %v3766_v58  ;;  %v2427_v6 = vmul.f32 0.5, %v2426_v11 }
 0x4db   : > { %v4168_v12 = vadd.f32 1e-06, %v2137_v20  ;;  %v4183_v48 = vpop.eup %3205  ;;  %v2428_v36 = vsub.f32 1.5, %v2427_v6  ;;  %v2517_v6 = vmul.f32 %v2413_v8, %v3846_v62 }
 0x4dc   : > { %v2435_v22 = vmul.f32 %v4183_v48, %v4162_v39  ;;  %vm2441_vm6 = vweird.f32 %v4183_v48 }
 0x4dd   : > { %3207 = vrsqrt.f32 %v4168_v12  ;;  %v2429_v52 = vmul.f32 %v4176_v15, %v2428_v36  ;;  %vm4271_vm10 = vmor %vm2440_vm9, %vm2441_vm6  ;;  %vm2450_vm11 = vweird.f32 %v4168_v12 }
 0x4de   : > { %v2436_v57 = vmul.f32 %v4183_v48, %v2435_v22 }
 0x4e0   : > { %v2103_v31 = vpop.xlane.xlu0 %2102 }
 0x4e1   : > { %v2138_v63 = vmul.f32 %v2103_v31, %v3766_v58  ;;  %v2437_v31 = vmul.f32 0.5, %v2436_v57 }
 0x4e3   : > { %v4185_v9 = vpop.eup %3207  ;;  %v4189_v24 = vadd.f32 1e-06, %v2138_v63  ;;  %v2438_v11 = vsub.f32 1.5, %v2437_v31 }
 0x4e4   : > { %v2445_v60 = vmul.f32 %v4185_v9, %v4168_v12  ;;  %vm2451_vm8 = vweird.f32 %v4185_v9 }
 0x4e5   : > { %3209 = vrsqrt.f32 %v4189_v24  ;;  %vm4281_vm12 = vmor %vm2450_vm11, %vm2451_vm8  ;;  %vm2460_vm14 = vweird.f32 %v4189_v24 }
 0x4e6   : > { %v2446_v18 = vmul.f32 %v4185_v9, %v2445_v60  ;;  %v2419_v60 = vmul.f32 %v4174_v59, %v2418_v41 }
 0x4e8   : > { %v2105_v25 = vpop.xlane.xlu1 %2104  ;;  %v2447_v63 = vmul.f32 0.5, %v2446_v18  ;;  %v2423_v34 = vsel %vm4242_vm4, %v4174_v59, %v2419_v60  ;;  %v2433_v59 = vsel %vm4259_vm7, %v4176_v15, %v2429_v52 }
 0x4e9   : > { %v2139_v45 = vmul.f32 %v2105_v25, %v3766_v58  ;;  %v2518_v36 = vmul.f32 %v2423_v34, %v3852_v13 }
 0x4ea   : > { %v2448_v23 = vsub.f32 1.5, %v2447_v63 }
 0x4eb   : > { %v4201_v56 = vpop.eup %3209  ;;  %v4204_v20 = vadd.f32 1e-06, %v2139_v45 }
 0x4ec   : > { %v2455_v43 = vmul.f32 %v4201_v56, %v4189_v24  ;;  %v2449_v62 = vmul.f32 %v4185_v9, %v2448_v23  ;;  %vm2461_vm13 = vweird.f32 %v4201_v56 }
 0x4ed   : > { %3211 = vrsqrt.f32 %v4204_v20  ;;  %vm4316_vm15 = vmor %vm2460_vm14, %vm2461_vm13  ;;  %vm2470_vm1 = vweird.f32 %v4204_v20 }
 0x4ee   : > { %v2456_v26 = vmul.f32 %v4201_v56, %v2455_v43  ;;  %v2439_v43 = vmul.f32 %v4183_v48, %v2438_v11  ;;  %v2453_v13 = vsel %vm4281_vm12, %v4185_v9, %v2449_v62 }
 0x4f0   : > { %v2107_v22 = vpop.xlane.xlu0 %2106  ;;  %v2087_v27 = vpop.xlane.xlu1 %2086  ;;  %v2457_v7 = vmul.f32 0.5, %v2456_v26  ;;  %v2549_v26 = vmul.f32 %v4016_v4, %v2516_v17  ;;  %v2443_v15 = vsel %vm4271_vm10, %v4183_v48, %v2439_v43  ;;  %v2519_v48 = vmul.f32 %v2433_v59, %v3858_v40 }
 0x4f1   : > { %v2140_v5 = vmul.f32 %v2107_v22, %v3766_v58  ;;  %v2130_v33 = vmul.f32 %v2087_v27, %v3766_v58  ;;  %v2550_v22 = vmul.f32 %v4016_v4, %v2517_v6  ;;  %v2520_v18 = vmul.f32 %v2443_v15, %v3864_v28 }
 0x4f2   : > { %v2458_v41 = vsub.f32 1.5, %v2457_v7  ;;  %v2551_v40 = vmul.f32 %v4016_v4, %v2518_v36  ;;  %v2521_v6 = vmul.f32 %v2453_v13, %v3870_v50  ;;  %v2552_v24 = vmul.f32 %v4016_v4, %v2519_v48 }
 0x4f3   : > { %v4233_v25 = vpop.eup %3211  ;;  %v4236_v57 = vadd.f32 1e-06, %v2140_v5  ;;  %v4238_v45 = vadd.f32 1e-06, %v2130_v33  ;;  %v2553_v59 = vmul.f32 %v4016_v4, %v2520_v18  ;;  %v4335_v31 = vadd.f32 %v4031_v35, %v2549_v26 }
 0x4f4   : > { %v2465_v32 = vmul.f32 %v4233_v25, %v4204_v20  ;;  %v2459_v11 = vmul.f32 %v4201_v56, %v2458_v41  ;;  %vm2471_vm0 = vweird.f32 %v4233_v25  ;;  %v4332_v41 = vadd.f32 %v4031_v35, %v2550_v22 }
 0x4f5   : > { %3213 = vrsqrt.f32 %v4236_v57  ;;  %vm4343_vm2 = vmor %vm2470_vm1, %vm2471_vm0  ;;  %v4350_v39 = vadd.f32 %v4031_v35, %v2552_v24  ;;  %v4353_v20 = vadd.f32 %v4031_v35, %v2551_v40  ;;  %vm2480_vm3 = vweird.f32 %v4236_v57 }
 0x4f6   : > { %v2466_v29 = vmul.f32 %v4233_v25, %v2465_v32  ;;  %3215 = vrsqrt.f32 %v4238_v45  ;;  %v2463_v34 = vsel %vm4316_vm15, %v4201_v56, %v2459_v11  ;;  %vm2380_vm5 = vweird.f32 %v4238_v45 }
 0x4f7   : > { %v2522_v26 = vmul.f32 %v2463_v34, %v3876_v54 }
 0x4f8   : > { %v2467_v44 = vmul.f32 0.5, %v2466_v29  ;;  %v2109_v63 = vpop.xlane.xlu2 %2108  ;;  %v2061_v61 = vpop.xlane.xlu0 %2060 }
 0x4f9   : > { %v2141_v14 = vmul.f32 %v2109_v63, %v3766_v58  ;;  %v2117_v8 = vmul.f32 %v2061_v61, %v3766_v58  ;;  %v2057_v12 = vpop.xlane.xlu1 %2056  ;;  %v2554_v61 = vmul.f32 %v4016_v4, %v2521_v6  ;;  %v2555_v17 = vmul.f32 %v4016_v4, %v2522_v26 }
 0x4fa   : > { %v2115_v27 = vmul.f32 %v2057_v12, %v3766_v58  ;;  %v2468_v5 = vsub.f32 1.5, %v2467_v44 }
 0x4fb   : > { %v4294_v60 = vpop.eup %3213  ;;  %v4297_v33 = vadd.f32 1e-06, %v2141_v14  ;;  %v4299_v23 = vadd.f32 1e-06, %v2117_v8  ;;  %v4380_v18 = vadd.f32 %v4031_v35, %v2554_v61 }
 0x4fc   : > { %v4301_v52 = vpop.eup %3215  ;;  %v2475_v9 = vmul.f32 %v4294_v60, %v4236_v57  ;;  %v4305_v7 = vadd.f32 1e-06, %v2115_v27  ;;  %v2469_v50 = vmul.f32 %v4233_v25, %v2468_v5  ;;  %v4371_v5 = vadd.f32 %v4031_v35, %v2553_v59 }
 0x4fd   : > { %v2375_v32 = vmul.f32 %v4301_v52, %v4238_v45  ;;  %3217 = vrsqrt.f32 %v4297_v33  ;;  %vm2481_vm4 = vweird.f32 %v4294_v60  ;;  %vm2381_vm6 = vweird.f32 %v4301_v52 }
 0x4fe   : > { %v2476_v28 = vmul.f32 %v4294_v60, %v2475_v9  ;;  %3219 = vrsqrt.f32 %v4299_v23  ;;  %v2473_v8 = vsel %vm4343_vm2, %v4233_v25, %v2469_v50  ;;  %vm2490_vm7 = vweird.f32 %v4297_v33  ;;  %vm4406_vm9 = vmor %vm2480_vm3, %vm2481_vm4 }
 0x4ff   : > { %v2376_v43 = vmul.f32 %v4301_v52, %v2375_v32  ;;  %3221 = vrsqrt.f32 %v4305_v7  ;;  %v2523_v6 = vmul.f32 %v2473_v8, %v3882_v0  ;;  %vm2250_vm12 = vweird.f32 %v4299_v23  ;;  %vm4458_vm15 = vmor %vm2380_vm5, %vm2381_vm6 }
 0x500   : > { %v2477_v49 = vmul.f32 0.5, %v2476_v28  ;;  %v2089_v62 = vpop.xlane.xlu2 %2088  ;;  %v2085_v29 = vpop.xlane.xlu0 %2084  ;;  %vm2230_vm14 = vweird.f32 %v4305_v7 }
 0x501   : > { %v2131_v56 = vmul.f32 %v2089_v62, %v3766_v58  ;;  %v2129_v44 = vmul.f32 %v2085_v29, %v3766_v58  ;;  %v2081_v63 = vpop.xlane.xlu1 %2080  ;;  %v2377_v12 = vmul.f32 0.5, %v2376_v43 }
 0x502   : > { %v2127_v15 = vmul.f32 %v2081_v63, %v3766_v58  ;;  %v2478_v54 = vsub.f32 1.5, %v2477_v49  ;;  %v2556_v63 = vmul.f32 %v4016_v4, %v2523_v6 }
 0x503   : > { %v4355_v14 = vpop.eup %3217  ;;  %v4360_v22 = vadd.f32 1e-06, %v2131_v56  ;;  %v4362_v13 = vadd.f32 1e-06, %v2129_v44  ;;  %v2378_v28 = vsub.f32 1.5, %v2377_v12 }
 0x504   : > { %v4364_v27 = vpop.eup %3219  ;;  %v2485_v48 = vmul.f32 %v4355_v14, %v4297_v33  ;;  %v4368_v11 = vadd.f32 1e-06, %v2127_v15  ;;  %v2479_v34 = vmul.f32 %v4294_v60, %v2478_v54  ;;  %vm2491_vm8 = vweird.f32 %v4355_v14 }
 0x505   : > { %v4373_v9 = vpop.eup %3221  ;;  %v2245_v25 = vmul.f32 %v4364_v27, %v4299_v23  ;;  %3223 = vrsqrt.f32 %v4360_v22  ;;  %v2379_v15 = vmul.f32 %v4301_v52, %v2378_v28  ;;  %vm2251_vm10 = vweird.f32 %v4364_v27  ;;  %vm4433_vm11 = vmor %vm2490_vm7, %vm2491_vm8 }
 0x506   : > { %v2486_v40 = vmul.f32 %v4355_v14, %v2485_v48  ;;  %v2225_v32 = vmul.f32 %v4373_v9, %v4305_v7  ;;  %3225 = vrsqrt.f32 %v4362_v13  ;;  %v2483_v54 = vsel %vm4406_vm9, %v4294_v60, %v2479_v34  ;;  %vm4447_vm13 = vmor %vm2250_vm12, %vm2251_vm10 }
 0x507   : > { %v2246_v24 = vmul.f32 %v4364_v27, %v2245_v25  ;;  %3227 = vrsqrt.f32 %v4368_v11  ;;  %v2383_v45 = vsel %vm4458_vm15, %v4301_v52, %v2379_v15  ;;  %vm2231_vm0 = vweird.f32 %v4373_v9 }
 0x508   : > { %v2487_v50 = vmul.f32 0.5, %v2486_v40  ;;  %v2226_v43 = vmul.f32 %v4373_v9, %v2225_v32  ;;  %v2059_v49 = vpop.xlane.xlu2 %2058  ;;  %vm2390_vm1 = vweird.f32 %v4360_v22  ;;  %vm4504_vm2 = vmor %vm2230_vm14, %vm2231_vm0  ;;  %vm2370_vm4 = vweird.f32 %v4362_v13 }
 0x509   : > { %v2247_v0 = vmul.f32 0.5, %v2246_v24  ;;  %v2116_v62 = vmul.f32 %v2059_v49, %v3766_v58  ;;  %v2055_v29 = vpop.xlane.xlu0 %2054  ;;  %v2051_v44 = vpop.xlane.xlu1 %2050  ;;  %vm2350_vm9 = vweird.f32 %v4368_v11 }
 0x50a   : > { %v2488_v59 = vsub.f32 1.5, %v2487_v50  ;;  %v2114_v56 = vmul.f32 %v2055_v29, %v3766_v58  ;;  %v2227_v8 = vmul.f32 0.5, %v2226_v43  ;;  %v2112_v6 = vmul.f32 %v2051_v44, %v3766_v58 }
 0x50b   : > { %v4400_v61 = vpop.eup %3223  ;;  %v2248_v26 = vsub.f32 1.5, %v2247_v0  ;;  %v4411_v12 = vadd.f32 1e-06, %v2116_v62  ;;  %v4442_v50 = vadd.f32 %v4031_v35, %v2555_v17  ;;  %v2524_v29 = vmul.f32 %v2483_v54, %v3893_v30 }
 0x50c   : > { %v2489_v48 = vmul.f32 %v4355_v14, %v2488_v59  ;;  %v2385_v57 = vmul.f32 %v4400_v61, %v4360_v22  ;;  %v4420_v25 = vpop.eup %3225  ;;  %v4424_v32 = vadd.f32 1e-06, %v2114_v56  ;;  %v2228_v49 = vsub.f32 1.5, %v2227_v8 }
 0x50d   : > { %v2249_v40 = vmul.f32 %v4364_v27, %v2248_v26  ;;  %3229 = vrsqrt.f32 %v4411_v12  ;;  %v4427_v28 = vpop.eup %3227  ;;  %v2365_v34 = vmul.f32 %v4420_v25, %v4362_v13  ;;  %v4468_v59 = vadd.f32 %v4031_v35, %v2556_v63 }
 0x50e   : > { %v2386_v24 = vmul.f32 %v4400_v61, %v2385_v57  ;;  %v2493_v43 = vsel %vm4433_vm11, %v4355_v14, %v2489_v48  ;;  %v2345_v23 = vmul.f32 %v4427_v28, %v4368_v11  ;;  %3231 = vrsqrt.f32 %v4424_v32 }
 0x50f   : > { %v2253_v14 = vsel %vm4447_vm13, %v4364_v27, %v2249_v40  ;;  %v2366_v0 = vmul.f32 %v4420_v25, %v2365_v34  ;;  %v4474_v44 = vadd.f32 1e-06, %v2112_v6  ;;  %v2525_v27 = vmul.f32 %v2493_v43, %v3927_v19 }
 0x510   : > { %v2083_v62 = vpop.xlane.xlu2 %2082  ;;  %v2387_v56 = vmul.f32 0.5, %v2386_v24  ;;  %v4483_v8 = vmul.f32 %v4373_v9, %v2228_v49  ;;  %v2346_v52 = vmul.f32 %v4427_v28, %v2345_v23  ;;  %v2501_v15 = vmul.f32 %v2253_v14, %v3911_v10 }
 0x511   : > { %v2079_v36 = vpop.xlane.xlu0 %2078  ;;  %v2128_v26 = vmul.f32 %v2083_v62, %v3766_v58  ;;  %3233 = vrsqrt.f32 %v4474_v44  ;;  %v2367_v19 = vmul.f32 0.5, %v2366_v0  ;;  %v2557_v48 = vmul.f32 %v4016_v4, %v2524_v29 }
 0x512   : > { %v2126_v30 = vmul.f32 %v2079_v36, %v3766_v58  ;;  %v4493_v57 = vmul.f32 %v2383_v45, %v3888_v1  ;;  %v2388_v40 = vsub.f32 1.5, %v2387_v56  ;;  %v2534_v24 = vmul.f32 %v4016_v4, %v2501_v15 }
 0x513   : > { %v4480_v63 = vpop.eup %3229  ;;  %v4495_v6 = vadd.f32 1e-06, %v2128_v26  ;;  %vm2391_vm3 = vweird.f32 %v4400_v61  ;;  %vm2240_vm5 = vweird.f32 %v4411_v12  ;;  %v2558_v34 = vmul.f32 %v4016_v4, %v2525_v27 }
 0x514   : > { %v2235_v54 = vmul.f32 %v4480_v63, %v4411_v12  ;;  %v4497_v60 = vadd.f32 1e-06, %v2126_v30  ;;  %v4513_v43 = vpop.eup %3231  ;;  %v2233_v7 = vsel %vm4504_vm2, %v4373_v9, %v4483_v8  ;;  %vm2371_vm6 = vweird.f32 %v4420_v25  ;;  %vm4543_vm11 = vmor %vm2390_vm1, %vm2391_vm3 }
 0x515   : > { %v2347_v33 = vmul.f32 0.5, %v2346_v52  ;;  %3235 = vrsqrt.f32 %v4495_v6  ;;  %v2368_v49 = vsub.f32 1.5, %v2367_v19  ;;  %vm2351_vm7 = vweird.f32 %v4427_v28  ;;  %vm4581_vm14 = vmor %vm2370_vm4, %vm2371_vm6 }
 0x516   : > { %v2236_v1 = vmul.f32 %v4480_v63, %v2235_v54  ;;  %v2215_v17 = vmul.f32 %v4513_v43, %v4424_v32  ;;  %vm2220_vm8 = vweird.f32 %v4424_v32  ;;  %v2389_v62 = vmul.f32 %v4400_v61, %v2388_v40  ;;  %vm4623_vm3 = vmor %vm2350_vm9, %vm2351_vm7 }
 0x517   : > { %v4525_v0 = vpop.eup %3233  ;;  %3237 = vrsqrt.f32 %v4497_v60  ;;  %v2567_v9 = vadd.f32 %v4031_v35, %v2534_v24  ;;  %v2591_v29 = vadd.f32 %v4031_v35, %v2558_v34  ;;  %vm2241_vm10 = vweird.f32 %v4480_v63 }
 0x518   : > { %v2237_v23 = vmul.f32 0.5, %v2236_v1  ;;  %v2053_v14 = vpop.xlane.xlu2 %2052  ;;  %v2216_v36 = vmul.f32 %v4513_v43, %v2215_v17  ;;  %v2195_v27 = vmul.f32 %v4525_v0, %v4474_v44  ;;  %v2348_v26 = vsub.f32 1.5, %v2347_v33  ;;  %vm4561_vm12 = vmor %vm2240_vm5, %vm2241_vm10 }
 0x519   : > { %v2047_v45 = vpop.xlane.xlu0 %2046  ;;  %2618 = vmatpush.msra.mxu1 %v2567_v9  ;;  %2630 = vmatpush.msra.mxu2 %v2591_v29  ;;  %v2590_v30 = vadd.f32 %v4031_v35, %v2557_v48  ;;  %v2113_v8 = vmul.f32 %v2053_v14, %v3766_v58  ;;  %v4548_v19 = vmul.f32 %v4420_v25, %v2368_v49  ;;  %vm2221_vm13 = vweird.f32 %v4513_v43 }
 0x51a   : > { %v2238_v56 = vsub.f32 1.5, %v2237_v23  ;;  %v2110_v52 = vmul.f32 %v2047_v45, %v3766_v58  ;;  %v2217_v40 = vmul.f32 0.5, %v2216_v36  ;;  %v2196_v48 = vmul.f32 %v4525_v0, %v2195_v27  ;;  %vm4604_vm0 = vmor %vm2220_vm8, %vm2221_vm13 }
 0x51b   : > { %v4552_v24 = vpop.eup %3235  ;;  %v2393_v10 = vsel %vm4543_vm11, %v4400_v61, %v2389_v62  ;;  %2631 = vmatpush.msra.mxu2 %v2590_v30  ;;  %v4566_v1 = vadd.f32 1e-06, %v2113_v8  ;;  %v4586_v14 = vmul.f32 %v4427_v28, %v2348_v26  ;;  %vm2360_vm15 = vweird.f32 %v4495_v6 }
 0x51c   : > { %v2239_v54 = vmul.f32 %v4480_v63, %v2238_v56  ;;  %v4568_v34 = vadd.f32 1e-06, %v2110_v52  ;;  %v2218_v61 = vsub.f32 1.5, %v2217_v40  ;;  %v2197_v49 = vmul.f32 0.5, %v2196_v48 }
 0x51d   : > { %v2355_v12 = vmul.f32 %v4552_v24, %v4495_v6  ;;  %v4575_v23 = vpop.eup %3237  ;;  %3239 = vrsqrt.f32 %v4566_v1  ;;  %2632 = vmatpush.msra.mxu2 %v4468_v59  ;;  %v2373_v13 = vsel %vm4581_vm14, %v4420_v25, %v4548_v19  ;;  %vm2200_vm1 = vweird.f32 %v4474_v44 }
 0x51e   : > { %v2243_v33 = vsel %vm4561_vm12, %v4480_v63, %v2239_v54  ;;  %v2499_v63 = vmul.f32 %v2233_v7, %v3918_v46  ;;  %v2219_v62 = vmul.f32 %v4513_v43, %v2218_v61  ;;  %v2335_v29 = vmul.f32 %v4575_v23, %v4497_v60 }
 0x51f   : > { %v2356_v9 = vmul.f32 %v4552_v24, %v2355_v12  ;;  %3241 = vrsqrt.f32 %v4568_v34  ;;  %2633 = vmatpush.msra.mxu2 %v4442_v50  ;;  %v2500_v25 = vmul.f32 %v2243_v33, %v4010_v42  ;;  %v2515_v7 = vmul.f32 %v2393_v10, %v3969_v51 }
 0x520   : > { %v2049_v45 = vpop.xlane.xlu2 %2048  ;;  %v2223_v32 = vsel %vm4604_vm0, %v4513_v43, %v2219_v62  ;;  %v2198_v56 = vsub.f32 1.5, %v2197_v49  ;;  %v2336_v27 = vmul.f32 %v4575_v23, %v2335_v29  ;;  %vm2340_vm2 = vweird.f32 %v4497_v60 }
 0x521   : > { %v2111_v46 = vmul.f32 %v2049_v45, %v3766_v58  ;;  %v2357_v36 = vmul.f32 0.5, %v2356_v9  ;;  %2634 = vmatpush.msra.mxu2 %v4380_v18  ;;  %v2533_v42 = vmul.f32 %v4016_v4, %v2500_v25  ;;  %v2532_v50 = vmul.f32 %v4016_v4, %v2499_v63 }
 0x522   : > { %v2498_v43 = vmul.f32 %v2223_v32, %v3963_v55  ;;  %v2353_v26 = vsel %vm4623_vm3, %v4427_v28, %v4586_v14  ;;  %vm2361_vm4 = vweird.f32 %v4552_v24  ;;  %v2337_v30 = vmul.f32 0.5, %v2336_v27 }
 0x523   : > { %v4628_v51 = vadd.f32 1e-06, %v2111_v46  ;;  %v2358_v11 = vsub.f32 1.5, %v2357_v36  ;;  %v4638_v8 = vpop.eup %3239  ;;  %vm2201_vm5 = vweird.f32 %v4525_v0  ;;  %2635 = vmatpush.msra.mxu2 %v4371_v5  ;;  %v2566_v18 = vadd.f32 %v4031_v35, %v2533_v42  ;;  %vm4654_vm6 = vmor %vm2360_vm15, %vm2361_vm4 }
 0x524   : > { %v2547_v55 = vmul.f32 %v4016_v4, %v4493_v57  ;;  %v2199_v52 = vmul.f32 %v4525_v0, %v2198_v56  ;;  %v2338_v15 = vsub.f32 1.5, %v2337_v30  ;;  %v2205_v19 = vmul.f32 %v4638_v8, %v4566_v1  ;;  %vm4678_vm9 = vmor %vm2200_vm1, %vm2201_vm5 }
 0x525   : > { %3243 = vrsqrt.f32 %v4628_v51  ;;  %v2359_v28 = vmul.f32 %v4552_v24, %v2358_v11  ;;  %v4650_v54 = vpop.eup %3241  ;;  %vm2341_vm7 = vweird.f32 %v4575_v23  ;;  %2636 = vmatpush.msra.mxu2 %v4350_v39  ;;  %2619 = vmatpush.msra.mxu1 %v2566_v18  ;;  %v2565_v57 = vadd.f32 %v4031_v35, %v2532_v50 }
 0x526   : > { %v2531_v40 = vmul.f32 %v4016_v4, %v2498_v43  ;;  %v2548_v48 = vmul.f32 %v4016_v4, %v2515_v7  ;;  %v2339_v6 = vmul.f32 %v4575_v23, %v2338_v15  ;;  %v2206_v22 = vmul.f32 %v4638_v8, %v2205_v19  ;;  %vm4692_vm11 = vmor %vm2340_vm2, %vm2341_vm7 }
 0x527   : > { %v2363_v10 = vsel %vm4654_vm6, %v4552_v24, %v2359_v28  ;;  %v2175_v33 = vmul.f32 %v4650_v54, %v4568_v34  ;;  %vm2210_vm8 = vweird.f32 %v4566_v1  ;;  %2637 = vmatpush.msra.mxu2 %v4353_v20  ;;  %2620 = vmatpush.msra.mxu1 %v2565_v57  ;;  %v2513_v61 = vmul.f32 %v2373_v13, %v3951_v21 }
 0x528   : > { %v2564_v39 = vadd.f32 %v4031_v35, %v2531_v40  ;;  %v2592_v49 = vlaneseq  ;;  %v2207_v12 = vmul.f32 0.5, %v2206_v22  ;;  %vm2180_vm10 = vweird.f32 %v4568_v34 }
 0x529   : > { %v2176_v17 = vmul.f32 %v4650_v54, %v2175_v33  ;;  %v2512_v20 = vmul.f32 %v2363_v10, %v4062_v38  ;;  %v2203_v21 = vsel %vm4678_vm9, %v4525_v0, %v2199_v52  ;;  %vm2211_vm12 = vweird.f32 %v4638_v8  ;;  %2638 = vmatpush.msra.mxu2 %v4332_v41 }
 0x52a   : > { %2621 = vmatpush.msra.mxu1 %v2564_v39  ;;  %v2581_v38 = vadd.f32 %v4031_v35, %v2548_v48  ;;  %v2546_v63 = vmul.f32 %v4016_v4, %v2513_v61  ;;  %v2343_v0 = vsel %vm4692_vm11, %v4575_v23, %v2339_v6  ;;  %v2208_v13 = vsub.f32 1.5, %v2207_v12  ;;  %vm2212_vm14 = vmor %vm2210_vm8, %vm2211_vm12  ;;  %v3247_v48 = vld [vmem:[%s4770_s6] sm:$0xff] }
 0x52b   : > { %v3244_v14 = vpop.eup %3243  ;;  %v2177_v62 = vmul.f32 0.5, %v2176_v17  ;;  %vm2181_vm13 = vweird.f32 %v4650_v54  ;;  %2639 = vmatpush.msra.mxu2 %v4335_v31  ;;  %v2580_v9 = vadd.f32 %v4031_v35, %v2547_v55  ;;  %v2511_v41 = vmul.f32 %v2353_v26, %v3935_v16 }
 0x52c   : > { %v2185_v60 = vmul.f32 %v3244_v14, %v4628_v51  ;;  %v2593_v29 = vshrl.u32 %v2592_v49, 7  ;;  %v2209_v45 = vmul.f32 %v4638_v8, %v2208_v13  ;;  %v2545_v25 = vmul.f32 %v4016_v4, %v2512_v20  ;;  %vm4723_vm15 = vmor %vm2180_vm10, %vm2181_vm13 }
 0x52d   : > { %v2178_v59 = vsub.f32 1.5, %v2177_v62  ;;  %2640 = vmatpush.msra.mxu2 %v2581_v38  ;;  %v2579_v23 = vadd.f32 %v4031_v35, %v2546_v63  ;;  %v2510_v31 = vmul.f32 %v2343_v0, %v4059_v37  ;;  %v2496_v7 = vmul.f32 %v2203_v21, %v3959_v53 }
 0x52e   : > { %v2186_v46 = vmul.f32 %v3244_v14, %v2185_v60  ;;  %v2595_v16 = vand.u32 127, %v2592_v49  ;;  %v2213_v32 = vsel %vm2212_vm14, %v4638_v8, %v2209_v45  ;;  %v2597_v27 = vmul.u32 32, %v2593_v29 }
 0x52f   : > { %v2179_v56 = vmul.f32 %v4650_v54, %v2178_v59  ;;  %2641 = vmatpush.msra.mxu2 %v2580_v9  ;;  %v2544_v37 = vmul.f32 %v4016_v4, %v2511_v41  ;;  %v2497_v53 = vmul.f32 %v2213_v32, %v4106_v3  ;;  %v2600_v42 = vadd.s32 1, %v2593_v29 }
 0x530   : > { %v2187_v36 = vmul.f32 0.5, %v2186_v46  ;;  %v2596_v58 = vadd.s32 128, %v2595_v16  ;;  %vm2191_vm0 = vweird.f32 %v3244_v14  ;;  %v2578_v26 = vadd.f32 %v4031_v35, %v2545_v25 }
 0x531   : > { %v2183_v50 = vsel %vm4723_vm15, %v4650_v54, %v2179_v56  ;;  %2642 = vmatpush.msra.mxu2 %v2579_v23  ;;  %v2543_v34 = vmul.f32 %v4016_v4, %v2510_v31  ;;  %v2530_v11 = vmul.f32 %v4016_v4, %v2497_v53  ;;  %v2529_v30 = vmul.f32 %v4016_v4, %v2496_v7 }
 0x532   : > { %v2188_v43 = vsub.f32 1.5, %v2187_v36  ;;  %v2601_v8 = vmul.u32 32, %v2600_v42  ;;  %vm2190_vm1 = vweird.f32 %v4628_v51  ;;  %vm4737_vm2 = vcmp.ge.s32.totalorder %v2596_v58, %v2597_v27 }
 0x533   : > { %vm2192_vm3 = vmor %vm2190_vm1, %vm2191_vm0  ;;  %2643 = vmatpush.msra.mxu2 %v2578_v26  ;;  %v2577_v55 = vadd.f32 %v4031_v35, %v2544_v37  ;;  %v2563_v52 = vadd.f32 %v4031_v35, %v2530_v11  ;;  %v2494_v28 = vmul.f32 %v2183_v50, %v4103_v2  ;;  %v2576_v19 = vadd.f32 %v4031_v35, %v2543_v34 }
 0x534   : > { %v2189_v18 = vmul.f32 %v3244_v14, %v2188_v43  ;;  %vm2603_vm4 = vcmp.lt.s32.totalorder %v2596_v58, %v2601_v8  ;;  %v2562_v51 = vadd.f32 %v4031_v35, %v2529_v30  ;;  %v3257_v2 = vmov 1.0  }
 0x535   : > { %2644 = vmatpush.msra.mxu2 %v2577_v55  ;;  %2622 = vmatpush.msra.mxu1 %v2563_v52  ;;  %vm2605_vm5 = vmand %vm4737_vm2, %vm2603_vm4  ;;  %v2527_v57 = vmul.f32 %v4016_v4, %v2494_v28  ;;  %vm2598_vm6 = vcmp.ge.s32.totalorder %v2595_v16, %v2597_v27  ;;  %vm2602_vm7 = vcmp.lt.s32.totalorder %v2595_v16, %v2601_v8  ;;  %v2650_v10 = vperm.slane %v3247_v48, 7 }
 0x536   : > { %v2193_v15 = vsel %vm2192_vm3, %v3244_v14, %v2189_v18  ;;  %vm2604_vm8 = vmand %vm2598_vm6, %vm2602_vm7  ;;  %v2655_v39 = vstv %s2654_s17  ;;  %vm2657_vm9 = vcmask 7168  }
 0x537   : > { %v2495_v54 = vmul.f32 %v2193_v15, %v4140_v47  ;;  %2645 = vmatpush.msra.mxu2 %v2576_v19  ;;  %2623 = vmatpush.msra.mxu1 %v2562_v51  ;;  %v2560_v47 = vadd.f32 %v4031_v35, %v2527_v57 }
 0x538   : > { %2959 = vmatmul.msk.f32.vlgmr.msra.gmra.mxu2 %vm2605_vm5, %v3257_v2 }
 0x539   : > { %v2528_v5 = vmul.f32 %v4016_v4, %v2495_v54 }
 0x53b   : > { %v2561_v40 = vadd.f32 %v4031_v35, %v2528_v5 }
 0x53d   : > { %2624 = vmatpush.msra.mxu1 %v2561_v40 }
 0x53f   : > { %2625 = vmatpush.msra.mxu1 %v2560_v47 }
 0x540   : > { %2958 = vmatmul.msk.f32.vlgmr.msra.gmra.mxu1 %vm2604_vm8, %v3257_v2 }
 0x5bb   : > { %v2647_v6 = vpop.f32.mrf.mxu2 }
 0x5bd   : > { %v2627_v4 = vpop.f32.mrf.mxu1 }
 0x5be   : > { %v2648_v22 = vadd.f32 %v2647_v6, %v2627_v4 }
 0x5c0   : > { %v2651_v33 = vmul.f32 %v2650_v10, %v2648_v22 }
 0x5c2   : > { %2652 = vadd.xlane.f32.xlu1 %v2651_v33 }
 0x635   : > { %v2653_v35 = vpop.xlane.xlu1 %2652 }
 0x636   : > { %v2656_v61 = vadd.f32 %v2655_v39, %v2653_v35 }
 0x638   : > { %2658 = vst.msk [vmem:[%s306_s21] sm:$0xff] %vm2657_vm9, %v2656_v61 }
 0x639 PF: > { %s19_s29 = sadd.s32 1, %s3254_s29  }
 0x63a   : > { %p16_p5 = scmp.ge.s32.totalorder %s19_s29, 6  }
 0x63c   :  { %18 = sbr.rel (!%p16_p5) target bundleno = 2 (0x2), region = 82 }

</bundles_post_ra>
